<compile_context>
chip_gen: v7x
topology: tpu7x:2x2x1
jax: 0.10.0
libtpu: 0.0.40
codegen_flags: <defaults>
</compile_context>

<pallas_src>
import math

import numpy as np
import jax
import jax.numpy as jnp
from jax.experimental import pallas as pl
from jax.experimental.pallas import tpu as pltpu


# ----------------------------------------------------------------------------
# Fused forward kernel: 9 small matmuls, everything stays in VMEM.
# ----------------------------------------------------------------------------
def _cmd_input_kernel(x_ref, a_ref, c_ref,
                      a1_ref, b1_ref, a2_ref, b2_ref,
                      wp_ref, bp_ref,
                      wm_ref, wc_ref, bmc_ref,
                      wja_ref, wjb_ref, bj_ref,
                      wha_ref, whs_ref, bh_ref,
                      wo_ref, bo_ref,
                      out_ref):
    def mm(x, w_ref):
        return jnp.dot(x, w_ref[...], preferred_element_type=jnp.float32)

    def relu(v):
        return jnp.maximum(v, 0.0)

    # Perception: conv1+bn+relu, conv2+bn+relu (as dense matmuls over the
    # NCHW-flattened sample), then perception FC.  Padded lanes stay zero.
    h1 = relu(mm(x_ref[...], a1_ref) + b1_ref[...])          # (B, 512), valid 0:392
    h2 = relu(mm(h1, a2_ref) + b2_ref[...])                  # (B, 256), valid 0:144
    px = relu(mm(h2, wp_ref) + bp_ref[...])                  # (B, 128), valid 0:64

    # Measurement + command FCs packed as [m(0:32) | c(32:64)] in one block.
    mc = relu(mm(a_ref[...], wm_ref) + mm(c_ref[...], wc_ref) + bmc_ref[...])

    # Join ('cat' of [px, m, c]) expressed as block matmuls (no lane concat).
    j = relu(mm(px, wja_ref) + mm(mc, wjb_ref) + bj_ref[...])  # valid 0:64

    # Fused branch hidden layers: cols 0:64 action hidden (from j),
    # cols 64:128 speed hidden (from px — original speed_branch(x)).
    hid = relu(mm(j, wha_ref) + mm(px, whs_ref) + bh_ref[...])

    # Final lane-dense store: cols 0:3 = action targets, col 3 = speed.
    out_ref[...] = (mm(hid, wo_ref) + bo_ref[...]).astype(out_ref.dtype)


def cmd_input_forward(P, x, a, c):
    """x: (B, 3, 16, 16) NCHW, a: (B, 1), c: (B, 4) -> [action (B,3), speed (B,1)]."""
    B = x.shape[0]
    x_flat = x.reshape(B, -1).astype(jnp.float32)     # NCHW channel-major flatten
    inputs = (x_flat, a.astype(jnp.float32), c.astype(jnp.float32)) + tuple(P["fused"])
    out = pl.pallas_call(
        _cmd_input_kernel,
        out_shape=jax.ShapeDtypeStruct((B, 128), jnp.float32),
        grid=(1,),
        in_specs=[pl.BlockSpec(t.shape, lambda i: (0, 0)) for t in inputs],
        out_specs=pl.BlockSpec((B, 128), lambda i: (0, 0)),
        compiler_params=pltpu.CompilerParams(dimension_semantics=("arbitrary",)),
    )(*inputs)
    return [out[:, 0:3], out[:, 3:4]]


# ----------------------------------------------------------------------------
# Init: xavier_uniform weights, bias 0.1, eval-mode BN folded; convs folded to
# dense matrices; everything placed/padded into 128-lane blocks once at init.
# ----------------------------------------------------------------------------
_BN_EPS = 1e-5
_BN_SCALE = 1.0 / math.sqrt(1.0 + _BN_EPS)   # eval-mode BatchNorm, default stats


def _xavier_uniform(key, shape, fan_in, fan_out):
    bound = math.sqrt(6.0 / (fan_in + fan_out))
    return jax.random.uniform(key, shape, jnp.float32, -bound, bound)


def _conv_to_dense(w, H, W, stride):
    """Dense A such that y_flat = x_flat @ A equals Conv2d(stride, VALID) with
    NCHW flattening on both sides and PyTorch (Cout, Cin, kh, kw) weights."""
    w = np.asarray(w, np.float32)
    Cout, Cin, kh, kw = w.shape
    OH = (H - kh) // stride + 1
    OW = (W - kw) // stride + 1
    A = np.zeros((Cin * H * W, Cout * OH * OW), np.float32)
    for co in range(Cout):
        for ci in range(Cin):
            for i in range(kh):
                for j in range(kw):
                    val = w[co, ci, i, j]
                    for oh in range(OH):
                        ih = stride * oh + i
                        for ow in range(OW):
                            iw = stride * ow + j
                            A[ci * H * W + ih * W + iw,
                              co * OH * OW + oh * OW + ow] = val
    return A, OH, OW


def _pad2(a, rows, cols):
    a = np.asarray(a, np.float32)
    out = np.zeros((rows, cols), np.float32)
    out[: a.shape[0], : a.shape[1]] = a
    return out


def init_params(key):
    keys = jax.random.split(key, 10)

    # ---- raw parameters (PyTorch layouts; BN already folded into conv) ----
    w1 = _xavier_uniform(keys[0], (8, 3, 3, 3), 3 * 9, 8 * 9) * _BN_SCALE
    b1 = jnp.full((8,), 0.1, jnp.float32) * _BN_SCALE
    w2 = _xavier_uniform(keys[1], (16, 8, 3, 3), 8 * 9, 16 * 9) * _BN_SCALE
    b2 = jnp.full((16,), 0.1, jnp.float32) * _BN_SCALE

    def lin(k, n_in, n_out):
        w = _xavier_uniform(k, (n_out, n_in), n_in, n_out).T    # stored (K, N)
        b = jnp.full((n_out,), 0.1, jnp.float32)
        return w, b

    p_fc = lin(keys[2], 144, 64)    # perception FC (end_layer=False -> relu)
    m_fc = lin(keys[3], 1, 32)      # measurements FC
    c_fc = lin(keys[4], 4, 32)      # command FC
    j_fc = lin(keys[5], 128, 64)    # join after_process FC
    act1 = lin(keys[6], 64, 64)     # action hidden (relu)
    act2 = lin(keys[7], 64, 3)      # action output (no relu)
    spd1 = lin(keys[8], 64, 64)     # speed hidden (relu)
    spd2 = lin(keys[9], 64, 1)      # speed output (no relu)

    raw = dict(w1=w1, b1=b1, w2=w2, b2=b2, p_fc=p_fc, m_fc=m_fc, c_fc=c_fc,
               j_fc=j_fc, act1=act1, act2=act2, spd1=spd1, spd2=spd2)

    # ---- fold convs into dense matrices; pad everything to 128-lane blocks ----
    A1, OH1, OW1 = _conv_to_dense(w1, 16, 16, 2)      # (768, 392), 16x16 -> 7x7
    A2, OH2, OW2 = _conv_to_dense(w2, OH1, OW1, 2)    # (392, 144), 7x7 -> 3x3
    b1_row = np.repeat(np.asarray(b1), OH1 * OW1)     # (392,) NCHW flatten order
    b2_row = np.repeat(np.asarray(b2), OH2 * OW2)     # (144,)

    A1p = _pad2(A1, 768, 512)
    b1p = _pad2(b1_row[None, :], 1, 512)
    A2p = _pad2(A2, 512, 256)
    b2p = _pad2(b2_row[None, :], 1, 256)

    Wpp = _pad2(p_fc[0], 256, 128)
    bpp = _pad2(np.asarray(p_fc[1])[None, :], 1, 128)

    # measurement/command fused into one 128-wide block: [m(0:32) | c(32:64)]
    Wm = np.zeros((1, 128), np.float32); Wm[:, 0:32] = np.asarray(m_fc[0])
    Wc = np.zeros((4, 128), np.float32); Wc[:, 32:64] = np.asarray(c_fc[0])
    bmc = np.zeros((1, 128), np.float32)
    bmc[0, 0:32] = np.asarray(m_fc[1]); bmc[0, 32:64] = np.asarray(c_fc[1])

    # join weight split into the px-part and the [m|c]-part (block matmuls)
    Wj = np.asarray(j_fc[0])                          # (128, 64): rows [px|m|c]
    WjA = np.zeros((128, 128), np.float32); WjA[0:64, 0:64] = Wj[0:64]
    WjB = np.zeros((128, 128), np.float32)
    WjB[0:32, 0:64] = Wj[64:96]                       # measurement rows
    WjB[32:64, 0:64] = Wj[96:128]                     # command rows
    bj = np.zeros((1, 128), np.float32); bj[0, 0:64] = np.asarray(j_fc[1])

    # fused branch hidden: cols 0:64 action (from j), cols 64:128 speed (from px)
    WhA = np.zeros((128, 128), np.float32); WhA[0:64, 0:64] = np.asarray(act1[0])
    WhS = np.zeros((128, 128), np.float32); WhS[0:64, 64:128] = np.asarray(spd1[0])
    bh = np.zeros((1, 128), np.float32)
    bh[0, 0:64] = np.asarray(act1[1]); bh[0, 64:128] = np.asarray(spd1[1])

    # fused output: cols 0:3 action targets, col 3 speed
    Wo = np.zeros((128, 128), np.float32)
    Wo[0:64, 0:3] = np.asarray(act2[0]); Wo[64:128, 3:4] = np.asarray(spd2[0])
    bo = np.zeros((1, 128), np.float32)
    bo[0, 0:3] = np.asarray(act2[1]); bo[0, 3:4] = np.asarray(spd2[1])

    fused = tuple(jnp.asarray(t, jnp.float32) for t in
                  (A1p, b1p, A2p, b2p, Wpp, bpp, Wm, Wc, bmc,
                   WjA, WjB, bj, WhA, WhS, bh, Wo, bo))
    return {"raw": raw, "fused": fused}


# ----------------------------------------------------------------------------
# Pure-JAX reference (conv via lax.conv, HIGHEST precision) for validation.
# ----------------------------------------------------------------------------
def reference_forward(P, x, a, c):
    R = P["raw"]
    hp = jax.lax.Precision.HIGHEST

    def conv_relu(h, w, b, stride):
        y = jax.lax.conv_general_dilated(
            h, w, (stride, stride), "VALID",
            dimension_numbers=("NCHW", "OIHW", "NCHW"), precision=hp)
        return jnp.maximum(y + b.reshape(1, -1, 1, 1), 0.0)

    def fc(h, wb, relu=True):
        y = jnp.dot(h, wb[0], precision=hp) + wb[1]
        return jnp.maximum(y, 0.0) if relu else y

    h = conv_relu(x, R["w1"], R["b1"], 2)
    h = conv_relu(h, R["w2"], R["b2"], 2)
    px = fc(h.reshape(x.shape[0], -1), R["p_fc"])
    m = fc(a, R["m_fc"])
    cm = fc(c, R["c_fc"])
    j = fc(jnp.concatenate([px, m, cm], axis=1), R["j_fc"])
    act = fc(fc(j, R["act1"]), R["act2"], relu=False)
    spd = fc(fc(px, R["spd1"]), R["spd2"], relu=False)
    return act, spd


# TODO(synk): train-mode Dropout / BatchNorm statistics and the helper methods
# get_perception_layers / extract_branch are not part of the eval forward hot
# path and are not implemented.

if __name__ == "__main__":
    key = jax.random.PRNGKey(0)
    k_params, k_x, k_a, k_c = jax.random.split(key, 4)

    params = init_params(k_params)

    B = 2
    x = jax.random.normal(k_x, (B, 3, 16, 16), jnp.float32)   # NCHW image
    a = jax.random.normal(k_a, (B, 1), jnp.float32)           # measurement (speed)
    c_idx = jax.random.randint(k_c, (B,), 0, 4)
    c = jax.nn.one_hot(c_idx, 4, dtype=jnp.float32)           # command one-hot

    fwd = jax.jit(cmd_input_forward)
    outs = jax.block_until_ready(fwd(params, x, a, c))

    assert outs[0].shape == (B, 3), outs[0].shape    # action targets
    assert outs[1].shape == (B, 1), outs[1].shape    # speed prediction
    assert all(bool(jnp.all(jnp.isfinite(o))) for o in outs)

    ref_act, ref_spd = reference_forward(params, x, a, c)
    np.testing.assert_allclose(np.asarray(outs[0]), np.asarray(ref_act),
                               rtol=2e-3, atol=2e-3)
    np.testing.assert_allclose(np.asarray(outs[1]), np.asarray(ref_spd),
                               rtol=2e-3, atol=2e-3)

    print("KERNEL_OK")
</pallas_src>

<mosaic_0001>
module attributes {stable_mosaic.version = 11 : i64} {
  func.func @_cmd_input_kernel(%arg0: i32, %arg1: memref<2x768xf32, #tpu.memory_space<vmem>>, %arg2: memref<2x1xf32, #tpu.memory_space<vmem>>, %arg3: memref<2x4xf32, #tpu.memory_space<vmem>>, %arg4: memref<768x512xf32, #tpu.memory_space<vmem>>, %arg5: memref<1x512xf32, #tpu.memory_space<vmem>>, %arg6: memref<512x256xf32, #tpu.memory_space<vmem>>, %arg7: memref<1x256xf32, #tpu.memory_space<vmem>>, %arg8: memref<256x128xf32, #tpu.memory_space<vmem>>, %arg9: memref<1x128xf32, #tpu.memory_space<vmem>>, %arg10: memref<1x128xf32, #tpu.memory_space<vmem>>, %arg11: memref<4x128xf32, #tpu.memory_space<vmem>>, %arg12: memref<1x128xf32, #tpu.memory_space<vmem>>, %arg13: memref<128x128xf32, #tpu.memory_space<vmem>>, %arg14: memref<128x128xf32, #tpu.memory_space<vmem>>, %arg15: memref<1x128xf32, #tpu.memory_space<vmem>>, %arg16: memref<128x128xf32, #tpu.memory_space<vmem>>, %arg17: memref<128x128xf32, #tpu.memory_space<vmem>>, %arg18: memref<1x128xf32, #tpu.memory_space<vmem>>, %arg19: memref<128x128xf32, #tpu.memory_space<vmem>>, %arg20: memref<1x128xf32, #tpu.memory_space<vmem>>, %arg21: memref<2x128xf32, #tpu.memory_space<vmem>>) attributes {dimension_semantics = [#tpu.dimension_semantics<arbitrary>], iteration_bounds = array<i64: 1>, scalar_prefetch = 0 : i64, scratch_operands = 0 : i64, tpu.core_type = #tpu.core_type<tc>, window_params = [{pipeline_mode = #tpu.pipeline_mode<synchronous>, transform_indices = @transform_0, window_bounds = array<i64: 2, 768>}, {pipeline_mode = #tpu.pipeline_mode<synchronous>, transform_indices = @transform_1, window_bounds = array<i64: 2, 1>}, {pipeline_mode = #tpu.pipeline_mode<synchronous>, transform_indices = @transform_2, window_bounds = array<i64: 2, 4>}, {pipeline_mode = #tpu.pipeline_mode<synchronous>, transform_indices = @transform_3, window_bounds = array<i64: 768, 512>}, {pipeline_mode = #tpu.pipeline_mode<synchronous>, transform_indices = @transform_4, window_bounds = array<i64: 1, 512>}, {pipeline_mode = #tpu.pipeline_mode<synchronous>, transform_indices = @transform_5, window_bounds = array<i64: 512, 256>}, {pipeline_mode = #tpu.pipeline_mode<synchronous>, transform_indices = @transform_6, window_bounds = array<i64: 1, 256>}, {pipeline_mode = #tpu.pipeline_mode<synchronous>, transform_indices = @transform_7, window_bounds = array<i64: 256, 128>}, {pipeline_mode = #tpu.pipeline_mode<synchronous>, transform_indices = @transform_8, window_bounds = array<i64: 1, 128>}, {pipeline_mode = #tpu.pipeline_mode<synchronous>, transform_indices = @transform_9, window_bounds = array<i64: 1, 128>}, {pipeline_mode = #tpu.pipeline_mode<synchronous>, transform_indices = @transform_10, window_bounds = array<i64: 4, 128>}, {pipeline_mode = #tpu.pipeline_mode<synchronous>, transform_indices = @transform_11, window_bounds = array<i64: 1, 128>}, {pipeline_mode = #tpu.pipeline_mode<synchronous>, transform_indices = @transform_12, window_bounds = array<i64: 128, 128>}, {pipeline_mode = #tpu.pipeline_mode<synchronous>, transform_indices = @transform_13, window_bounds = array<i64: 128, 128>}, {pipeline_mode = #tpu.pipeline_mode<synchronous>, transform_indices = @transform_14, window_bounds = array<i64: 1, 128>}, {pipeline_mode = #tpu.pipeline_mode<synchronous>, transform_indices = @transform_15, window_bounds = array<i64: 128, 128>}, {pipeline_mode = #tpu.pipeline_mode<synchronous>, transform_indices = @transform_16, window_bounds = array<i64: 128, 128>}, {pipeline_mode = #tpu.pipeline_mode<synchronous>, transform_indices = @transform_17, window_bounds = array<i64: 1, 128>}, {pipeline_mode = #tpu.pipeline_mode<synchronous>, transform_indices = @transform_18, window_bounds = array<i64: 128, 128>}, {pipeline_mode = #tpu.pipeline_mode<synchronous>, transform_indices = @transform_19, window_bounds = array<i64: 1, 128>}, {pipeline_mode = #tpu.pipeline_mode<synchronous>, transform_indices = @transform_20, window_bounds = array<i64: 2, 128>}]} {
    %c0 = arith.constant 0 : index
    %c0_0 = arith.constant 0 : index
    %0 = vector.load %arg1[%c0, %c0_0] : memref<2x768xf32, #tpu.memory_space<vmem>>, vector<2x768xf32>
    %c0_1 = arith.constant 0 : index
    %c0_2 = arith.constant 0 : index
    %1 = vector.load %arg4[%c0_1, %c0_2] : memref<768x512xf32, #tpu.memory_space<vmem>>, vector<768x512xf32>
    %cst = arith.constant dense<0.000000e+00> : vector<2x512xf32>
    %2 = tpu.matmul %0, %1, %cst {dimension_numbers = #tpu.dot_dimension_numbers<[1], [0], [0], [1], [0, 0, 1, 1], [], []>} : vector<2x768xf32>, vector<768x512xf32>, vector<2x512xf32> -> vector<2x512xf32>
    %c0_3 = arith.constant 0 : index
    %c0_4 = arith.constant 0 : index
    %3 = vector.load %arg5[%c0_3, %c0_4] : memref<1x512xf32, #tpu.memory_space<vmem>>, vector<1x512xf32>
    %4 = vector.broadcast %3 : vector<1x512xf32> to vector<2x512xf32>
    %5 = arith.addf %2, %4 : vector<2x512xf32>
    %cst_5 = arith.constant 0.000000e+00 : f32
    %6 = vector.broadcast %cst_5 : f32 to vector<2x512xf32>
    %7 = arith.maximumf %5, %6 : vector<2x512xf32>
    %c0_6 = arith.constant 0 : index
    %c0_7 = arith.constant 0 : index
    %8 = vector.load %arg6[%c0_6, %c0_7] : memref<512x256xf32, #tpu.memory_space<vmem>>, vector<512x256xf32>
    %cst_8 = arith.constant dense<0.000000e+00> : vector<2x256xf32>
    %9 = tpu.matmul %7, %8, %cst_8 {dimension_numbers = #tpu.dot_dimension_numbers<[1], [0], [0], [1], [0, 0, 1, 1], [], []>} : vector<2x512xf32>, vector<512x256xf32>, vector<2x256xf32> -> vector<2x256xf32>
    %c0_9 = arith.constant 0 : index
    %c0_10 = arith.constant 0 : index
    %10 = vector.load %arg7[%c0_9, %c0_10] : memref<1x256xf32, #tpu.memory_space<vmem>>, vector<1x256xf32>
    %11 = vector.broadcast %10 : vector<1x256xf32> to vector<2x256xf32>
    %12 = arith.addf %9, %11 : vector<2x256xf32>
    %cst_11 = arith.constant 0.000000e+00 : f32
    %13 = vector.broadcast %cst_11 : f32 to vector<2x256xf32>
    %14 = arith.maximumf %12, %13 : vector<2x256xf32>
    %c0_12 = arith.constant 0 : index
    %c0_13 = arith.constant 0 : index
    %15 = vector.load %arg8[%c0_12, %c0_13] : memref<256x128xf32, #tpu.memory_space<vmem>>, vector<256x128xf32>
    %cst_14 = arith.constant dense<0.000000e+00> : vector<2x128xf32>
    %16 = tpu.matmul %14, %15, %cst_14 {dimension_numbers = #tpu.dot_dimension_numbers<[1], [0], [0], [1], [0, 0, 1, 1], [], []>} : vector<2x256xf32>, vector<256x128xf32>, vector<2x128xf32> -> vector<2x128xf32>
    %c0_15 = arith.constant 0 : index
    %c0_16 = arith.constant 0 : index
    %17 = vector.load %arg9[%c0_15, %c0_16] : memref<1x128xf32, #tpu.memory_space<vmem>>, vector<1x128xf32>
    %18 = vector.broadcast %17 : vector<1x128xf32> to vector<2x128xf32>
    %19 = arith.addf %16, %18 : vector<2x128xf32>
    %cst_17 = arith.constant 0.000000e+00 : f32
    %20 = vector.broadcast %cst_17 : f32 to vector<2x128xf32>
    %21 = arith.maximumf %19, %20 : vector<2x128xf32>
    %c0_18 = arith.constant 0 : index
    %c0_19 = arith.constant 0 : index
    %22 = vector.load %arg2[%c0_18, %c0_19] : memref<2x1xf32, #tpu.memory_space<vmem>>, vector<2x1xf32>
    %c0_20 = arith.constant 0 : index
    %c0_21 = arith.constant 0 : index
    %23 = vector.load %arg10[%c0_20, %c0_21] : memref<1x128xf32, #tpu.memory_space<vmem>>, vector<1x128xf32>
    %cst_22 = arith.constant dense<0.000000e+00> : vector<2x128xf32>
    %24 = tpu.matmul %22, %23, %cst_22 {dimension_numbers = #tpu.dot_dimension_numbers<[1], [0], [0], [1], [0, 0, 1, 1], [], []>} : vector<2x1xf32>, vector<1x128xf32>, vector<2x128xf32> -> vector<2x128xf32>
    %c0_23 = arith.constant 0 : index
    %c0_24 = arith.constant 0 : index
    %25 = vector.load %arg3[%c0_23, %c0_24] : memref<2x4xf32, #tpu.memory_space<vmem>>, vector<2x4xf32>
    %c0_25 = arith.constant 0 : index
    %c0_26 = arith.constant 0 : index
    %26 = vector.load %arg11[%c0_25, %c0_26] : memref<4x128xf32, #tpu.memory_space<vmem>>, vector<4x128xf32>
    %cst_27 = arith.constant dense<0.000000e+00> : vector<2x128xf32>
    %27 = tpu.matmul %25, %26, %cst_27 {dimension_numbers = #tpu.dot_dimension_numbers<[1], [0], [0], [1], [0, 0, 1, 1], [], []>} : vector<2x4xf32>, vector<4x128xf32>, vector<2x128xf32> -> vector<2x128xf32>
    %28 = arith.addf %24, %27 : vector<2x128xf32>
    %c0_28 = arith.constant 0 : index
    %c0_29 = arith.constant 0 : index
    %29 = vector.load %arg12[%c0_28, %c0_29] : memref<1x128xf32, #tpu.memory_space<vmem>>, vector<1x128xf32>
    %30 = vector.broadcast %29 : vector<1x128xf32> to vector<2x128xf32>
    %31 = arith.addf %28, %30 : vector<2x128xf32>
    %cst_30 = arith.constant 0.000000e+00 : f32
    %32 = vector.broadcast %cst_30 : f32 to vector<2x128xf32>
    %33 = arith.maximumf %31, %32 : vector<2x128xf32>
    %c0_31 = arith.constant 0 : index
    %c0_32 = arith.constant 0 : index
    %34 = vector.load %arg13[%c0_31, %c0_32] : memref<128x128xf32, #tpu.memory_space<vmem>>, vector<128x128xf32>
    %cst_33 = arith.constant dense<0.000000e+00> : vector<2x128xf32>
    %35 = tpu.matmul %21, %34, %cst_33 {dimension_numbers = #tpu.dot_dimension_numbers<[1], [0], [0], [1], [0, 0, 1, 1], [], []>} : vector<2x128xf32>, vector<128x128xf32>, vector<2x128xf32> -> vector<2x128xf32>
    %c0_34 = arith.constant 0 : index
    %c0_35 = arith.constant 0 : index
    %36 = vector.load %arg14[%c0_34, %c0_35] : memref<128x128xf32, #tpu.memory_space<vmem>>, vector<128x128xf32>
    %cst_36 = arith.constant dense<0.000000e+00> : vector<2x128xf32>
    %37 = tpu.matmul %33, %36, %cst_36 {dimension_numbers = #tpu.dot_dimension_numbers<[1], [0], [0], [1], [0, 0, 1, 1], [], []>} : vector<2x128xf32>, vector<128x128xf32>, vector<2x128xf32> -> vector<2x128xf32>
    %38 = arith.addf %35, %37 : vector<2x128xf32>
    %c0_37 = arith.constant 0 : index
    %c0_38 = arith.constant 0 : index
    %39 = vector.load %arg15[%c0_37, %c0_38] : memref<1x128xf32, #tpu.memory_space<vmem>>, vector<1x128xf32>
    %40 = vector.broadcast %39 : vector<1x128xf32> to vector<2x128xf32>
    %41 = arith.addf %38, %40 : vector<2x128xf32>
    %cst_39 = arith.constant 0.000000e+00 : f32
    %42 = vector.broadcast %cst_39 : f32 to vector<2x128xf32>
    %43 = arith.maximumf %41, %42 : vector<2x128xf32>
    %c0_40 = arith.constant 0 : index
    %c0_41 = arith.constant 0 : index
    %44 = vector.load %arg16[%c0_40, %c0_41] : memref<128x128xf32, #tpu.memory_space<vmem>>, vector<128x128xf32>
    %cst_42 = arith.constant dense<0.000000e+00> : vector<2x128xf32>
    %45 = tpu.matmul %43, %44, %cst_42 {dimension_numbers = #tpu.dot_dimension_numbers<[1], [0], [0], [1], [0, 0, 1, 1], [], []>} : vector<2x128xf32>, vector<128x128xf32>, vector<2x128xf32> -> vector<2x128xf32>
    %c0_43 = arith.constant 0 : index
    %c0_44 = arith.constant 0 : index
    %46 = vector.load %arg17[%c0_43, %c0_44] : memref<128x128xf32, #tpu.memory_space<vmem>>, vector<128x128xf32>
    %cst_45 = arith.constant dense<0.000000e+00> : vector<2x128xf32>
    %47 = tpu.matmul %21, %46, %cst_45 {dimension_numbers = #tpu.dot_dimension_numbers<[1], [0], [0], [1], [0, 0, 1, 1], [], []>} : vector<2x128xf32>, vector<128x128xf32>, vector<2x128xf32> -> vector<2x128xf32>
    %48 = arith.addf %45, %47 : vector<2x128xf32>
    %c0_46 = arith.constant 0 : index
    %c0_47 = arith.constant 0 : index
    %49 = vector.load %arg18[%c0_46, %c0_47] : memref<1x128xf32, #tpu.memory_space<vmem>>, vector<1x128xf32>
    %50 = vector.broadcast %49 : vector<1x128xf32> to vector<2x128xf32>
    %51 = arith.addf %48, %50 : vector<2x128xf32>
    %cst_48 = arith.constant 0.000000e+00 : f32
    %52 = vector.broadcast %cst_48 : f32 to vector<2x128xf32>
    %53 = arith.maximumf %51, %52 : vector<2x128xf32>
    %c0_49 = arith.constant 0 : index
    %c0_50 = arith.constant 0 : index
    %54 = vector.load %arg19[%c0_49, %c0_50] : memref<128x128xf32, #tpu.memory_space<vmem>>, vector<128x128xf32>
    %cst_51 = arith.constant dense<0.000000e+00> : vector<2x128xf32>
    %55 = tpu.matmul %53, %54, %cst_51 {dimension_numbers = #tpu.dot_dimension_numbers<[1], [0], [0], [1], [0, 0, 1, 1], [], []>} : vector<2x128xf32>, vector<128x128xf32>, vector<2x128xf32> -> vector<2x128xf32>
    %c0_52 = arith.constant 0 : index
    %c0_53 = arith.constant 0 : index
    %56 = vector.load %arg20[%c0_52, %c0_53] : memref<1x128xf32, #tpu.memory_space<vmem>>, vector<1x128xf32>
    %57 = vector.broadcast %56 : vector<1x128xf32> to vector<2x128xf32>
    %58 = arith.addf %55, %57 : vector<2x128xf32>
    %c0_54 = arith.constant 0 : index
    %c0_55 = arith.constant 0 : index
    %59 = vector.load %arg21[%c0_54, %c0_55] : memref<2x128xf32, #tpu.memory_space<vmem>>, vector<2x128xf32>
    tpu.vector_store %arg21[%c0_54, %c0_55], %58 {strides = array<i32>} : memref<2x128xf32, #tpu.memory_space<vmem>>, vector<2x128xf32>,
    return
  }
  func.func @transform_0(%arg0: i32) -> (i32, i32) {
    %c0_i32 = arith.constant 0 : i32
    %c0_i32_0 = arith.constant 0 : i32
    %c0_i32_1 = arith.constant 0 : i32
    return %c0_i32, %c0_i32_0 : i32, i32
  }
  func.func @transform_1(%arg0: i32) -> (i32, i32) {
    %c0_i32 = arith.constant 0 : i32
    %c0_i32_0 = arith.constant 0 : i32
    %c0_i32_1 = arith.constant 0 : i32
    return %c0_i32, %c0_i32_0 : i32, i32
  }
  func.func @transform_2(%arg0: i32) -> (i32, i32) {
    %c0_i32 = arith.constant 0 : i32
    %c0_i32_0 = arith.constant 0 : i32
    %c0_i32_1 = arith.constant 0 : i32
    return %c0_i32, %c0_i32_0 : i32, i32
  }
  func.func @transform_3(%arg0: i32) -> (i32, i32) {
    %c0_i32 = arith.constant 0 : i32
    %c0_i32_0 = arith.constant 0 : i32
    %c0_i32_1 = arith.constant 0 : i32
    return %c0_i32, %c0_i32_0 : i32, i32
  }
  func.func @transform_4(%arg0: i32) -> (i32, i32) {
    %c0_i32 = arith.constant 0 : i32
    %c0_i32_0 = arith.constant 0 : i32
    %c0_i32_1 = arith.constant 0 : i32
    return %c0_i32, %c0_i32_0 : i32, i32
  }
  func.func @transform_5(%arg0: i32) -> (i32, i32) {
    %c0_i32 = arith.constant 0 : i32
    %c0_i32_0 = arith.constant 0 : i32
    %c0_i32_1 = arith.constant 0 : i32
    return %c0_i32, %c0_i32_0 : i32, i32
  }
  func.func @transform_6(%arg0: i32) -> (i32, i32) {
    %c0_i32 = arith.constant 0 : i32
    %c0_i32_0 = arith.constant 0 : i32
    %c0_i32_1 = arith.constant 0 : i32
    return %c0_i32, %c0_i32_0 : i32, i32
  }
  func.func @transform_7(%arg0: i32) -> (i32, i32) {
    %c0_i32 = arith.constant 0 : i32
    %c0_i32_0 = arith.constant 0 : i32
    %c0_i32_1 = arith.constant 0 : i32
    return %c0_i32, %c0_i32_0 : i32, i32
  }
  func.func @transform_8(%arg0: i32) -> (i32, i32) {
    %c0_i32 = arith.constant 0 : i32
    %c0_i32_0 = arith.constant 0 : i32
    %c0_i32_1 = arith.constant 0 : i32
    return %c0_i32, %c0_i32_0 : i32, i32
  }
  func.func @transform_9(%arg0: i32) -> (i32, i32) {
    %c0_i32 = arith.constant 0 : i32
    %c0_i32_0 = arith.constant 0 : i32
    %c0_i32_1 = arith.constant 0 : i32
    return %c0_i32, %c0_i32_0 : i32, i32
  }
  func.func @transform_10(%arg0: i32) -> (i32, i32) {
    %c0_i32 = arith.constant 0 : i32
    %c0_i32_0 = arith.constant 0 : i32
    %c0_i32_1 = arith.constant 0 : i32
    return %c0_i32, %c0_i32_0 : i32, i32
  }
  func.func @transform_11(%arg0: i32) -> (i32, i32) {
    %c0_i32 = arith.constant 0 : i32
    %c0_i32_0 = arith.constant 0 : i32
    %c0_i32_1 = arith.constant 0 : i32
    return %c0_i32, %c0_i32_0 : i32, i32
  }
  func.func @transform_12(%arg0: i32) -> (i32, i32) {
    %c0_i32 = arith.constant 0 : i32
    %c0_i32_0 = arith.constant 0 : i32
    %c0_i32_1 = arith.constant 0 : i32
    return %c0_i32, %c0_i32_0 : i32, i32
  }
  func.func @transform_13(%arg0: i32) -> (i32, i32) {
    %c0_i32 = arith.constant 0 : i32
    %c0_i32_0 = arith.constant 0 : i32
    %c0_i32_1 = arith.constant 0 : i32
    return %c0_i32, %c0_i32_0 : i32, i32
  }
  func.func @transform_14(%arg0: i32) -> (i32, i32) {
    %c0_i32 = arith.constant 0 : i32
    %c0_i32_0 = arith.constant 0 : i32
    %c0_i32_1 = arith.constant 0 : i32
    return %c0_i32, %c0_i32_0 : i32, i32
  }
  func.func @transform_15(%arg0: i32) -> (i32, i32) {
    %c0_i32 = arith.constant 0 : i32
    %c0_i32_0 = arith.constant 0 : i32
    %c0_i32_1 = arith.constant 0 : i32
    return %c0_i32, %c0_i32_0 : i32, i32
  }
  func.func @transform_16(%arg0: i32) -> (i32, i32) {
    %c0_i32 = arith.constant 0 : i32
    %c0_i32_0 = arith.constant 0 : i32
    %c0_i32_1 = arith.constant 0 : i32
    return %c0_i32, %c0_i32_0 : i32, i32
  }
  func.func @transform_17(%arg0: i32) -> (i32, i32) {
    %c0_i32 = arith.constant 0 : i32
    %c0_i32_0 = arith.constant 0 : i32
    %c0_i32_1 = arith.constant 0 : i32
    return %c0_i32, %c0_i32_0 : i32, i32
  }
  func.func @transform_18(%arg0: i32) -> (i32, i32) {
    %c0_i32 = arith.constant 0 : i32
    %c0_i32_0 = arith.constant 0 : i32
    %c0_i32_1 = arith.constant 0 : i32
    return %c0_i32, %c0_i32_0 : i32, i32
  }
  func.func @transform_19(%arg0: i32) -> (i32, i32) {
    %c0_i32 = arith.constant 0 : i32
    %c0_i32_0 = arith.constant 0 : i32
    %c0_i32_1 = arith.constant 0 : i32
    return %c0_i32, %c0_i32_0 : i32, i32
  }
  func.func @transform_20(%arg0: i32) -> (i32, i32) {
    %c0_i32 = arith.constant 0 : i32
    %c0_i32_0 = arith.constant 0 : i32
    %c0_i32_1 = arith.constant 0 : i32
    return %c0_i32, %c0_i32_0 : i32, i32
  }
}

</mosaic_0001>

<bundles_post_ra>
// kernel: cmd_input_forward.1
= control target key start
LH: loop header
LB: loop body
LE: loop exit
PB: predicated region body
PF: predicated region fallthrough
CT: control target
= control target key end

     0   :  { %s4123_s0 = inlined_call_operand.vmem [shape: f32[2,768], index: 0, kind: input, shape index: {}]   ;;  %s4124_s1 = inlined_call_operand.vmem [shape: f32[2,1], index: 1, kind: input, shape index: {}]   ;;  %s4125_s2 = inlined_call_operand.hbm [shape: f32[2,4], index: 2, kind: input, shape index: {}]   ;;  %s4126_s3 = inlined_call_operand.hbm [shape: f32[768,512], index: 3, kind: input, shape index: {}]   ;;  %s4127_s4 = inlined_call_operand.hbm [shape: f32[1,512], index: 4, kind: input, shape index: {}]   ;;  %s4128_s5 = inlined_call_operand.hbm [shape: f32[512,256], index: 5, kind: input, shape index: {}]   ;;  %s4129_s6 = inlined_call_operand.hbm [shape: f32[1,256], index: 6, kind: input, shape index: {}]   ;;  %s4130_s7 = inlined_call_operand.hbm [shape: f32[256,128], index: 7, kind: input, shape index: {}]   ;;  %s4131_s8 = inlined_call_operand.hbm [shape: f32[1,128], index: 8, kind: input, shape index: {}]   ;;  %s4132_s9 = inlined_call_operand.hbm [shape: f32[1,128], index: 9, kind: input, shape index: {}]   ;;  %s4133_s10 = inlined_call_operand.hbm [shape: f32[4,128], index: 10, kind: input, shape index: {}]   ;;  %s4134_s11 = inlined_call_operand.hbm [shape: f32[1,128], index: 11, kind: input, shape index: {}]   ;;  %s4135_s12 = inlined_call_operand.hbm [shape: f32[128,128], index: 12, kind: input, shape index: {}]   ;;  %s4136_s13 = inlined_call_operand.hbm [shape: f32[128,128], index: 13, kind: input, shape index: {}]   ;;  %s4137_s14 = inlined_call_operand.hbm [shape: f32[1,128], index: 14, kind: input, shape index: {}]   ;;  %s4138_s15 = inlined_call_operand.hbm [shape: f32[128,128], index: 15, kind: input, shape index: {}]   ;;  %s4139_s16 = inlined_call_operand.hbm [shape: f32[128,128], index: 16, kind: input, shape index: {}]   ;;  %s4140_s17 = inlined_call_operand.hbm [shape: f32[1,128], index: 17, kind: input, shape index: {}]   ;;  %s4141_s18 = inlined_call_operand.hbm [shape: f32[128,128], index: 18, kind: input, shape index: {}]   ;;  %s4142_s19 = inlined_call_operand.hbm [shape: f32[1,128], index: 19, kind: input, shape index: {}]   ;;  %s4143_s20 = inlined_call_operand.vmem [shape: f32[2,128], index: 20, kind: output, shape index: {}]  }
   0x1   :  { %4148 = sst [smem:[#allocation40_spill]] %s4123_s0 }
   0x2   :  { %4149 = sst [smem:[#allocation41_spill]] %s4124_s1 }
   0x3   :  { %4150 = sst [smem:[#allocation42_spill]] %s4125_s2 }
   0x4   :  { %4151 = sst [smem:[#allocation43_spill]] %s4126_s3 }
   0x5   :  { %4152 = sst [smem:[#allocation44_spill]] %s4127_s4 }
   0x6   :  { %4153 = sst [smem:[#allocation45_spill]] %s4143_s20 }
   0x7   :  { %25 = vsyncpa [#allocation3], 0 }
   0x8   :  { %26 = vsyncpa [#allocation5], 0 }
   0x9   :  { %27 = vsyncpa [#allocation8], 0 }
   0xa   :  { %28 = vsyncpa [#allocation11], 0 }
   0xb   :  { %29 = vsyncpa [#allocation14], 0 }
   0xc   :  { %30 = vsyncpa [#allocation17], 0 }
   0xd   :  { %31 = vsyncpa [#allocation20], 0 }
   0xe   :  { %32 = vsyncpa [#allocation23], 0 }
   0xf   :  { %33 = vsyncpa [#allocation26], 0 }
  0x10   :  { %34 = vsyncpa [#allocation29], 0  ;;  %s3637_s1 = smov [#allocation4]   ;;  %s4154_s2 = sld [smem:[#allocation43_spill]] }
  0x11   :  { %s54_s22 = sshll.u32 %s3637_s1, 4  ;;  %s55_s22 = int_to_ptr.vmem [resolvable:$true] %s54_s22 }
  0x16   :  { %s3221_s25 = scalar_lea.hbm %s4154_s2, 49152 }
  0x17   :  { %p3222_p0 = scmp.ne.s32.totalorder %s4154_s2, %s3221_s25  ;;  %p3225_p1 = scmp.lt.u32.totalorder %s3221_s25, %s4154_s2 }
  0x19   :  { %p3227_p2 = pnand %p3225_p1, %p3222_p0 }
  0x1b   :  { %3230 = shalt.err (!%p3227_p2)
}
  0x1c   :  { %s3231_s4 = scalar_lea.vmem %s55_s22, 49152  ;;  %p3236_p4 = scmp.lt.s32.totalorder %s55_s22, %s55_s22 }
  0x1d   :  { %p3232_p3 = scmp.ne.s32.totalorder %s55_s22, %s3231_s4  ;;  %p3237_p5 = scmp.lt.s32.totalorder %s3231_s4, %s3231_s4 }
  0x1f   :  { %p3238_p6 = por %p3237_p5, %p3236_p4 }
  0x21   :  { %p3239_p7 = pnand %p3238_p6, %p3232_p3 }
  0x23   :  { %3242 = shalt.err (!%p3239_p7)
}
  0x24   :  { %s3638_s29 = smov 512   ;;  %s3639_s30 = smov 32  }
  0x25   :  { %60 = dma.hbm_to_vmem [thread:$0]  %s4154_s2, 49152, %s55_s22, [#allocation5], %s3638_s29, %s3638_s29, %s3639_s30  }
  0x26   :  { %s3640_s1 = smov [#allocation7]   ;;  %s3243_s3 = scalar_lea.hbm %s4128_s5, 16384 }
  0x27   :  { %s76_s23 = sshll.u32 %s3640_s1, 4  ;;  %p3244_p8 = scmp.ne.s32.totalorder %s4128_s5, %s3243_s3  ;;  %s77_s23 = int_to_ptr.vmem [resolvable:$true] %s76_s23 }
  0x28   :  { %p3247_p9 = scmp.lt.u32.totalorder %s3243_s3, %s4128_s5 }
  0x2a   :  { %p3249_p10 = pnand %p3247_p9, %p3244_p8 }
  0x2c   :  { %3252 = shalt.err (!%p3249_p10)
}
  0x2d   :  { %s3253_s20 = scalar_lea.vmem %s77_s23, 16384  ;;  %p3258_p12 = scmp.lt.s32.totalorder %s77_s23, %s77_s23 }
  0x2e   :  { %p3254_p11 = scmp.ne.s32.totalorder %s77_s23, %s3253_s20  ;;  %p3259_p13 = scmp.lt.s32.totalorder %s3253_s20, %s3253_s20 }
  0x30   :  { %p3260_p0 = por %p3259_p13, %p3258_p12 }
  0x32   :  { %p3261_p1 = pnand %p3260_p0, %p3254_p11 }
  0x34   :  { %3264 = shalt.err (!%p3261_p1)
}
  0x35   :  { %s3641_s22 = smov 256   ;;  %s3642_s2 = smov 16  }
  0x36   :  { %82 = dma.hbm_to_vmem [thread:$0]  %s4128_s5, 16384, %s77_s23, [#allocation8], %s3641_s22, %s3641_s22, %s3642_s2  }
  0x37   :  { %s3643_s0 = smov [#allocation10]   ;;  %s3265_s25 = scalar_lea.hbm %s4130_s7, 4096 }
  0x38   :  { %s98_s21 = sshll.u32 %s3643_s0, 4  ;;  %p3266_p2 = scmp.ne.s32.totalorder %s4130_s7, %s3265_s25  ;;  %s99_s21 = int_to_ptr.vmem [resolvable:$true] %s98_s21 }
  0x39   :  { %p3269_p3 = scmp.lt.u32.totalorder %s3265_s25, %s4130_s7 }
  0x3b   :  { %p3271_p4 = pnand %p3269_p3, %p3266_p2 }
  0x3d   :  { %3274 = shalt.err (!%p3271_p4)
}
  0x3e   :  { %s3275_s28 = scalar_lea.vmem %s99_s21, 4096  ;;  %p3280_p6 = scmp.lt.s32.totalorder %s99_s21, %s99_s21 }
  0x3f   :  { %p3276_p5 = scmp.ne.s32.totalorder %s99_s21, %s3275_s28  ;;  %p3281_p7 = scmp.lt.s32.totalorder %s3275_s28, %s3275_s28 }
  0x41   :  { %p3282_p8 = por %p3281_p7, %p3280_p6 }
  0x43   :  { %p3283_p9 = pnand %p3282_p8, %p3276_p5 }
  0x45   :  { %3286 = shalt.err (!%p3283_p9)
}
  0x46   :  { %s3644_s5 = smov 128   ;;  %s3645_s23 = smov 8  }
  0x47   :  { %104 = dma.hbm_to_vmem [thread:$0]  %s4130_s7, 4096, %s99_s21, [#allocation11], %s3644_s5, %s3644_s5, %s3645_s23  }
  0x48   :  { %s3646_s2 = smov [#allocation13]   ;;  %s3647_s30 = smov [#allocation16]  }
  0x49   :  { %s121_s29 = sshll.u32 %s3646_s2, 4  ;;  %s141_s0 = sshll.u32 %s3647_s30, 4  ;;  %s122_s29 = int_to_ptr.vmem [resolvable:$true] %s121_s29  ;;  %s142_s0 = int_to_ptr.vmem [resolvable:$true] %s141_s0 }
  0x4a   :  { %s3287_s25 = scalar_lea.hbm %s4132_s9, 16 }
  0x4b   :  { %p3288_p10 = scmp.ne.s32.totalorder %s4132_s9, %s3287_s25  ;;  %p3291_p11 = scmp.lt.u32.totalorder %s3287_s25, %s4132_s9 }
  0x4d   :  { %p3293_p12 = pnand %p3291_p11, %p3288_p10 }
  0x4f   :  { %3296 = shalt.err (!%p3293_p12)
}
  0x50   :  { %s3297_s7 = scalar_lea.vmem %s122_s29, 16  ;;  %s3301_s21 = scalar_lea.vmem %s122_s29, 32 }
  0x51   :  { %p3298_p13 = scmp.ne.s32.totalorder %s122_s29, %s3297_s7  ;;  %p3302_p0 = scmp.lt.s32.totalorder %s122_s29, %s122_s29 }
  0x52   :  { %p3303_p1 = scmp.lt.s32.totalorder %s3301_s21, %s3297_s7 }
  0x54   :  { %p3304_p2 = por %p3303_p1, %p3302_p0 }
  0x56   :  { %p3305_p3 = pnand %p3304_p2, %p3298_p13 }
  0x58   :  { %3308 = shalt.err (!%p3305_p3)
}
  0x59   :  { %124 = dma.hbm_to_vmem [thread:$0]  %s4132_s9, 16, %s122_s29, [#allocation14]  }
  0x5a   :  { %s3309_s30 = scalar_lea.hbm %s4134_s11, 16 }
  0x5b   :  { %p3310_p4 = scmp.ne.s32.totalorder %s4134_s11, %s3309_s30  ;;  %p3313_p5 = scmp.lt.u32.totalorder %s3309_s30, %s4134_s11 }
  0x5d   :  { %p3315_p6 = pnand %p3313_p5, %p3310_p4 }
  0x5f   :  { %3318 = shalt.err (!%p3315_p6)
}
  0x60   :  { %s3319_s26 = scalar_lea.vmem %s142_s0, 16  ;;  %s3323_s20 = scalar_lea.vmem %s142_s0, 32 }
  0x61   :  { %p3320_p7 = scmp.ne.s32.totalorder %s142_s0, %s3319_s26  ;;  %p3324_p8 = scmp.lt.s32.totalorder %s142_s0, %s142_s0 }
  0x62   :  { %p3325_p9 = scmp.lt.s32.totalorder %s3323_s20, %s3319_s26 }
  0x64   :  { %p3326_p10 = por %p3325_p9, %p3324_p8 }
  0x66   :  { %p3327_p11 = pnand %p3326_p10, %p3320_p7 }
  0x68   :  { %3330 = shalt.err (!%p3327_p11)
}
  0x69   :  { %144 = dma.hbm_to_vmem [thread:$0]  %s4134_s11, 16, %s142_s0, [#allocation17]  }
  0x6a   :  { %s3648_s27 = smov [#allocation19]   ;;  %s3649_s21 = smov [#allocation22]  }
  0x6b   :  { %s162_s7 = sshll.u32 %s3648_s27, 4  ;;  %s184_s28 = sshll.u32 %s3649_s21, 4  ;;  %s163_s7 = int_to_ptr.vmem [resolvable:$true] %s162_s7  ;;  %s185_s28 = int_to_ptr.vmem [resolvable:$true] %s184_s28 }
  0x6c   :  { %s3331_s2 = scalar_lea.hbm %s4136_s13, 2048 }
  0x6d   :  { %p3332_p12 = scmp.ne.s32.totalorder %s4136_s13, %s3331_s2  ;;  %p3335_p13 = scmp.lt.u32.totalorder %s3331_s2, %s4136_s13 }
  0x6f   :  { %p3337_p0 = pnand %p3335_p13, %p3332_p12 }
  0x71   :  { %3340 = shalt.err (!%p3337_p0)
}
  0x72   :  { %s3341_s11 = scalar_lea.vmem %s163_s7, 2048  ;;  %p3346_p2 = scmp.lt.s32.totalorder %s163_s7, %s163_s7 }
  0x73   :  { %p3342_p1 = scmp.ne.s32.totalorder %s163_s7, %s3341_s11  ;;  %p3347_p3 = scmp.lt.s32.totalorder %s3341_s11, %s3341_s11 }
  0x75   :  { %p3348_p4 = por %p3347_p3, %p3346_p2 }
  0x77   :  { %p3349_p5 = pnand %p3348_p4, %p3342_p1 }
  0x79   :  { %3352 = shalt.err (!%p3349_p5)
}
  0x7a   :  { %168 = dma.hbm_to_vmem [thread:$0]  %s4136_s13, 2048, %s163_s7, [#allocation20], %s3644_s5, %s3644_s5, %s3645_s23  }
  0x7b   :  { %s3353_s9 = scalar_lea.hbm %s4138_s15, 2048 }
  0x7c   :  { %p3354_p6 = scmp.ne.s32.totalorder %s4138_s15, %s3353_s9  ;;  %p3357_p7 = scmp.lt.u32.totalorder %s3353_s9, %s4138_s15 }
  0x7e   :  { %p3359_p8 = pnand %p3357_p7, %p3354_p6 }
  0x80   :  { %3362 = shalt.err (!%p3359_p8)
}
  0x81   :  { %s3363_s22 = scalar_lea.vmem %s185_s28, 2048  ;;  %p3368_p10 = scmp.lt.s32.totalorder %s185_s28, %s185_s28 }
  0x82   :  { %p3364_p9 = scmp.ne.s32.totalorder %s185_s28, %s3363_s22  ;;  %p3369_p11 = scmp.lt.s32.totalorder %s3363_s22, %s3363_s22 }
  0x84   :  { %p3370_p12 = por %p3369_p11, %p3368_p10 }
  0x86   :  { %p3371_p13 = pnand %p3370_p12, %p3364_p9 }
  0x88   :  { %3374 = shalt.err (!%p3371_p13)
}
  0x89   :  { %190 = dma.hbm_to_vmem [thread:$0]  %s4138_s15, 2048, %s185_s28, [#allocation23], %s3644_s5, %s3644_s5, %s3645_s23  }
  0x8a   :  { %s3650_s2 = smov [#allocation25]   ;;  %s3651_s1 = smov [#allocation2]  }
  0x8b   :  { %s209_s30 = sshll.u32 %s3650_s2, 4  ;;  %s45_s24 = sshll.u32 %s3651_s1, 4  ;;  %s210_s30 = int_to_ptr.vmem [resolvable:$true] %s209_s30  ;;  %s46_s24 = int_to_ptr.vmem [resolvable:$true] %s45_s24 }
  0x8c   :  { %s3375_s0 = scalar_lea.hbm %s4140_s17, 16 }
  0x8d   :  { %p3376_p0 = scmp.ne.s32.totalorder %s4140_s17, %s3375_s0  ;;  %p3379_p1 = scmp.lt.u32.totalorder %s3375_s0, %s4140_s17 }
  0x8f   :  { %p3381_p2 = pnand %p3379_p1, %p3376_p0 }
  0x91   :  { %3384 = shalt.err (!%p3381_p2)
}
  0x92   :  { %s3385_s15 = scalar_lea.vmem %s210_s30, 16  ;;  %s3389_s28 = scalar_lea.vmem %s210_s30, 32 }
  0x93   :  { %p3386_p3 = scmp.ne.s32.totalorder %s210_s30, %s3385_s15  ;;  %p3390_p4 = scmp.lt.s32.totalorder %s210_s30, %s210_s30 }
  0x94   :  { %p3391_p5 = scmp.lt.s32.totalorder %s3389_s28, %s3385_s15 }
  0x96   :  { %p3392_p6 = por %p3391_p5, %p3390_p4 }
  0x98   :  { %p3393_p7 = pnand %p3392_p6, %p3386_p3 }
  0x9a   :  { %3396 = shalt.err (!%p3393_p7)
}
  0x9b   :  { %212 = dma.hbm_to_vmem [thread:$0]  %s4140_s17, 16, %s210_s30, [#allocation26]  }
  0x9c   :  { %s4155_s22 = sld [smem:[#allocation42_spill]] }
  0xa2   :  { %s3397_s13 = scalar_lea.hbm %s4155_s22, 32 }
  0xa3   :  { %p3398_p8 = scmp.ne.s32.totalorder %s4155_s22, %s3397_s13  ;;  %p3401_p9 = scmp.lt.u32.totalorder %s3397_s13, %s4155_s22 }
  0xa5   :  { %p3403_p10 = pnand %p3401_p9, %p3398_p8 }
  0xa7   :  { %3406 = shalt.err (!%p3403_p10)
}
  0xa8   :  { %s3407_s11 = scalar_lea.vmem %s46_s24, 32  ;;  %p3412_p12 = scmp.lt.s32.totalorder %s46_s24, %s46_s24 }
  0xa9   :  { %p3408_p11 = scmp.ne.s32.totalorder %s46_s24, %s3407_s11  ;;  %p3413_p13 = scmp.lt.s32.totalorder %s3407_s11, %s3407_s11 }
  0xab   :  { %p3414_p0 = por %p3413_p13, %p3412_p12 }
  0xad   :  { %p3415_p1 = pnand %p3414_p0, %p3408_p11 }
  0xaf   :  { %3418 = shalt.err (!%p3415_p1)
}
  0xb0   :  { %48 = dma.hbm_to_vmem [thread:$0]  %s4155_s22, 32, %s46_s24, [#allocation3]  }
  0xb1   :  { %s3652_s0 = smov [#allocation6]   ;;  %s3653_s26 = smov [#allocation9]  }
  0xb2   :  { %s67_s3 = sshll.u32 %s3652_s0, 4  ;;  %s89_s20 = sshll.u32 %s3653_s26, 4  ;;  %s68_s3 = int_to_ptr.vmem [resolvable:$true] %s67_s3  ;;  %s90_s20 = int_to_ptr.vmem [resolvable:$true] %s89_s20 }
  0xb3   :  { %s4156_s28 = sld [smem:[#allocation44_spill]] }
  0xb9   :  { %s3419_s29 = scalar_lea.hbm %s4156_s28, 64 }
  0xba   :  { %p3420_p2 = scmp.ne.s32.totalorder %s4156_s28, %s3419_s29  ;;  %p3423_p3 = scmp.lt.u32.totalorder %s3419_s29, %s4156_s28 }
  0xbc   :  { %p3425_p4 = pnand %p3423_p3, %p3420_p2 }
  0xbe   :  { %3428 = shalt.err (!%p3425_p4)
}
  0xbf   :  { %s3429_s24 = scalar_lea.vmem %s68_s3, 64  ;;  %p3434_p6 = scmp.lt.s32.totalorder %s68_s3, %s68_s3 }
  0xc0   :  { %p3430_p5 = scmp.ne.s32.totalorder %s68_s3, %s3429_s24  ;;  %p3435_p7 = scmp.lt.s32.totalorder %s3429_s24, %s3429_s24 }
  0xc2   :  { %p3436_p8 = por %p3435_p7, %p3434_p6 }
  0xc4   :  { %p3437_p9 = pnand %p3436_p8, %p3430_p5 }
  0xc6   :  { %3440 = shalt.err (!%p3437_p9)
}
  0xc7   :  { %70 = dma.hbm_to_vmem [thread:$0]  %s4156_s28, 64, %s68_s3, [#allocation5]  }
  0xc8   :  { %s3441_s25 = scalar_lea.hbm %s4129_s6, 32 }
  0xc9   :  { %p3442_p10 = scmp.ne.s32.totalorder %s4129_s6, %s3441_s25  ;;  %p3445_p11 = scmp.lt.u32.totalorder %s3441_s25, %s4129_s6 }
  0xcb   :  { %p3447_p12 = pnand %p3445_p11, %p3442_p10 }
  0xcd   :  { %3450 = shalt.err (!%p3447_p12)
}
  0xce   :  { %s3451_s26 = scalar_lea.vmem %s90_s20, 32  ;;  %p3456_p0 = scmp.lt.s32.totalorder %s90_s20, %s90_s20 }
  0xcf   :  { %p3452_p13 = scmp.ne.s32.totalorder %s90_s20, %s3451_s26  ;;  %p3457_p1 = scmp.lt.s32.totalorder %s3451_s26, %s3451_s26 }
  0xd1   :  { %p3458_p2 = por %p3457_p1, %p3456_p0 }
  0xd3   :  { %p3459_p3 = pnand %p3458_p2, %p3452_p13 }
  0xd5   :  { %3462 = shalt.err (!%p3459_p3)
}
  0xd6   :  { %92 = dma.hbm_to_vmem [thread:$0]  %s4129_s6, 32, %s90_s20, [#allocation8]  }
  0xd7   :  { %s3654_s15 = smov [#allocation12]   ;;  %s3655_s29 = smov [#allocation15]  }
  0xd8   :  { %s111_s28 = sshll.u32 %s3654_s15, 4  ;;  %s131_s27 = sshll.u32 %s3655_s29, 4  ;;  %s112_s28 = int_to_ptr.vmem [resolvable:$true] %s111_s28  ;;  %s132_s27 = int_to_ptr.vmem [resolvable:$true] %s131_s27 }
  0xd9   :  { %s3463_s13 = scalar_lea.hbm %s4131_s8, 16 }
  0xda   :  { %p3464_p4 = scmp.ne.s32.totalorder %s4131_s8, %s3463_s13  ;;  %p3467_p5 = scmp.lt.u32.totalorder %s3463_s13, %s4131_s8 }
  0xdc   :  { %p3469_p6 = pnand %p3467_p5, %p3464_p4 }
  0xde   :  { %3472 = shalt.err (!%p3469_p6)
}
  0xdf   :  { %s3473_s6 = scalar_lea.vmem %s112_s28, 16  ;;  %s3477_s20 = scalar_lea.vmem %s112_s28, 32 }
  0xe0   :  { %p3474_p7 = scmp.ne.s32.totalorder %s112_s28, %s3473_s6  ;;  %p3478_p8 = scmp.lt.s32.totalorder %s112_s28, %s112_s28 }
  0xe1   :  { %p3479_p9 = scmp.lt.s32.totalorder %s3477_s20, %s3473_s6 }
  0xe3   :  { %p3480_p10 = por %p3479_p9, %p3478_p8 }
  0xe5   :  { %p3481_p11 = pnand %p3480_p10, %p3474_p7 }
  0xe7   :  { %3484 = shalt.err (!%p3481_p11)
}
  0xe8   :  { %114 = dma.hbm_to_vmem [thread:$0]  %s4131_s8, 16, %s112_s28, [#allocation11]  }
  0xe9   :  { %s3485_s30 = scalar_lea.hbm %s4133_s10, 64 }
  0xea   :  { %p3486_p12 = scmp.ne.s32.totalorder %s4133_s10, %s3485_s30  ;;  %p3489_p13 = scmp.lt.u32.totalorder %s3485_s30, %s4133_s10 }
  0xec   :  { %p3491_p0 = pnand %p3489_p13, %p3486_p12 }
  0xee   :  { %3494 = shalt.err (!%p3491_p0)
}
  0xef   :  { %s3495_s15 = scalar_lea.vmem %s132_s27, 64  ;;  %p3500_p2 = scmp.lt.s32.totalorder %s132_s27, %s132_s27 }
  0xf0   :  { %p3496_p1 = scmp.ne.s32.totalorder %s132_s27, %s3495_s15  ;;  %p3501_p3 = scmp.lt.s32.totalorder %s3495_s15, %s3495_s15 }
  0xf2   :  { %p3502_p4 = por %p3501_p3, %p3500_p2 }
  0xf4   :  { %p3503_p5 = pnand %p3502_p4, %p3496_p1 }
  0xf6   :  { %3506 = shalt.err (!%p3503_p5)
}
  0xf7   :  { %134 = dma.hbm_to_vmem [thread:$0]  %s4133_s10, 64, %s132_s27, [#allocation14]  }
  0xf8   :  { %s3656_s29 = smov [#allocation18]   ;;  %s3657_s4 = smov [#allocation21]  }
  0xf9   :  { %s150_s21 = sshll.u32 %s3656_s29, 4  ;;  %s175_s13 = sshll.u32 %s3657_s4, 4  ;;  %s151_s21 = int_to_ptr.vmem [resolvable:$true] %s150_s21  ;;  %s176_s13 = int_to_ptr.vmem [resolvable:$true] %s175_s13 }
  0xfa   :  { %s3507_s7 = scalar_lea.hbm %s4135_s12, 2048 }
  0xfb   :  { %p3508_p6 = scmp.ne.s32.totalorder %s4135_s12, %s3507_s7  ;;  %p3511_p7 = scmp.lt.u32.totalorder %s3507_s7, %s4135_s12 }
  0xfd   :  { %p3513_p8 = pnand %p3511_p7, %p3508_p6 }
  0xff   :  { %3516 = shalt.err (!%p3513_p8)
}
 0x100   :  { %s3517_s10 = scalar_lea.vmem %s151_s21, 2048  ;;  %p3522_p10 = scmp.lt.s32.totalorder %s151_s21, %s151_s21 }
 0x101   :  { %p3518_p9 = scmp.ne.s32.totalorder %s151_s21, %s3517_s10  ;;  %p3523_p11 = scmp.lt.s32.totalorder %s3517_s10, %s3517_s10 }
 0x103   :  { %p3524_p12 = por %p3523_p11, %p3522_p10 }
 0x105   :  { %p3525_p13 = pnand %p3524_p12, %p3518_p9 }
 0x107   :  { %3528 = shalt.err (!%p3525_p13)
}
 0x108   :  { %156 = dma.hbm_to_vmem [thread:$0]  %s4135_s12, 2048, %s151_s21, [#allocation17], %s3644_s5, %s3644_s5, %s3645_s23  }
 0x109   :  { %s3529_s30 = scalar_lea.hbm %s4137_s14, 16 }
 0x10a   :  { %p3530_p0 = scmp.ne.s32.totalorder %s4137_s14, %s3529_s30  ;;  %p3533_p1 = scmp.lt.u32.totalorder %s3529_s30, %s4137_s14 }
 0x10c   :  { %p3535_p2 = pnand %p3533_p1, %p3530_p0 }
 0x10e   :  { %3538 = shalt.err (!%p3535_p2)
}
 0x10f   :  { %s3539_s15 = scalar_lea.vmem %s176_s13, 16  ;;  %s3543_s8 = scalar_lea.vmem %s176_s13, 32 }
 0x110   :  { %p3540_p3 = scmp.ne.s32.totalorder %s176_s13, %s3539_s15  ;;  %p3544_p4 = scmp.lt.s32.totalorder %s176_s13, %s176_s13 }
 0x111   :  { %p3545_p5 = scmp.lt.s32.totalorder %s3543_s8, %s3539_s15 }
 0x113   :  { %p3546_p6 = por %p3545_p5, %p3544_p4 }
 0x115   :  { %p3547_p7 = pnand %p3546_p6, %p3540_p3 }
 0x117   :  { %3550 = shalt.err (!%p3547_p7)
}
 0x118   :  { %178 = dma.hbm_to_vmem [thread:$0]  %s4137_s14, 16, %s176_s13, [#allocation20]  }
 0x119   :  { %s3658_s29 = smov [#allocation24]   ;;  %s3659_s4 = smov [#allocation27]  }
 0x11a   :  { %s196_s21 = sshll.u32 %s3658_s29, 4  ;;  %s218_s24 = sshll.u32 %s3659_s4, 4  ;;  %s197_s21 = int_to_ptr.vmem [resolvable:$true] %s196_s21  ;;  %s219_s24 = int_to_ptr.vmem [resolvable:$true] %s218_s24 }
 0x11b   :  { %s3551_s2 = scalar_lea.hbm %s4139_s16, 2048 }
 0x11c   :  { %p3552_p8 = scmp.ne.s32.totalorder %s4139_s16, %s3551_s2  ;;  %p3555_p9 = scmp.lt.u32.totalorder %s3551_s2, %s4139_s16 }
 0x11e   :  { %p3557_p10 = pnand %p3555_p9, %p3552_p8 }
 0x120   :  { %3560 = shalt.err (!%p3557_p10)
}
 0x121   :  { %s3561_s14 = scalar_lea.vmem %s197_s21, 2048  ;;  %p3566_p12 = scmp.lt.s32.totalorder %s197_s21, %s197_s21 }
 0x122   :  { %p3562_p11 = scmp.ne.s32.totalorder %s197_s21, %s3561_s14  ;;  %p3567_p13 = scmp.lt.s32.totalorder %s3561_s14, %s3561_s14 }
 0x124   :  { %p3568_p0 = por %p3567_p13, %p3566_p12 }
 0x126   :  { %p3569_p1 = pnand %p3568_p0, %p3562_p11 }
 0x128   :  { %3572 = shalt.err (!%p3569_p1)
}
 0x129   :  { %202 = dma.hbm_to_vmem [thread:$0]  %s4139_s16, 2048, %s197_s21, [#allocation23], %s3644_s5, %s3644_s5, %s3645_s23  }
 0x12a   :  { %s3573_s17 = scalar_lea.hbm %s4141_s18, 2048 }
 0x12b   :  { %p3574_p2 = scmp.ne.s32.totalorder %s4141_s18, %s3573_s17  ;;  %p3577_p3 = scmp.lt.u32.totalorder %s3573_s17, %s4141_s18 }
 0x12d   :  { %p3579_p4 = pnand %p3577_p3, %p3574_p2 }
 0x12f   :  { %3582 = shalt.err (!%p3579_p4)
}
 0x130   :  { %s3583_s9 = scalar_lea.vmem %s219_s24, 2048  ;;  %p3588_p6 = scmp.lt.s32.totalorder %s219_s24, %s219_s24 }
 0x131   :  { %p3584_p5 = scmp.ne.s32.totalorder %s219_s24, %s3583_s9  ;;  %p3589_p7 = scmp.lt.s32.totalorder %s3583_s9, %s3583_s9 }
 0x133   :  { %p3590_p8 = por %p3589_p7, %p3588_p6 }
 0x135   :  { %p3591_p9 = pnand %p3590_p8, %p3584_p5 }
 0x137   :  { %3594 = shalt.err (!%p3591_p9)
}
 0x138   :  { %224 = dma.hbm_to_vmem [thread:$0]  %s4141_s18, 2048, %s219_s24, [#allocation26], %s3644_s5, %s3644_s5, %s3645_s23  }
 0x139   :  { %s3660_s8 = smov [#allocation28]   ;;  %s3595_s21 = scalar_lea.hbm %s4142_s19, 16 }
 0x13a   :  { %s231_s12 = sshll.u32 %s3660_s8, 4  ;;  %p3596_p10 = scmp.ne.s32.totalorder %s4142_s19, %s3595_s21  ;;  %s232_s12 = int_to_ptr.vmem [resolvable:$true] %s231_s12 }
 0x13b   :  { %p3599_p11 = scmp.lt.u32.totalorder %s3595_s21, %s4142_s19 }
 0x13d   :  { %p3601_p12 = pnand %p3599_p11, %p3596_p10 }
 0x13f   :  { %3604 = shalt.err (!%p3601_p12)
}
 0x140   :  { %s3605_s6 = scalar_lea.vmem %s232_s12, 16  ;;  %s3609_s18 = scalar_lea.vmem %s232_s12, 32 }
 0x141   :  { %p3606_p13 = scmp.ne.s32.totalorder %s232_s12, %s3605_s6  ;;  %p3610_p0 = scmp.lt.s32.totalorder %s232_s12, %s232_s12 }
 0x142   :  { %p3611_p1 = scmp.lt.s32.totalorder %s3609_s18, %s3605_s6 }
 0x144   :  { %p3612_p2 = por %p3611_p1, %p3610_p0 }
 0x146   :  { %p3613_p3 = pnand %p3612_p2, %p3606_p13 }
 0x148   :  { %3616 = shalt.err (!%p3613_p3)
}
 0x149   :  { %234 = dma.hbm_to_vmem [thread:$0]  %s4142_s19, 16, %s232_s12, [#allocation29]  }
 0x14a   :  { %3617 = dma.done.wait [#allocation3], 32  }
 0x14b   :  { %3618 = vsyncadd [#allocation3], 4294967264 }
 0x14c   :  { %3619 = dma.done.wait [#allocation5], 49216  }
 0x14d   :  { %3620 = vsyncadd [#allocation5], 4294918080 }
 0x14e   :  { %3621 = dma.done.wait [#allocation8], 16416  }
 0x14f   :  { %3622 = vsyncadd [#allocation8], 4294950880 }
 0x150   :  { %3623 = dma.done.wait [#allocation11], 4112  }
 0x151   :  { %3624 = vsyncadd [#allocation11], 4294963184 }
 0x152   :  { %3625 = dma.done.wait [#allocation14], 80  }
 0x153   :  { %3626 = vsyncadd [#allocation14], 4294967216 }
 0x154   :  { %3627 = dma.done.wait [#allocation17], 2064  }
 0x155   :  { %3628 = vsyncadd [#allocation17], 4294965232 }
 0x156   :  { %3629 = dma.done.wait [#allocation20], 2064  }
 0x157   :  { %3630 = vsyncadd [#allocation20], 4294965232 }
 0x158   :  { %3631 = dma.done.wait [#allocation23], 4096  }
 0x159   :  { %3632 = vsyncadd [#allocation23], 4294963200 }
 0x15a   :  { %3633 = dma.done.wait [#allocation26], 2064  }
 0x15b   :  { %3634 = vsyncadd [#allocation26], 4294965232 }
 0x15c   :  { %3635 = dma.done.wait [#allocation29], 16  }
 0x15d   :  { %3636 = vsyncadd [#allocation29], 4294967280  ;;  %v292_v0 = vld [vmem:[#allocation4 + $0x8] sm:$0xff]  ;;  %v294_v2 = vld [vmem:[#allocation4 + $0x18] sm:$0xff]  ;;  %s4157_s20 = sld [smem:[#allocation40_spill]]  ;;  %vm1562_vm0 = vcmask 1043456  }
 0x15e   :  { %v296_v1 = vld [vmem:[#allocation4 + $0x28] sm:$0xff]  ;;  %v298_v4 = vld [vmem:[#allocation4 + $0x38] sm:$0xff]  ;;  %v291_v5 = vld [vmem:[#allocation4] sm:$0xff]  ;;  %vm1558_vm1 = vcmask 31744   ;;  %vm3663_vm2 = vmmov 0   ;;  %vm1640_vm3 = vcmask 1040384  }
 0x15f   :  { %v2512_v3 = vpack.c.bf16 %v296_v1, %v292_v0  ;;  %v295_v6 = vld [vmem:[#allocation4 + $0x20] sm:$0xff]  ;;  %v2704_v7 = vpack.c.bf16 %v298_v4, %v294_v2  ;;  %v293_v9 = vld [vmem:[#allocation4 + $0x10] sm:$0xff]  ;;  %v300_v11 = vld [vmem:[#allocation4 + $0x48] sm:$0xff]  ;;  %s4158_s27 = sld [smem:[#allocation41_spill]]  ;;  %vm1636_vm4 = vcmask 7168   ;;  %s4159_s17 = sld [smem:[#allocation45_spill]] }
 0x160   :  { %v2514_v8 = vpack.c.bf16 %v295_v6, %v291_v5  ;;  %v297_v10 = vld [vmem:[#allocation4 + $0x30] sm:$0xff]  ;;  %v304_v13 = vld [vmem:[#allocation4 + $0x68] sm:$0xff]  ;;  %v302_v14 = vld [vmem:[#allocation4 + $0x58] sm:$0xff] }
 0x161   :  { %2513 = vmatprep.subr.bf16.mxu0 %v2512_v3  ;;  %v2706_v12 = vpack.c.bf16 %v297_v10, %v293_v9  ;;  %v306_v15 = vld [vmem:[#allocation4 + $0x78] sm:$0xff]  ;;  %2705 = vmatprep.subr.bf16.mxu1 %v2704_v7  ;;  %v2516_v16 = vpack.c.bf16 %v304_v13, %v300_v11  ;;  %v299_v18 = vld [vmem:[#allocation4 + $0x40] sm:$0xff]  ;;  %v301_v20 = vld [vmem:[#allocation4 + $0x50] sm:$0xff] }
 0x162   :  { %2515 = vmatpush1.bf16.msra.mxu0 %v2514_v8  ;;  %v2708_v17 = vpack.c.bf16 %v306_v15, %v302_v14  ;;  %v303_v19 = vld [vmem:[#allocation4 + $0x60] sm:$0xff]  ;;  %v305_v22 = vld [vmem:[#allocation4 + $0x70] sm:$0xff]  ;;  %v308_v23 = vld [vmem:[#allocation4 + $0x88] sm:$0xff] }
 0x163   :  { %2707 = vmatpush1.bf16.msra.mxu1 %v2706_v12  ;;  %v2518_v21 = vpack.c.bf16 %v303_v19, %v299_v18  ;;  %v312_v24 = vld [vmem:[#allocation4 + $0xa8] sm:$0xff]  ;;  %2517 = vmatprep.subr.bf16.mxu0 %v2516_v16  ;;  %v2710_v25 = vpack.c.bf16 %v305_v22, %v301_v20  ;;  %v310_v27 = vld [vmem:[#allocation4 + $0x98] sm:$0xff]  ;;  %v307_v29 = vld [vmem:[#allocation4 + $0x80] sm:$0xff] }
 0x164   :  { %2709 = vmatprep.subr.bf16.mxu1 %v2708_v17  ;;  %v2520_v26 = vpack.c.bf16 %v312_v24, %v308_v23  ;;  %v314_v28 = vld [vmem:[#allocation4 + $0xb8] sm:$0xff]  ;;  %v311_v31 = vld [vmem:[#allocation4 + $0xa0] sm:$0xff]  ;;  %v309_v32 = vld [vmem:[#allocation4 + $0x90] sm:$0xff] }
 0x165   :  { %v2712_v30 = vpack.c.bf16 %v314_v28, %v310_v27  ;;  %v313_v33 = vld [vmem:[#allocation4 + $0xb0] sm:$0xff]  ;;  %v2522_v34 = vpack.c.bf16 %v311_v31, %v307_v29  ;;  %v316_v35 = vld [vmem:[#allocation4 + $0xc8] sm:$0xff]  ;;  %v318_v37 = vld [vmem:[#allocation4 + $0xd8] sm:$0xff] }
 0x166   :  { %2519 = vmatpush1.bf16.msra.mxu0 %v2518_v21  ;;  %v320_v36 = vld [vmem:[#allocation4 + $0xe8] sm:$0xff]  ;;  %v2714_v38 = vpack.c.bf16 %v313_v33, %v309_v32  ;;  %v322_v40 = vld [vmem:[#allocation4 + $0xf8] sm:$0xff]  ;;  %v315_v41 = vld [vmem:[#allocation4 + $0xc0] sm:$0xff] }
 0x167   :  { %2711 = vmatpush1.bf16.msra.mxu1 %v2710_v25  ;;  %2521 = vmatprep.subr.bf16.mxu0 %v2520_v26  ;;  %v2524_v39 = vpack.c.bf16 %v320_v36, %v316_v35  ;;  %v319_v42 = vld [vmem:[#allocation4 + $0xe0] sm:$0xff]  ;;  %v2716_v43 = vpack.c.bf16 %v322_v40, %v318_v37  ;;  %v317_v44 = vld [vmem:[#allocation4 + $0xd0] sm:$0xff]  ;;  %v324_v46 = vld [vmem:[#allocation4 + $0x108] sm:$0xff] }
 0x168   :  { %2713 = vmatprep.subr.bf16.mxu1 %v2712_v30  ;;  %v321_v45 = vld [vmem:[#allocation4 + $0xf0] sm:$0xff]  ;;  %v328_v47 = vld [vmem:[#allocation4 + $0x128] sm:$0xff]  ;;  %v326_v48 = vld [vmem:[#allocation4 + $0x118] sm:$0xff]  ;;  %v2526_v50 = vpack.c.bf16 %v319_v42, %v315_v41 }
 0x169   :  { %v330_v49 = vld [vmem:[#allocation4 + $0x138] sm:$0xff]  ;;  %v2718_v51 = vpack.c.bf16 %v321_v45, %v317_v44  ;;  %v2528_v52 = vpack.c.bf16 %v328_v47, %v324_v46  ;;  %v323_v53 = vld [vmem:[#allocation4 + $0x100] sm:$0xff]  ;;  %v325_v55 = vld [vmem:[#allocation4 + $0x110] sm:$0xff]  ;;  %v677_v46 = vlaneseq  ;;  %v3661_v47 = vmov 1983009808  }
 0x16a   :  { %2523 = vmatpush1.bf16.msra.mxu0 %v2522_v34  ;;  %v327_v54 = vld [vmem:[#allocation4 + $0x120] sm:$0xff]  ;;  %v2720_v56 = vpack.c.bf16 %v330_v49, %v326_v48  ;;  %v329_v57 = vld [vmem:[#allocation4 + $0x130] sm:$0xff]  ;;  %v332_v58 = vld [vmem:[#allocation4 + $0x148] sm:$0xff]  ;;  %v701_v48 = vunpack.c.l.s4 %v3661_v47 }
 0x16b   :  { %2715 = vmatpush1.bf16.msra.mxu1 %v2714_v38  ;;  %2525 = vmatprep.subr.bf16.mxu0 %v2524_v39  ;;  %v336_v59 = vld [vmem:[#allocation4 + $0x168] sm:$0xff]  ;;  %v334_v60 = vld [vmem:[#allocation4 + $0x158] sm:$0xff]  ;;  %v2530_v62 = vpack.c.bf16 %v327_v54, %v323_v53  ;;  %v2722_v63 = vpack.c.bf16 %v329_v57, %v325_v55  ;;  %v331_v1 = vld [vmem:[#allocation4 + $0x140] sm:$0xff] }
 0x16c   :  { %2717 = vmatprep.subr.bf16.mxu1 %v2716_v43  ;;  %v338_v61 = vld [vmem:[#allocation4 + $0x178] sm:$0xff]  ;;  %v2532_v0 = vpack.c.bf16 %v336_v59, %v332_v58  ;;  %v335_v2 = vld [vmem:[#allocation4 + $0x160] sm:$0xff]  ;;  %v333_v3 = vld [vmem:[#allocation4 + $0x150] sm:$0xff] }
 0x16d   :  { %v2724_v4 = vpack.c.bf16 %v338_v61, %v334_v60  ;;  %v337_v5 = vld [vmem:[#allocation4 + $0x170] sm:$0xff]  ;;  %v340_v6 = vld [vmem:[#allocation4 + $0x188] sm:$0xff]  ;;  %v342_v8 = vld [vmem:[#allocation4 + $0x198] sm:$0xff]  ;;  %v2534_v10 = vpack.c.bf16 %v335_v2, %v331_v1  ;;  %v4004_v61 = vshrl.u32 %v677_v46, 7 }
 0x16e   :  { %2527 = vmatpush1.bf16.msra.mxu0 %v2526_v50  ;;  %v344_v7 = vld [vmem:[#allocation4 + $0x1a8] sm:$0xff]  ;;  %v346_v9 = vld [vmem:[#allocation4 + $0x1b8] sm:$0xff]  ;;  %v2726_v11 = vpack.c.bf16 %v337_v5, %v333_v3  ;;  %v339_v13 = vld [vmem:[#allocation4 + $0x180] sm:$0xff] }
 0x16f   :  { %2719 = vmatpush1.bf16.msra.mxu1 %v2718_v51  ;;  %2529 = vmatprep.subr.bf16.mxu0 %v2528_v52  ;;  %v2536_v12 = vpack.c.bf16 %v344_v7, %v340_v6  ;;  %v343_v14 = vld [vmem:[#allocation4 + $0x1a0] sm:$0xff]  ;;  %v341_v15 = vld [vmem:[#allocation4 + $0x190] sm:$0xff]  ;;  %v2728_v16 = vpack.c.bf16 %v346_v9, %v342_v8  ;;  %v348_v18 = vld [vmem:[#allocation4 + $0x1c8] sm:$0xff] }
 0x170   :  { %2721 = vmatprep.subr.bf16.mxu1 %v2720_v56  ;;  %v345_v17 = vld [vmem:[#allocation4 + $0x1b0] sm:$0xff]  ;;  %v352_v19 = vld [vmem:[#allocation4 + $0x1e8] sm:$0xff]  ;;  %v350_v20 = vld [vmem:[#allocation4 + $0x1d8] sm:$0xff]  ;;  %v2538_v22 = vpack.c.bf16 %v343_v14, %v339_v13 }
 0x171   :  { %v354_v21 = vld [vmem:[#allocation4 + $0x1f8] sm:$0xff]  ;;  %v2730_v23 = vpack.c.bf16 %v345_v17, %v341_v15  ;;  %v2540_v24 = vpack.c.bf16 %v352_v19, %v348_v18  ;;  %v347_v25 = vld [vmem:[#allocation4 + $0x1c0] sm:$0xff]  ;;  %v349_v27 = vld [vmem:[#allocation4 + $0x1d0] sm:$0xff] }
 0x172   :  { %2531 = vmatpush1.bf16.msra.mxu0 %v2530_v62  ;;  %v351_v26 = vld [vmem:[#allocation4 + $0x1e0] sm:$0xff]  ;;  %v2732_v28 = vpack.c.bf16 %v354_v21, %v350_v20  ;;  %v353_v29 = vld [vmem:[#allocation4 + $0x1f0] sm:$0xff]  ;;  %v356_v30 = vld [vmem:[#allocation4 + $0x208] sm:$0xff]  ;;  %v702_v62 = vunpack.c.0.s8 %v701_v48 }
 0x173   :  { %2723 = vmatpush1.bf16.msra.mxu1 %v2722_v63  ;;  %2533 = vmatprep.subr.bf16.mxu0 %v2532_v0  ;;  %v360_v31 = vld [vmem:[#allocation4 + $0x228] sm:$0xff]  ;;  %v358_v32 = vld [vmem:[#allocation4 + $0x218] sm:$0xff]  ;;  %v2542_v34 = vpack.c.bf16 %v351_v26, %v347_v25  ;;  %v2734_v35 = vpack.c.bf16 %v353_v29, %v349_v27  ;;  %v355_v37 = vld [vmem:[#allocation4 + $0x200] sm:$0xff] }
 0x174   :  { %2725 = vmatprep.subr.bf16.mxu1 %v2724_v4  ;;  %v362_v33 = vld [vmem:[#allocation4 + $0x238] sm:$0xff]  ;;  %v2544_v36 = vpack.c.bf16 %v360_v31, %v356_v30  ;;  %v359_v38 = vld [vmem:[#allocation4 + $0x220] sm:$0xff]  ;;  %v357_v39 = vld [vmem:[#allocation4 + $0x210] sm:$0xff] }
 0x175   :  { %v2736_v40 = vpack.c.bf16 %v362_v33, %v358_v32  ;;  %v361_v41 = vld [vmem:[#allocation4 + $0x230] sm:$0xff]  ;;  %v364_v42 = vld [vmem:[#allocation4 + $0x248] sm:$0xff]  ;;  %v366_v44 = vld [vmem:[#allocation4 + $0x258] sm:$0xff]  ;;  %v2546_v49 = vpack.c.bf16 %v359_v38, %v355_v37 }
 0x176   :  { %2535 = vmatpush1.bf16.msra.mxu0 %v2534_v10  ;;  %v368_v43 = vld [vmem:[#allocation4 + $0x268] sm:$0xff]  ;;  %v370_v45 = vld [vmem:[#allocation4 + $0x278] sm:$0xff]  ;;  %v2738_v50 = vpack.c.bf16 %v361_v41, %v357_v39  ;;  %v363_v52 = vld [vmem:[#allocation4 + $0x240] sm:$0xff] }
 0x177   :  { %2727 = vmatpush1.bf16.msra.mxu1 %v2726_v11  ;;  %2537 = vmatprep.subr.bf16.mxu0 %v2536_v12  ;;  %v2548_v51 = vpack.c.bf16 %v368_v43, %v364_v42  ;;  %v367_v53 = vld [vmem:[#allocation4 + $0x260] sm:$0xff]  ;;  %v365_v54 = vld [vmem:[#allocation4 + $0x250] sm:$0xff]  ;;  %v2740_v55 = vpack.c.bf16 %v370_v45, %v366_v44  ;;  %v372_v57 = vld [vmem:[#allocation4 + $0x288] sm:$0xff]  ;;  %v4007_v11 = vsub.s32 %v702_v62, %v4004_v61 }
 0x178   :  { %2729 = vmatprep.subr.bf16.mxu1 %v2728_v16  ;;  %v369_v56 = vld [vmem:[#allocation4 + $0x270] sm:$0xff]  ;;  %v376_v58 = vld [vmem:[#allocation4 + $0x2a8] sm:$0xff]  ;;  %v374_v59 = vld [vmem:[#allocation4 + $0x298] sm:$0xff]  ;;  %v2550_v63 = vpack.c.bf16 %v367_v53, %v363_v52 }
 0x179   :  { %v378_v60 = vld [vmem:[#allocation4 + $0x2b8] sm:$0xff]  ;;  %v2742_v0 = vpack.c.bf16 %v369_v56, %v365_v54  ;;  %v2552_v1 = vpack.c.bf16 %v376_v58, %v372_v57  ;;  %v371_v2 = vld [vmem:[#allocation4 + $0x280] sm:$0xff]  ;;  %v373_v4 = vld [vmem:[#allocation4 + $0x290] sm:$0xff] }
 0x17a   :  { %2539 = vmatpush1.bf16.msra.mxu0 %v2538_v22  ;;  %v375_v3 = vld [vmem:[#allocation4 + $0x2a0] sm:$0xff]  ;;  %v2744_v5 = vpack.c.bf16 %v378_v60, %v374_v59  ;;  %v377_v6 = vld [vmem:[#allocation4 + $0x2b0] sm:$0xff]  ;;  %v380_v7 = vld [vmem:[#allocation4 + $0x2c8] sm:$0xff] }
 0x17b   :  { %2731 = vmatpush1.bf16.msra.mxu1 %v2730_v23  ;;  %2541 = vmatprep.subr.bf16.mxu0 %v2540_v24  ;;  %v384_v8 = vld [vmem:[#allocation4 + $0x2e8] sm:$0xff]  ;;  %v382_v9 = vld [vmem:[#allocation4 + $0x2d8] sm:$0xff]  ;;  %v2554_v12 = vpack.c.bf16 %v375_v3, %v371_v2  ;;  %v379_v13 = vld [vmem:[#allocation4 + $0x2c0] sm:$0xff]  ;;  %v2746_v14 = vpack.c.bf16 %v377_v6, %v373_v4 }
 0x17c   :  { %2733 = vmatprep.subr.bf16.mxu1 %v2732_v28  ;;  %v386_v10 = vld [vmem:[#allocation4 + $0x2f8] sm:$0xff]  ;;  %v2556_v15 = vpack.c.bf16 %v384_v8, %v380_v7  ;;  %v383_v16 = vld [vmem:[#allocation4 + $0x2e0] sm:$0xff]  ;;  %v381_v17 = vld [vmem:[#allocation4 + $0x2d0] sm:$0xff] }
 0x17d   :  { %v385_v18 = vld [vmem:[#allocation4 + $0x2f0] sm:$0xff]  ;;  %v2748_v19 = vpack.c.bf16 %v386_v10, %v382_v9  ;;  %v388_v20 = vld [vmem:[#allocation4 + $0x308] sm:$0xff]  ;;  %v4012_v22 = vld [vmem:[%s4157_s20] sm:$0xff]  ;;  %v2558_v26 = vpack.c.bf16 %v383_v16, %v379_v13 }
 0x17e   :  { %2543 = vmatpush1.bf16.msra.mxu0 %v2542_v34  ;;  %v392_v21 = vld [vmem:[#allocation4 + $0x328] sm:$0xff]  ;;  %v390_v23 = vld [vmem:[#allocation4 + $0x318] sm:$0xff]  ;;  %v4016_v25 = vrot.slane %v4012_v22, %v4007_v11  ;;  %v2750_v27 = vpack.c.bf16 %v385_v18, %v381_v17  ;;  %v387_v29 = vld [vmem:[#allocation4 + $0x300] sm:$0xff]  ;;  %v699_v8 = vcombine.high %v4012_v22, %v4012_v22 }
 0x17f   :  { %2735 = vmatpush1.bf16.msra.mxu1 %v2734_v35  ;;  %2545 = vmatprep.subr.bf16.mxu0 %v2544_v36  ;;  %v394_v24 = vld [vmem:[#allocation4 + $0x338] sm:$0xff]  ;;  %v2560_v28 = vpack.c.bf16 %v392_v21, %v388_v20  ;;  %v391_v30 = vld [vmem:[#allocation4 + $0x320] sm:$0xff]  ;;  %v389_v31 = vld [vmem:[#allocation4 + $0x310] sm:$0xff] }
 0x180   :  { %2737 = vmatprep.subr.bf16.mxu1 %v2736_v40  ;;  %v714_v32 = vcombine.high %v4016_v25, %v4016_v25  ;;  %v2752_v33 = vpack.c.bf16 %v394_v24, %v390_v23  ;;  %v393_v34 = vld [vmem:[#allocation4 + $0x330] sm:$0xff]  ;;  %v396_v35 = vld [vmem:[#allocation4 + $0x348] sm:$0xff]  ;;  %v398_v37 = vld [vmem:[#allocation4 + $0x358] sm:$0xff]  ;;  %v2562_v39 = vpack.c.bf16 %v391_v30, %v387_v29  ;;  %v4023_v22 = vrot.slane %v699_v8, %v4007_v11 }
 0x181   :  { %v400_v36 = vld [vmem:[#allocation4 + $0x368] sm:$0xff]  ;;  %v402_v38 = vld [vmem:[#allocation4 + $0x378] sm:$0xff]  ;;  %v2754_v40 = vpack.c.bf16 %v393_v34, %v389_v31  ;;  %v395_v42 = vld [vmem:[#allocation4 + $0x340] sm:$0xff] }
 0x182   :  { %2547 = vmatpush1.bf16.msra.mxu0 %v2546_v49  ;;  %794 = vmatprep.mubr.f32.mxu0 %v714_v32  ;;  %v2564_v41 = vpack.c.bf16 %v400_v36, %v396_v35  ;;  %v399_v43 = vld [vmem:[#allocation4 + $0x360] sm:$0xff]  ;;  %v397_v44 = vld [vmem:[#allocation4 + $0x350] sm:$0xff]  ;;  %v2756_v45 = vpack.c.bf16 %v402_v38, %v398_v37  ;;  %v404_v47 = vld [vmem:[#allocation4 + $0x388] sm:$0xff]  ;;  %v715_v11 = vcombine.high %v4023_v22, %v4023_v22 }
 0x183   :  { %2739 = vmatpush1.bf16.msra.mxu1 %v2738_v50  ;;  %2549 = vmatprep.subr.bf16.mxu0 %v2548_v51  ;;  %v401_v46 = vld [vmem:[#allocation4 + $0x370] sm:$0xff]  ;;  %v408_v48 = vld [vmem:[#allocation4 + $0x3a8] sm:$0xff]  ;;  %v406_v49 = vld [vmem:[#allocation4 + $0x398] sm:$0xff]  ;;  %v2566_v51 = vpack.c.bf16 %v399_v43, %v395_v42 }
 0x184   :  { %2741 = vmatprep.subr.bf16.mxu1 %v2740_v55  ;;  %1007 = vmatprep.mubr.f32.mxu1 %v714_v32  ;;  %v410_v50 = vld [vmem:[#allocation4 + $0x3b8] sm:$0xff]  ;;  %v2758_v52 = vpack.c.bf16 %v401_v46, %v397_v44  ;;  %v2568_v53 = vpack.c.bf16 %v408_v48, %v404_v47  ;;  %v403_v54 = vld [vmem:[#allocation4 + $0x380] sm:$0xff]  ;;  %v405_v56 = vld [vmem:[#allocation4 + $0x390] sm:$0xff] }
 0x185   :  { %v407_v55 = vld [vmem:[#allocation4 + $0x3a0] sm:$0xff]  ;;  %v2760_v57 = vpack.c.bf16 %v410_v50, %v406_v49  ;;  %v409_v58 = vld [vmem:[#allocation4 + $0x3b0] sm:$0xff]  ;;  %v412_v59 = vld [vmem:[#allocation4 + $0x3c8] sm:$0xff] }
 0x186   :  { %2551 = vmatpush1.bf16.msra.mxu0 %v2550_v63  ;;  %v416_v60 = vld [vmem:[#allocation4 + $0x3e8] sm:$0xff]  ;;  %v414_v62 = vld [vmem:[#allocation4 + $0x3d8] sm:$0xff]  ;;  %v411_v3 = vld [vmem:[#allocation4 + $0x3c0] sm:$0xff] }
 0x187   :  { %2743 = vmatpush1.bf16.msra.mxu1 %v2742_v0  ;;  %2553 = vmatprep.subr.bf16.mxu0 %v2552_v1  ;;  %v418_v63 = vld [vmem:[#allocation4 + $0x3f8] sm:$0xff]  ;;  %v2570_v0 = vpack.c.bf16 %v407_v55, %v403_v54  ;;  %v2762_v1 = vpack.c.bf16 %v409_v58, %v405_v56  ;;  %v2572_v2 = vpack.c.bf16 %v416_v60, %v412_v59  ;;  %v415_v4 = vld [vmem:[#allocation4 + $0x3e0] sm:$0xff]  ;;  %v417_v7 = vld [vmem:[#allocation4 + $0x3f0] sm:$0xff] }
 0x188   :  { %2745 = vmatprep.subr.bf16.mxu1 %v2744_v5  ;;  %v413_v5 = vld [vmem:[#allocation4 + $0x3d0] sm:$0xff]  ;;  %v2764_v6 = vpack.c.bf16 %v418_v63, %v414_v62  ;;  %v420_v9 = vld [vmem:[#allocation4 + $0x408] sm:$0xff]  ;;  %v426_v13 = vld [vmem:[#allocation4 + $0x438] sm:$0xff] }
 0x189   :  { %v424_v10 = vld [vmem:[#allocation4 + $0x428] sm:$0xff]  ;;  %v419_v17 = vld [vmem:[#allocation4 + $0x400] sm:$0xff]  ;;  %v425_v21 = vld [vmem:[#allocation4 + $0x430] sm:$0xff] }
 0x18a   :  { %2555 = vmatpush1.bf16.msra.mxu0 %v2554_v12  ;;  %v422_v12 = vld [vmem:[#allocation4 + $0x418] sm:$0xff]  ;;  %v2576_v16 = vpack.c.bf16 %v424_v10, %v420_v9  ;;  %v423_v18 = vld [vmem:[#allocation4 + $0x420] sm:$0xff]  ;;  %v428_v23 = vld [vmem:[#allocation4 + $0x448] sm:$0xff] }
 0x18b   :  { %2747 = vmatpush1.bf16.msra.mxu1 %v2746_v14  ;;  %2557 = vmatprep.subr.bf16.mxu0 %v2556_v15  ;;  %v2574_v14 = vpack.c.bf16 %v415_v4, %v411_v3  ;;  %v2766_v15 = vpack.c.bf16 %v417_v7, %v413_v5  ;;  %v2768_v20 = vpack.c.bf16 %v426_v13, %v422_v12  ;;  %v432_v24 = vld [vmem:[#allocation4 + $0x468] sm:$0xff]  ;;  %v427_v31 = vld [vmem:[#allocation4 + $0x440] sm:$0xff]  ;;  %v433_v35 = vld [vmem:[#allocation4 + $0x470] sm:$0xff] }
 0x18c   :  { %2749 = vmatprep.subr.bf16.mxu1 %v2748_v19  ;;  %v421_v19 = vld [vmem:[#allocation4 + $0x410] sm:$0xff]  ;;  %v2580_v30 = vpack.c.bf16 %v432_v24, %v428_v23  ;;  %v431_v32 = vld [vmem:[#allocation4 + $0x460] sm:$0xff]  ;;  %v436_v36 = vld [vmem:[#allocation4 + $0x488] sm:$0xff] }
 0x18d   :  { %v2770_v29 = vpack.c.bf16 %v425_v21, %v421_v19  ;;  %v440_v37 = vld [vmem:[#allocation4 + $0x4a8] sm:$0xff]  ;;  %v438_v38 = vld [vmem:[#allocation4 + $0x498] sm:$0xff]  ;;  %v435_v43 = vld [vmem:[#allocation4 + $0x480] sm:$0xff] }
 0x18e   :  { %2559 = vmatpush1.bf16.msra.mxu0 %v2558_v26  ;;  %v430_v26 = vld [vmem:[#allocation4 + $0x458] sm:$0xff]  ;;  %v2584_v42 = vpack.c.bf16 %v440_v37, %v436_v36  ;;  %v439_v44 = vld [vmem:[#allocation4 + $0x4a0] sm:$0xff]  ;;  %v441_v47 = vld [vmem:[#allocation4 + $0x4b0] sm:$0xff] }
 0x18f   :  { %2751 = vmatpush1.bf16.msra.mxu1 %v2750_v27  ;;  %2561 = vmatprep.subr.bf16.mxu0 %v2560_v28  ;;  %v434_v27 = vld [vmem:[#allocation4 + $0x478] sm:$0xff]  ;;  %v2578_v28 = vpack.c.bf16 %v423_v18, %v419_v17  ;;  %v444_v48 = vld [vmem:[#allocation4 + $0x4c8] sm:$0xff]  ;;  %v443_v54 = vld [vmem:[#allocation4 + $0x4c0] sm:$0xff] }
 0x190   :  { %2753 = vmatprep.subr.bf16.mxu1 %v2752_v33  ;;  %v429_v33 = vld [vmem:[#allocation4 + $0x450] sm:$0xff]  ;;  %v2772_v34 = vpack.c.bf16 %v434_v27, %v430_v26  ;;  %v448_v49 = vld [vmem:[#allocation4 + $0x4e8] sm:$0xff]  ;;  %v446_v50 = vld [vmem:[#allocation4 + $0x4d8] sm:$0xff] }
 0x191   :  { %v447_v55 = vld [vmem:[#allocation4 + $0x4e0] sm:$0xff]  ;;  %v445_v56 = vld [vmem:[#allocation4 + $0x4d0] sm:$0xff]  ;;  %v452_v59 = vld [vmem:[#allocation4 + $0x508] sm:$0xff] }
 0x192   :  { %2563 = vmatpush1.bf16.msra.mxu0 %v2562_v39  ;;  %v442_v39 = vld [vmem:[#allocation4 + $0x4b8] sm:$0xff]  ;;  %v449_v58 = vld [vmem:[#allocation4 + $0x4f0] sm:$0xff]  ;;  %v456_v60 = vld [vmem:[#allocation4 + $0x528] sm:$0xff] }
 0x193   :  { %2755 = vmatpush1.bf16.msra.mxu1 %v2754_v40  ;;  %2565 = vmatprep.subr.bf16.mxu0 %v2564_v41  ;;  %v2582_v40 = vpack.c.bf16 %v431_v32, %v427_v31  ;;  %v2774_v41 = vpack.c.bf16 %v433_v35, %v429_v33  ;;  %v2776_v46 = vpack.c.bf16 %v442_v39, %v438_v38  ;;  %v454_v62 = vld [vmem:[#allocation4 + $0x518] sm:$0xff]  ;;  %v451_v3 = vld [vmem:[#allocation4 + $0x500] sm:$0xff]  ;;  %v453_v5 = vld [vmem:[#allocation4 + $0x510] sm:$0xff] }
 0x194   :  { %2757 = vmatprep.subr.bf16.mxu1 %v2756_v45  ;;  %v437_v45 = vld [vmem:[#allocation4 + $0x490] sm:$0xff]  ;;  %v458_v63 = vld [vmem:[#allocation4 + $0x538] sm:$0xff]  ;;  %v455_v4 = vld [vmem:[#allocation4 + $0x520] sm:$0xff] }
 0x195   :  { %v457_v7 = vld [vmem:[#allocation4 + $0x530] sm:$0xff]  ;;  %v460_v8 = vld [vmem:[#allocation4 + $0x548] sm:$0xff]  ;;  %v462_v10 = vld [vmem:[#allocation4 + $0x558] sm:$0xff]  ;;  %v2594_v13 = vpack.c.bf16 %v455_v4, %v451_v3 }
 0x196   :  { %2567 = vmatpush1.bf16.msra.mxu0 %v2566_v51  ;;  %v450_v51 = vld [vmem:[#allocation4 + $0x4f8] sm:$0xff]  ;;  %v464_v9 = vld [vmem:[#allocation4 + $0x568] sm:$0xff]  ;;  %v463_v17 = vld [vmem:[#allocation4 + $0x560] sm:$0xff] }
 0x197   :  { %2759 = vmatpush1.bf16.msra.mxu1 %v2758_v52  ;;  %2569 = vmatprep.subr.bf16.mxu0 %v2568_v53  ;;  %v2586_v52 = vpack.c.bf16 %v439_v44, %v435_v43  ;;  %v2588_v53 = vpack.c.bf16 %v448_v49, %v444_v48  ;;  %v466_v12 = vld [vmem:[#allocation4 + $0x578] sm:$0xff]  ;;  %v461_v18 = vld [vmem:[#allocation4 + $0x550] sm:$0xff]  ;;  %v468_v21 = vld [vmem:[#allocation4 + $0x588] sm:$0xff] }
 0x198   :  { %2761 = vmatprep.subr.bf16.mxu1 %v2760_v57  ;;  %v2780_v57 = vpack.c.bf16 %v450_v51, %v446_v50  ;;  %v2788_v19 = vpack.c.bf16 %v466_v12, %v462_v10  ;;  %v472_v23 = vld [vmem:[#allocation4 + $0x5a8] sm:$0xff]  ;;  %v470_v24 = vld [vmem:[#allocation4 + $0x598] sm:$0xff]  ;;  %v471_v31 = vld [vmem:[#allocation4 + $0x5a0] sm:$0xff] }
 0x199   :  { %v474_v26 = vld [vmem:[#allocation4 + $0x5b8] sm:$0xff]  ;;  %v469_v32 = vld [vmem:[#allocation4 + $0x590] sm:$0xff]  ;;  %v476_v35 = vld [vmem:[#allocation4 + $0x5c8] sm:$0xff] }
 0x19a   :  { %2571 = vmatpush1.bf16.msra.mxu0 %v2570_v0  ;;  %v2590_v0 = vpack.c.bf16 %v447_v55, %v443_v54  ;;  %v2792_v33 = vpack.c.bf16 %v474_v26, %v470_v24  ;;  %v480_v36 = vld [vmem:[#allocation4 + $0x5e8] sm:$0xff]  ;;  %v478_v37 = vld [vmem:[#allocation4 + $0x5d8] sm:$0xff]  ;;  %v477_v43 = vld [vmem:[#allocation4 + $0x5d0] sm:$0xff] }
 0x19b   :  { %2763 = vmatpush1.bf16.msra.mxu1 %v2762_v1  ;;  %2573 = vmatprep.subr.bf16.mxu0 %v2572_v2  ;;  %v2782_v1 = vpack.c.bf16 %v449_v58, %v445_v56  ;;  %v2592_v2 = vpack.c.bf16 %v456_v60, %v452_v59  ;;  %v486_v48 = vld [vmem:[#allocation4 + $0x618] sm:$0xff]  ;;  %v485_v54 = vld [vmem:[#allocation4 + $0x610] sm:$0xff]  ;;  %v496_v58 = vld [vmem:[#allocation4 + $0x668] sm:$0xff] }
 0x19c   :  { %2765 = vmatprep.subr.bf16.mxu1 %v2764_v6  ;;  %v2784_v6 = vpack.c.bf16 %v458_v63, %v454_v62  ;;  %v490_v49 = vld [vmem:[#allocation4 + $0x638] sm:$0xff]  ;;  %v489_v56 = vld [vmem:[#allocation4 + $0x630] sm:$0xff] }
 0x19d   :  { %v2800_v55 = vpack.c.bf16 %v490_v49, %v486_v48  ;;  %v494_v59 = vld [vmem:[#allocation4 + $0x658] sm:$0xff]  ;;  %v2802_v63 = vpack.c.bf16 %v489_v56, %v485_v54  ;;  %v493_v3 = vld [vmem:[#allocation4 + $0x650] sm:$0xff]  ;;  %v536_v56 = vld [vmem:[#allocation4 + $0x7a8] sm:$0xff] }
 0x19e   :  { %2575 = vmatpush1.bf16.msra.mxu0 %v2574_v14  ;;  %v2786_v14 = vpack.c.bf16 %v457_v7, %v453_v5  ;;  %v498_v60 = vld [vmem:[#allocation4 + $0x678] sm:$0xff]  ;;  %v497_v5 = vld [vmem:[#allocation4 + $0x670] sm:$0xff]  ;;  %v504_v7 = vld [vmem:[#allocation4 + $0x6a8] sm:$0xff] }
 0x19f   :  { %2767 = vmatpush1.bf16.msra.mxu1 %v2766_v15  ;;  %2577 = vmatprep.subr.bf16.mxu0 %v2576_v16  ;;  %v2596_v15 = vpack.c.bf16 %v464_v9, %v460_v8  ;;  %v459_v16 = vld [vmem:[#allocation4 + $0x540] sm:$0xff]  ;;  %v2804_v4 = vpack.c.bf16 %v498_v60, %v494_v59  ;;  %v502_v8 = vld [vmem:[#allocation4 + $0x698] sm:$0xff]  ;;  %v2806_v12 = vpack.c.bf16 %v497_v5, %v493_v3  ;;  %v529_v54 = vld [vmem:[#allocation4 + $0x770] sm:$0xff] }
 0x1a0   :  { %2769 = vmatprep.subr.bf16.mxu1 %v2768_v20  ;;  %v465_v20 = vld [vmem:[#allocation4 + $0x570] sm:$0xff]  ;;  %v2598_v27 = vpack.c.bf16 %v463_v17, %v459_v16  ;;  %v506_v9 = vld [vmem:[#allocation4 + $0x6b8] sm:$0xff]  ;;  %v544_v5 = vld [vmem:[#allocation4 + $0x7e8] sm:$0xff] }
 0x1a1   :  { %795 = vmatmul.mubr.f32.vlgmr.msra.gmra.mrb[0].mxu0 %v4016_v25  ;;  %v501_v16 = vld [vmem:[#allocation4 + $0x690] sm:$0xff]  ;;  %v2808_v17 = vpack.c.bf16 %v506_v9, %v502_v8 }
 0x1a2   :  { %2579 = vmatpush1.bf16.msra.mxu0 %v2578_v28  ;;  %1008 = vmatmul.mubr.f32.vlgmr.msra.gmra.mrb[0].mxu1 %v4016_v25  ;;  %v2778_v25 = vpack.c.bf16 %v441_v47, %v437_v45  ;;  %v2790_v28 = vpack.c.bf16 %v465_v20, %v461_v18  ;;  %v481_v45 = vld [vmem:[#allocation4 + $0x5f0] sm:$0xff]  ;;  %v488_v47 = vld [vmem:[#allocation4 + $0x628] sm:$0xff] }
 0x1a3   :  { %2771 = vmatpush1.bf16.msra.mxu1 %v2770_v29  ;;  %2581 = vmatprep.subr.bf16.mxu0 %v2580_v30  ;;  %v2600_v29 = vpack.c.bf16 %v472_v23, %v468_v21  ;;  %v467_v30 = vld [vmem:[#allocation4 + $0x580] sm:$0xff]  ;;  %v2798_v51 = vpack.c.bf16 %v481_v45, %v477_v43  ;;  %v505_v18 = vld [vmem:[#allocation4 + $0x6b0] sm:$0xff]  ;;  %v512_v20 = vld [vmem:[#allocation4 + $0x6e8] sm:$0xff] }
 0x1a4   :  { %2773 = vmatprep.subr.bf16.mxu1 %v2772_v34  ;;  %865 = vmatprep.mubr.f32.mxu0 %v715_v11  ;;  %v473_v34 = vld [vmem:[#allocation4 + $0x5b0] sm:$0xff]  ;;  %v2602_v38 = vpack.c.bf16 %v471_v31, %v467_v30  ;;  %v510_v21 = vld [vmem:[#allocation4 + $0x6d8] sm:$0xff]  ;;  %v2810_v26 = vpack.c.bf16 %v505_v18, %v501_v16  ;;  %v528_v45 = vld [vmem:[#allocation4 + $0x768] sm:$0xff] }
 0x1a5   :  { %1078 = vmatprep.mubr.f32.mxu1 %v715_v11  ;;  %v482_v11 = vld [vmem:[#allocation4 + $0x5f8] sm:$0xff]  ;;  %v2794_v39 = vpack.c.bf16 %v473_v34, %v469_v32  ;;  %v509_v30 = vld [vmem:[#allocation4 + $0x6d0] sm:$0xff]  ;;  %v520_v34 = vld [vmem:[#allocation4 + $0x728] sm:$0xff] }
 0x1a6   :  { %2583 = vmatpush1.bf16.msra.mxu0 %v2582_v40  ;;  %v2604_v40 = vpack.c.bf16 %v480_v36, %v476_v35  ;;  %v2796_v44 = vpack.c.bf16 %v482_v11, %v478_v37  ;;  %v514_v23 = vld [vmem:[#allocation4 + $0x6f8] sm:$0xff]  ;;  %v513_v32 = vld [vmem:[#allocation4 + $0x6f0] sm:$0xff]  ;;  %v552_v18 = vld [vmem:[#allocation4 + $0x828] sm:$0xff] }
 0x1a7   :  { %2775 = vmatpush1.bf16.msra.mxu1 %v2774_v41  ;;  %2585 = vmatprep.subr.bf16.mxu0 %v2584_v42  ;;  %v475_v41 = vld [vmem:[#allocation4 + $0x5c0] sm:$0xff]  ;;  %v2812_v31 = vpack.c.bf16 %v514_v23, %v510_v21  ;;  %v518_v35 = vld [vmem:[#allocation4 + $0x718] sm:$0xff]  ;;  %v2814_v11 = vpack.c.bf16 %v513_v32, %v509_v30  ;;  %v521_v43 = vld [vmem:[#allocation4 + $0x730] sm:$0xff] }
 0x1a8   :  { %2777 = vmatprep.subr.bf16.mxu1 %v2776_v46  ;;  %v479_v42 = vld [vmem:[#allocation4 + $0x5e0] sm:$0xff]  ;;  %v484_v46 = vld [vmem:[#allocation4 + $0x608] sm:$0xff]  ;;  %v522_v36 = vld [vmem:[#allocation4 + $0x738] sm:$0xff] }
 0x1a9   :  { %v2606_v50 = vpack.c.bf16 %v479_v42, %v475_v41  ;;  %v517_v41 = vld [vmem:[#allocation4 + $0x710] sm:$0xff]  ;;  %v2816_v42 = vpack.c.bf16 %v522_v36, %v518_v35  ;;  %v560_v32 = vld [vmem:[#allocation4 + $0x868] sm:$0xff] }
 0x1aa   :  { %2587 = vmatpush1.bf16.msra.mxu0 %v2586_v52  ;;  %v2608_v52 = vpack.c.bf16 %v488_v47, %v484_v46  ;;  %v526_v46 = vld [vmem:[#allocation4 + $0x758] sm:$0xff]  ;;  %v2818_v49 = vpack.c.bf16 %v521_v43, %v517_v41  ;;  %v537_v3 = vld [vmem:[#allocation4 + $0x7b0] sm:$0xff]  ;;  %v4032_v36 = vld.sshfl [vmem:[%s4157_s20 + $0x8] sm:$0x33 pattern:$0x76325410] }
 0x1ab   :  { %2779 = vmatpush1.bf16.msra.mxu1 %v2778_v25  ;;  %2589 = vmatprep.subr.bf16.mxu0 %v2588_v53  ;;  %v483_v25 = vld [vmem:[#allocation4 + $0x600] sm:$0xff]  ;;  %v530_v47 = vld [vmem:[#allocation4 + $0x778] sm:$0xff]  ;;  %v545_v16 = vld [vmem:[#allocation4 + $0x7f0] sm:$0xff] }
 0x1ac   :  { %2781 = vmatprep.subr.bf16.mxu1 %v2780_v57  ;;  %v487_v53 = vld [vmem:[#allocation4 + $0x620] sm:$0xff]  ;;  %v492_v57 = vld [vmem:[#allocation4 + $0x648] sm:$0xff]  ;;  %v553_v30 = vld [vmem:[#allocation4 + $0x830] sm:$0xff] }
 0x1ad   :  { %v2610_v62 = vpack.c.bf16 %v487_v53, %v483_v25  ;;  %v525_v25 = vld [vmem:[#allocation4 + $0x750] sm:$0xff]  ;;  %v2820_v53 = vpack.c.bf16 %v530_v47, %v526_v46  ;;  %v564_v43 = vld [vmem:[#allocation4 + $0x888] sm:$0xff]  ;;  %v566_v46 = vld [vmem:[#allocation4 + $0x898] sm:$0xff] }
 0x1ae   :  { %2591 = vmatpush1.bf16.msra.mxu0 %v2590_v0  ;;  %v2612_v0 = vpack.c.bf16 %v496_v58, %v492_v57  ;;  %v534_v57 = vld [vmem:[#allocation4 + $0x798] sm:$0xff]  ;;  %v2822_v60 = vpack.c.bf16 %v529_v54, %v525_v25  ;;  %v565_v25 = vld [vmem:[#allocation4 + $0x890] sm:$0xff] }
 0x1af   :  { %2783 = vmatpush1.bf16.msra.mxu1 %v2782_v1  ;;  %2593 = vmatprep.subr.bf16.mxu0 %v2592_v2  ;;  %v491_v1 = vld [vmem:[#allocation4 + $0x640] sm:$0xff]  ;;  %v538_v58 = vld [vmem:[#allocation4 + $0x7b8] sm:$0xff]  ;;  %v569_v54 = vld [vmem:[#allocation4 + $0x8b0] sm:$0xff] }
 0x1b0   :  { %2785 = vmatprep.subr.bf16.mxu1 %v2784_v6  ;;  %v495_v2 = vld [vmem:[#allocation4 + $0x660] sm:$0xff]  ;;  %v500_v6 = vld [vmem:[#allocation4 + $0x688] sm:$0xff]  ;;  %v570_v47 = vld [vmem:[#allocation4 + $0x8b8] sm:$0xff] }
 0x1b1   :  { %v2614_v10 = vpack.c.bf16 %v495_v2, %v491_v1  ;;  %v533_v1 = vld [vmem:[#allocation4 + $0x790] sm:$0xff]  ;;  %v2824_v2 = vpack.c.bf16 %v538_v58, %v534_v57  ;;  %v574_v57 = vld [vmem:[#allocation4 + $0x8d8] sm:$0xff] }
 0x1b2   :  { %2595 = vmatpush1.bf16.msra.mxu0 %v2594_v13  ;;  %v2616_v13 = vpack.c.bf16 %v504_v7, %v500_v6  ;;  %v542_v6 = vld [vmem:[#allocation4 + $0x7d8] sm:$0xff]  ;;  %v2826_v9 = vpack.c.bf16 %v537_v3, %v533_v1  ;;  %v580_v3 = vld [vmem:[#allocation4 + $0x908] sm:$0xff] }
 0x1b3   :  { %2787 = vmatpush1.bf16.msra.mxu1 %v2786_v14  ;;  %2597 = vmatprep.subr.bf16.mxu0 %v2596_v15  ;;  %v499_v14 = vld [vmem:[#allocation4 + $0x680] sm:$0xff]  ;;  %v546_v7 = vld [vmem:[#allocation4 + $0x7f8] sm:$0xff] }
 0x1b4   :  { %2789 = vmatprep.subr.bf16.mxu1 %v2788_v19  ;;  %v503_v15 = vld [vmem:[#allocation4 + $0x6a0] sm:$0xff]  ;;  %v508_v19 = vld [vmem:[#allocation4 + $0x6c8] sm:$0xff]  ;;  %v578_v58 = vld [vmem:[#allocation4 + $0x8f8] sm:$0xff] }
 0x1b5   :  { %v2618_v24 = vpack.c.bf16 %v503_v15, %v499_v14  ;;  %v541_v14 = vld [vmem:[#allocation4 + $0x7d0] sm:$0xff]  ;;  %v2828_v15 = vpack.c.bf16 %v546_v7, %v542_v6  ;;  %v2844_v1 = vpack.c.bf16 %v578_v58, %v574_v57  ;;  %v586_v6 = vld [vmem:[#allocation4 + $0x938] sm:$0xff] }
 0x1b6   :  { %2599 = vmatpush1.bf16.msra.mxu0 %v2598_v27  ;;  %v2620_v27 = vpack.c.bf16 %v512_v20, %v508_v19  ;;  %v550_v19 = vld [vmem:[#allocation4 + $0x818] sm:$0xff]  ;;  %v2830_v23 = vpack.c.bf16 %v545_v16, %v541_v14  ;;  %v588_v16 = vld [vmem:[#allocation4 + $0x948] sm:$0xff] }
 0x1b7   :  { %2791 = vmatpush1.bf16.msra.mxu1 %v2790_v28  ;;  %2601 = vmatprep.subr.bf16.mxu0 %v2600_v29  ;;  %v507_v28 = vld [vmem:[#allocation4 + $0x6c0] sm:$0xff]  ;;  %v554_v20 = vld [vmem:[#allocation4 + $0x838] sm:$0xff] }
 0x1b8   :  { %2793 = vmatprep.subr.bf16.mxu1 %v2792_v33  ;;  %v511_v29 = vld [vmem:[#allocation4 + $0x6e0] sm:$0xff]  ;;  %v516_v33 = vld [vmem:[#allocation4 + $0x708] sm:$0xff] }
 0x1b9   :  { %v2622_v37 = vpack.c.bf16 %v511_v29, %v507_v28  ;;  %v549_v28 = vld [vmem:[#allocation4 + $0x810] sm:$0xff]  ;;  %v2832_v29 = vpack.c.bf16 %v554_v20, %v550_v19  ;;  %v594_v19 = vld [vmem:[#allocation4 + $0x978] sm:$0xff] }
 0x1ba   :  { %2603 = vmatpush1.bf16.msra.mxu0 %v2602_v38  ;;  %v2624_v38 = vpack.c.bf16 %v520_v34, %v516_v33  ;;  %v558_v33 = vld [vmem:[#allocation4 + $0x858] sm:$0xff] }
 0x1bb   :  { %2795 = vmatpush1.bf16.msra.mxu1 %v2794_v39  ;;  %2605 = vmatprep.subr.bf16.mxu0 %v2604_v40  ;;  %v515_v39 = vld [vmem:[#allocation4 + $0x700] sm:$0xff]  ;;  %v562_v34 = vld [vmem:[#allocation4 + $0x878] sm:$0xff] }
 0x1bc   :  { %2797 = vmatprep.subr.bf16.mxu1 %v2796_v44  ;;  %v519_v40 = vld [vmem:[#allocation4 + $0x720] sm:$0xff]  ;;  %v524_v44 = vld [vmem:[#allocation4 + $0x748] sm:$0xff]  ;;  %v2836_v41 = vpack.c.bf16 %v562_v34, %v558_v33  ;;  %v602_v33 = vld [vmem:[#allocation4 + $0x9b8] sm:$0xff] }
 0x1bd   :  { %v2626_v48 = vpack.c.bf16 %v519_v40, %v515_v39  ;;  %v559_v39 = vld [vmem:[#allocation4 + $0x860] sm:$0xff]  ;;  %v557_v40 = vld [vmem:[#allocation4 + $0x850] sm:$0xff] }
 0x1be   :  { %2607 = vmatpush1.bf16.msra.mxu0 %v2606_v50  ;;  %v2628_v50 = vpack.c.bf16 %v528_v45, %v524_v44  ;;  %v568_v44 = vld [vmem:[#allocation4 + $0x8a8] sm:$0xff]  ;;  %v723_v45 = vcombine.high %v4032_v36, %v4032_v36 }
 0x1bf   :  { %2799 = vmatpush1.bf16.msra.mxu1 %v2798_v51  ;;  %2609 = vmatprep.subr.bf16.mxu0 %v2608_v52  ;;  %v523_v51 = vld [vmem:[#allocation4 + $0x740] sm:$0xff] }
 0x1c0   :  { %2801 = vmatprep.subr.bf16.mxu1 %v2800_v55  ;;  %v527_v52 = vld [vmem:[#allocation4 + $0x760] sm:$0xff]  ;;  %v532_v55 = vld [vmem:[#allocation4 + $0x788] sm:$0xff] }
 0x1c1   :  { %v2630_v59 = vpack.c.bf16 %v527_v52, %v523_v51  ;;  %v563_v51 = vld [vmem:[#allocation4 + $0x880] sm:$0xff] }
 0x1c2   :  { %2611 = vmatpush1.bf16.msra.mxu0 %v2610_v62  ;;  %v2632_v62 = vpack.c.bf16 %v536_v56, %v532_v55  ;;  %v567_v52 = vld [vmem:[#allocation4 + $0x8a0] sm:$0xff]  ;;  %v572_v55 = vld [vmem:[#allocation4 + $0x8c8] sm:$0xff] }
 0x1c3   :  { %2803 = vmatpush1.bf16.msra.mxu1 %v2802_v63  ;;  %2613 = vmatprep.subr.bf16.mxu0 %v2612_v0  ;;  %v531_v63 = vld [vmem:[#allocation4 + $0x780] sm:$0xff]  ;;  %v576_v56 = vld [vmem:[#allocation4 + $0x8e8] sm:$0xff] }
 0x1c4   :  { %2805 = vmatprep.subr.bf16.mxu1 %v2804_v4  ;;  %v535_v0 = vld [vmem:[#allocation4 + $0x7a0] sm:$0xff]  ;;  %v540_v4 = vld [vmem:[#allocation4 + $0x7c8] sm:$0xff] }
 0x1c5   :  { %v2634_v8 = vpack.c.bf16 %v535_v0, %v531_v63  ;;  %v575_v63 = vld [vmem:[#allocation4 + $0x8e0] sm:$0xff]  ;;  %v573_v0 = vld [vmem:[#allocation4 + $0x8d0] sm:$0xff] }
 0x1c6   :  { %2615 = vmatpush1.bf16.msra.mxu0 %v2614_v10  ;;  %v2636_v10 = vpack.c.bf16 %v544_v5, %v540_v4  ;;  %v584_v4 = vld [vmem:[#allocation4 + $0x928] sm:$0xff]  ;;  %v582_v5 = vld [vmem:[#allocation4 + $0x918] sm:$0xff] }
 0x1c7   :  { %2807 = vmatpush1.bf16.msra.mxu1 %v2806_v12  ;;  %2617 = vmatprep.subr.bf16.mxu0 %v2616_v13  ;;  %v539_v12 = vld [vmem:[#allocation4 + $0x7c0] sm:$0xff]  ;;  %v2848_v14 = vpack.c.bf16 %v586_v6, %v582_v5 }
 0x1c8   :  { %2809 = vmatprep.subr.bf16.mxu1 %v2808_v17  ;;  %v543_v13 = vld [vmem:[#allocation4 + $0x7e0] sm:$0xff]  ;;  %v548_v17 = vld [vmem:[#allocation4 + $0x808] sm:$0xff] }
 0x1c9   :  { %v2638_v21 = vpack.c.bf16 %v543_v13, %v539_v12  ;;  %v583_v12 = vld [vmem:[#allocation4 + $0x920] sm:$0xff]  ;;  %v581_v13 = vld [vmem:[#allocation4 + $0x910] sm:$0xff] }
 0x1ca   :  { %2619 = vmatpush1.bf16.msra.mxu0 %v2618_v24  ;;  %v2640_v24 = vpack.c.bf16 %v552_v18, %v548_v17  ;;  %v592_v17 = vld [vmem:[#allocation4 + $0x968] sm:$0xff]  ;;  %v590_v18 = vld [vmem:[#allocation4 + $0x958] sm:$0xff] }
 0x1cb   :  { %2811 = vmatpush1.bf16.msra.mxu1 %v2810_v26  ;;  %2621 = vmatprep.subr.bf16.mxu0 %v2620_v27  ;;  %v547_v26 = vld [vmem:[#allocation4 + $0x800] sm:$0xff] }
 0x1cc   :  { %2813 = vmatprep.subr.bf16.mxu1 %v2812_v31  ;;  %v551_v27 = vld [vmem:[#allocation4 + $0x820] sm:$0xff]  ;;  %v556_v31 = vld [vmem:[#allocation4 + $0x848] sm:$0xff] }
 0x1cd   :  { %v2642_v35 = vpack.c.bf16 %v551_v27, %v547_v26  ;;  %v591_v26 = vld [vmem:[#allocation4 + $0x960] sm:$0xff]  ;;  %v589_v27 = vld [vmem:[#allocation4 + $0x950] sm:$0xff] }
 0x1ce   :  { %2623 = vmatpush1.bf16.msra.mxu0 %v2622_v37  ;;  %v2834_v37 = vpack.c.bf16 %v553_v30, %v549_v28  ;;  %v2852_v28 = vpack.c.bf16 %v594_v19, %v590_v18  ;;  %v596_v30 = vld [vmem:[#allocation4 + $0x988] sm:$0xff] }
 0x1cf   :  { %2815 = vmatpush1.bf16.msra.mxu1 %v2814_v11  ;;  %2625 = vmatprep.subr.bf16.mxu0 %v2624_v38  ;;  %v2644_v11 = vpack.c.bf16 %v560_v32, %v556_v31  ;;  %v555_v38 = vld [vmem:[#allocation4 + $0x840] sm:$0xff]  ;;  %v600_v31 = vld [vmem:[#allocation4 + $0x9a8] sm:$0xff]  ;;  %v598_v32 = vld [vmem:[#allocation4 + $0x998] sm:$0xff] }
 0x1d0   :  { %2817 = vmatprep.subr.bf16.mxu1 %v2816_v42  ;;  %v561_v42 = vld [vmem:[#allocation4 + $0x870] sm:$0xff] }
 0x1d2   :  { %2627 = vmatpush1.bf16.msra.mxu0 %v2626_v48  ;;  %v2646_v48 = vpack.c.bf16 %v559_v39, %v555_v38  ;;  %v599_v38 = vld [vmem:[#allocation4 + $0x9a0] sm:$0xff]  ;;  %v597_v39 = vld [vmem:[#allocation4 + $0x990] sm:$0xff] }
 0x1d3   :  { %2819 = vmatpush1.bf16.msra.mxu1 %v2818_v49  ;;  %2629 = vmatprep.subr.bf16.mxu0 %v2628_v50  ;;  %v2838_v49 = vpack.c.bf16 %v561_v42, %v557_v40  ;;  %v2648_v50 = vpack.c.bf16 %v568_v44, %v564_v43  ;;  %v2856_v40 = vpack.c.bf16 %v602_v33, %v598_v32  ;;  %v604_v42 = vld [vmem:[#allocation4 + $0x9c8] sm:$0xff]  ;;  %v606_v44 = vld [vmem:[#allocation4 + $0x9d8] sm:$0xff] }
 0x1d4   :  { %2821 = vmatprep.subr.bf16.mxu1 %v2820_v53  ;;  %v2840_v53 = vpack.c.bf16 %v570_v47, %v566_v46  ;;  %v608_v43 = vld [vmem:[#allocation4 + $0x9e8] sm:$0xff] }
 0x1d6   :  { %2631 = vmatpush1.bf16.msra.mxu0 %v2630_v59  ;;  %v2650_v59 = vpack.c.bf16 %v567_v52, %v563_v51  ;;  %v605_v51 = vld [vmem:[#allocation4 + $0x9d0] sm:$0xff] }
 0x1d7   :  { %2823 = vmatpush1.bf16.msra.mxu1 %v2822_v60  ;;  %2633 = vmatprep.subr.bf16.mxu0 %v2632_v62  ;;  %v2652_v60 = vpack.c.bf16 %v576_v56, %v572_v55  ;;  %v571_v62 = vld [vmem:[#allocation4 + $0x8c0] sm:$0xff]  ;;  %v614_v55 = vld [vmem:[#allocation4 + $0xa18] sm:$0xff] }
 0x1d8   :  { %2825 = vmatprep.subr.bf16.mxu1 %v2824_v2  ;;  %v577_v2 = vld [vmem:[#allocation4 + $0x8f0] sm:$0xff]  ;;  %v2654_v7 = vpack.c.bf16 %v575_v63, %v571_v62  ;;  %v618_v56 = vld [vmem:[#allocation4 + $0xa38] sm:$0xff] }
 0x1d9   :  { %v613_v62 = vld [vmem:[#allocation4 + $0xa10] sm:$0xff]  ;;  %v2864_v63 = vpack.c.bf16 %v618_v56, %v614_v55 }
 0x1da   :  { %2635 = vmatpush1.bf16.msra.mxu0 %v2634_v8  ;;  %v2846_v8 = vpack.c.bf16 %v577_v2, %v573_v0  ;;  %v617_v0 = vld [vmem:[#allocation4 + $0xa30] sm:$0xff]  ;;  %v624_v2 = vld [vmem:[#allocation4 + $0xa68] sm:$0xff] }
 0x1db   :  { %2827 = vmatpush1.bf16.msra.mxu1 %v2826_v9  ;;  %2637 = vmatprep.subr.bf16.mxu0 %v2636_v10  ;;  %v2656_v9 = vpack.c.bf16 %v584_v4, %v580_v3  ;;  %v579_v10 = vld [vmem:[#allocation4 + $0x900] sm:$0xff]  ;;  %v622_v3 = vld [vmem:[#allocation4 + $0xa58] sm:$0xff]  ;;  %v2866_v6 = vpack.c.bf16 %v617_v0, %v613_v62  ;;  %v657_v62 = vld [vmem:[#allocation4 + $0xb70] sm:$0xff] }
 0x1dc   :  { %2829 = vmatprep.subr.bf16.mxu1 %v2828_v15  ;;  %v585_v15 = vld [vmem:[#allocation4 + $0x930] sm:$0xff]  ;;  %v2658_v20 = vpack.c.bf16 %v583_v12, %v579_v10  ;;  %v626_v4 = vld [vmem:[#allocation4 + $0xa78] sm:$0xff]  ;;  %v664_v0 = vld [vmem:[#allocation4 + $0xba8] sm:$0xff] }
 0x1dd   :  { %v621_v10 = vld [vmem:[#allocation4 + $0xa50] sm:$0xff]  ;;  %v2868_v12 = vpack.c.bf16 %v626_v4, %v622_v3 }
 0x1de   :  { %2639 = vmatpush1.bf16.msra.mxu0 %v2638_v21  ;;  %v2850_v21 = vpack.c.bf16 %v585_v15, %v581_v13  ;;  %v625_v13 = vld [vmem:[#allocation4 + $0xa70] sm:$0xff]  ;;  %v632_v15 = vld [vmem:[#allocation4 + $0xaa8] sm:$0xff] }
 0x1df   :  { %2831 = vmatpush1.bf16.msra.mxu1 %v2830_v23  ;;  %2641 = vmatprep.subr.bf16.mxu0 %v2640_v24  ;;  %v2660_v23 = vpack.c.bf16 %v592_v17, %v588_v16  ;;  %v587_v24 = vld [vmem:[#allocation4 + $0x940] sm:$0xff]  ;;  %v630_v16 = vld [vmem:[#allocation4 + $0xa98] sm:$0xff]  ;;  %v2870_v19 = vpack.c.bf16 %v625_v13, %v621_v10  ;;  %v665_v10 = vld [vmem:[#allocation4 + $0xbb0] sm:$0xff] }
 0x1e0   :  { %2833 = vmatprep.subr.bf16.mxu1 %v2832_v29  ;;  %v593_v29 = vld [vmem:[#allocation4 + $0x970] sm:$0xff]  ;;  %v2662_v34 = vpack.c.bf16 %v591_v26, %v587_v24  ;;  %v634_v17 = vld [vmem:[#allocation4 + $0xab8] sm:$0xff]  ;;  %v672_v13 = vld [vmem:[#allocation4 + $0xbe8] sm:$0xff] }
 0x1e1   :  { %866 = vmatmul.mubr.f32.vlgmr.msra.gmra.mrb[0].mxu0 %v4023_v22  ;;  %v629_v24 = vld [vmem:[#allocation4 + $0xa90] sm:$0xff]  ;;  %v2872_v26 = vpack.c.bf16 %v634_v17, %v630_v16 }
 0x1e2   :  { %2643 = vmatpush1.bf16.msra.mxu0 %v2642_v35  ;;  %1079 = vmatmul.mubr.f32.vlgmr.msra.gmra.mrb[0].mxu1 %v4023_v22  ;;  %v2842_v22 = vpack.c.bf16 %v569_v54, %v565_v25  ;;  %v2854_v35 = vpack.c.bf16 %v593_v29, %v589_v27  ;;  %v609_v25 = vld [vmem:[#allocation4 + $0x9f0] sm:$0xff]  ;;  %v616_v54 = vld [vmem:[#allocation4 + $0xa28] sm:$0xff] }
 0x1e3   :  { %2835 = vmatpush1.bf16.msra.mxu1 %v2834_v37  ;;  %2645 = vmatprep.subr.bf16.mxu0 %v2644_v11  ;;  %v2664_v37 = vpack.c.bf16 %v600_v31, %v596_v30  ;;  %v595_v11 = vld [vmem:[#allocation4 + $0x980] sm:$0xff]  ;;  %v2862_v58 = vpack.c.bf16 %v609_v25, %v605_v51  ;;  %v633_v27 = vld [vmem:[#allocation4 + $0xab0] sm:$0xff]  ;;  %v640_v29 = vld [vmem:[#allocation4 + $0xae8] sm:$0xff] }
 0x1e4   :  { %2837 = vmatprep.subr.bf16.mxu1 %v2836_v41  ;;  %936 = vmatprep.mubr.f32.mxu0 %v723_v45  ;;  %v601_v41 = vld [vmem:[#allocation4 + $0x9b0] sm:$0xff]  ;;  %v2666_v46 = vpack.c.bf16 %v599_v38, %v595_v11  ;;  %v638_v30 = vld [vmem:[#allocation4 + $0xad8] sm:$0xff]  ;;  %v2874_v33 = vpack.c.bf16 %v633_v27, %v629_v24  ;;  %v656_v25 = vld [vmem:[#allocation4 + $0xb68] sm:$0xff] }
 0x1e5   :  { %1149 = vmatprep.mubr.f32.mxu1 %v723_v45  ;;  %v610_v45 = vld [vmem:[#allocation4 + $0x9f8] sm:$0xff]  ;;  %v2858_v47 = vpack.c.bf16 %v601_v41, %v597_v39  ;;  %v637_v11 = vld [vmem:[#allocation4 + $0xad0] sm:$0xff]  ;;  %v648_v41 = vld [vmem:[#allocation4 + $0xb28] sm:$0xff] }
 0x1e6   :  { %2647 = vmatpush1.bf16.msra.mxu0 %v2646_v48  ;;  %v2668_v48 = vpack.c.bf16 %v608_v43, %v604_v42  ;;  %v2860_v52 = vpack.c.bf16 %v610_v45, %v606_v44  ;;  %v642_v31 = vld [vmem:[#allocation4 + $0xaf8] sm:$0xff]  ;;  %v641_v39 = vld [vmem:[#allocation4 + $0xaf0] sm:$0xff] }
 0x1e7   :  { %2839 = vmatpush1.bf16.msra.mxu1 %v2838_v49  ;;  %2649 = vmatprep.subr.bf16.mxu0 %v2648_v50  ;;  %v603_v49 = vld [vmem:[#allocation4 + $0x9c0] sm:$0xff]  ;;  %v2876_v38 = vpack.c.bf16 %v642_v31, %v638_v30  ;;  %v646_v42 = vld [vmem:[#allocation4 + $0xb18] sm:$0xff]  ;;  %v2878_v45 = vpack.c.bf16 %v641_v39, %v637_v11  ;;  %v649_v51 = vld [vmem:[#allocation4 + $0xb30] sm:$0xff] }
 0x1e8   :  { %2841 = vmatprep.subr.bf16.mxu1 %v2840_v53  ;;  %v607_v50 = vld [vmem:[#allocation4 + $0x9e0] sm:$0xff]  ;;  %v612_v53 = vld [vmem:[#allocation4 + $0xa08] sm:$0xff]  ;;  %v650_v43 = vld [vmem:[#allocation4 + $0xb38] sm:$0xff] }
 0x1e9   :  { %v2670_v57 = vpack.c.bf16 %v607_v50, %v603_v49  ;;  %v645_v49 = vld [vmem:[#allocation4 + $0xb10] sm:$0xff]  ;;  %v2880_v50 = vpack.c.bf16 %v650_v43, %v646_v42  ;;  %v1163_v27 = vld [vmem:[#allocation7 + $0x18] sm:$0xff]  ;;  %v1160_v31 = vld [vmem:[#allocation7] sm:$0xff] }
 0x1ea   :  { %2651 = vmatpush1.bf16.msra.mxu0 %v2650_v59  ;;  %v2672_v59 = vpack.c.bf16 %v616_v54, %v612_v53  ;;  %v654_v53 = vld [vmem:[#allocation4 + $0xb58] sm:$0xff]  ;;  %v2882_v56 = vpack.c.bf16 %v649_v51, %v645_v49  ;;  %v673_v24 = vld [vmem:[#allocation4 + $0xbf0] sm:$0xff]  ;;  %v1164_v11 = vld [vmem:[#allocation7 + $0x20] sm:$0xff] }
 0x1eb   :  { %2843 = vmatpush1.bf16.msra.mxu1 %v2842_v22  ;;  %2653 = vmatprep.subr.bf16.mxu0 %v2652_v60  ;;  %v611_v22 = vld [vmem:[#allocation4 + $0xa00] sm:$0xff]  ;;  %v658_v54 = vld [vmem:[#allocation4 + $0xb78] sm:$0xff]  ;;  %v1169_v39 = vld [vmem:[#allocation7 + $0x48] sm:$0xff] }
 0x1ec   :  { %2845 = vmatprep.subr.bf16.mxu1 %v2844_v1  ;;  %v615_v60 = vld [vmem:[#allocation4 + $0xa20] sm:$0xff]  ;;  %v620_v1 = vld [vmem:[#allocation4 + $0xa48] sm:$0xff] }
 0x1ed   :  { %v2674_v5 = vpack.c.bf16 %v615_v60, %v611_v22  ;;  %v653_v22 = vld [vmem:[#allocation4 + $0xb50] sm:$0xff]  ;;  %v2884_v60 = vpack.c.bf16 %v658_v54, %v654_v53  ;;  %v1168_v43 = vld [vmem:[#allocation7 + $0x40] sm:$0xff] }
 0x1ee   :  { %2655 = vmatpush1.bf16.msra.mxu0 %v2654_v7  ;;  %v2676_v7 = vpack.c.bf16 %v624_v2, %v620_v1  ;;  %v662_v1 = vld [vmem:[#allocation4 + $0xb98] sm:$0xff]  ;;  %v2886_v4 = vpack.c.bf16 %v657_v62, %v653_v22  ;;  %v1172_v49 = vld [vmem:[#allocation7 + $0x60] sm:$0xff]  ;;  %v1177_v51 = vld [vmem:[#allocation7 + $0x88] sm:$0xff] }
 0x1ef   :  { %2847 = vmatpush1.bf16.msra.mxu1 %v2846_v8  ;;  %2657 = vmatprep.subr.bf16.mxu0 %v2656_v9  ;;  %v619_v8 = vld [vmem:[#allocation4 + $0xa40] sm:$0xff]  ;;  %v666_v2 = vld [vmem:[#allocation4 + $0xbb8] sm:$0xff] }
 0x1f0   :  { %2849 = vmatprep.subr.bf16.mxu1 %v2848_v14  ;;  %v623_v9 = vld [vmem:[#allocation4 + $0xa60] sm:$0xff]  ;;  %v628_v14 = vld [vmem:[#allocation4 + $0xa88] sm:$0xff]  ;;  %v1178_v54 = vld [vmem:[#allocation7 + $0x90] sm:$0xff] }
 0x1f1   :  { %v2678_v18 = vpack.c.bf16 %v623_v9, %v619_v8  ;;  %v661_v8 = vld [vmem:[#allocation4 + $0xb90] sm:$0xff]  ;;  %v2888_v9 = vpack.c.bf16 %v666_v2, %v662_v1  ;;  %v1176_v53 = vld [vmem:[#allocation7 + $0x80] sm:$0xff]  ;;  %v1187_v62 = vld [vmem:[#allocation7 + $0xd8] sm:$0xff] }
 0x1f2   :  { %2659 = vmatpush1.bf16.msra.mxu0 %v2658_v20  ;;  %v2680_v20 = vpack.c.bf16 %v632_v15, %v628_v14  ;;  %v670_v14 = vld [vmem:[#allocation4 + $0xbd8] sm:$0xff]  ;;  %v2890_v17 = vpack.c.bf16 %v665_v10, %v661_v8  ;;  %v1184_v1 = vld [vmem:[#allocation7 + $0xc0] sm:$0xff] }
 0x1f3   :  { %2851 = vmatpush1.bf16.msra.mxu1 %v2850_v21  ;;  %2661 = vmatprep.subr.bf16.mxu0 %v2660_v23  ;;  %v627_v21 = vld [vmem:[#allocation4 + $0xa80] sm:$0xff]  ;;  %v674_v15 = vld [vmem:[#allocation4 + $0xbf8] sm:$0xff] }
 0x1f4   :  { %2853 = vmatprep.subr.bf16.mxu1 %v2852_v28  ;;  %v631_v23 = vld [vmem:[#allocation4 + $0xaa0] sm:$0xff]  ;;  %v636_v28 = vld [vmem:[#allocation4 + $0xac8] sm:$0xff]  ;;  %v1182_v22 = vld [vmem:[#allocation7 + $0xb0] sm:$0xff] }
 0x1f5   :  { %v2682_v32 = vpack.c.bf16 %v631_v23, %v627_v21  ;;  %v669_v21 = vld [vmem:[#allocation4 + $0xbd0] sm:$0xff]  ;;  %v2892_v23 = vpack.c.bf16 %v674_v15, %v670_v14  ;;  %v1195_v10 = vld [vmem:[#allocation7 + $0x118] sm:$0xff]  ;;  %v1192_v14 = vld [vmem:[#allocation7 + $0x100] sm:$0xff] }
 0x1f6   :  { %2663 = vmatpush1.bf16.msra.mxu0 %v2662_v34  ;;  %v2684_v34 = vpack.c.bf16 %v640_v29, %v636_v28  ;;  %v2894_v29 = vpack.c.bf16 %v673_v24, %v669_v21  ;;  %v1186_v2 = vld [vmem:[#allocation7 + $0xd0] sm:$0xff]  ;;  %v1203_v24 = vld [vmem:[#allocation7 + $0x158] sm:$0xff] }
 0x1f7   :  { %2855 = vmatpush1.bf16.msra.mxu1 %v2854_v35  ;;  %2665 = vmatprep.subr.bf16.mxu0 %v2664_v37  ;;  %v635_v35 = vld [vmem:[#allocation4 + $0xac0] sm:$0xff]  ;;  %v1190_v8 = vld [vmem:[#allocation7 + $0xf0] sm:$0xff] }
 0x1f8   :  { %2857 = vmatprep.subr.bf16.mxu1 %v2856_v40  ;;  %v639_v37 = vld [vmem:[#allocation4 + $0xae0] sm:$0xff]  ;;  %v644_v40 = vld [vmem:[#allocation4 + $0xb08] sm:$0xff]  ;;  %v1194_v15 = vld [vmem:[#allocation7 + $0x110] sm:$0xff] }
 0x1f9   :  { %v2686_v44 = vpack.c.bf16 %v639_v37, %v635_v35  ;;  %v1198_v21 = vld [vmem:[#allocation7 + $0x130] sm:$0xff] }
 0x1fa   :  { %2667 = vmatpush1.bf16.msra.mxu0 %v2666_v46  ;;  %v2688_v46 = vpack.c.bf16 %v648_v41, %v644_v40  ;;  %v1171_v40 = vld [vmem:[#allocation7 + $0x58] sm:$0xff] }
 0x1fb   :  { %2859 = vmatpush1.bf16.msra.mxu1 %v2858_v47  ;;  %2669 = vmatprep.subr.bf16.mxu0 %v2668_v48  ;;  %v643_v47 = vld [vmem:[#allocation4 + $0xb00] sm:$0xff]  ;;  %v2904_v42 = vpack.c.bf16 %v1171_v40, %v1169_v39 }
 0x1fc   :  { %2861 = vmatprep.subr.bf16.mxu1 %v2860_v52  ;;  %v647_v48 = vld [vmem:[#allocation4 + $0xb20] sm:$0xff]  ;;  %v652_v52 = vld [vmem:[#allocation4 + $0xb48] sm:$0xff] }
 0x1fd   :  { %v2690_v55 = vpack.c.bf16 %v647_v48, %v643_v47  ;;  %v1208_v40 = vld [vmem:[#allocation7 + $0x180] sm:$0xff] }
 0x1fe   :  { %2671 = vmatpush1.bf16.msra.mxu0 %v2670_v57  ;;  %v2692_v57 = vpack.c.bf16 %v656_v25, %v652_v52  ;;  %v1179_v52 = vld [vmem:[#allocation7 + $0x98] sm:$0xff] }
 0x1ff   :  { %2863 = vmatpush1.bf16.msra.mxu1 %v2862_v58  ;;  %2673 = vmatprep.subr.bf16.mxu0 %v2672_v59  ;;  %v651_v58 = vld [vmem:[#allocation4 + $0xb40] sm:$0xff] }
 0x200   :  { %2865 = vmatprep.subr.bf16.mxu1 %v2864_v63  ;;  %v655_v59 = vld [vmem:[#allocation4 + $0xb60] sm:$0xff]  ;;  %v660_v63 = vld [vmem:[#allocation4 + $0xb88] sm:$0xff] }
 0x201   :  { %v2694_v3 = vpack.c.bf16 %v655_v59, %v651_v58  ;;  %v1180_v59 = vld [vmem:[#allocation7 + $0xa0] sm:$0xff] }
 0x202   :  { %2675 = vmatpush1.bf16.msra.mxu0 %v2674_v5  ;;  %v2696_v5 = vpack.c.bf16 %v664_v0, %v660_v63  ;;  %v2918_v63 = vpack.c.bf16 %v1182_v22, %v1180_v59  ;;  %v1225_v59 = vld [vmem:[#allocation7 + $0x208] sm:$0xff]  ;;  %v1227_v22 = vld [vmem:[#allocation7 + $0x218] sm:$0xff] }
 0x203   :  { %2867 = vmatpush1.bf16.msra.mxu1 %v2866_v6  ;;  %2677 = vmatprep.subr.bf16.mxu0 %v2676_v7  ;;  %v659_v6 = vld [vmem:[#allocation4 + $0xb80] sm:$0xff] }
 0x204   :  { %2869 = vmatprep.subr.bf16.mxu1 %v2868_v12  ;;  %v663_v7 = vld [vmem:[#allocation4 + $0xba0] sm:$0xff]  ;;  %v668_v12 = vld [vmem:[#allocation4 + $0xbc8] sm:$0xff] }
 0x205   :  { %v2698_v16 = vpack.c.bf16 %v663_v7, %v659_v6  ;;  %v1188_v7 = vld [vmem:[#allocation7 + $0xe0] sm:$0xff] }
 0x206   :  { %2679 = vmatpush1.bf16.msra.mxu0 %v2678_v18  ;;  %v2700_v18 = vpack.c.bf16 %v672_v13, %v668_v12  ;;  %v2926_v12 = vpack.c.bf16 %v1190_v8, %v1188_v7  ;;  %v1446_v7 = vld [vmem:[#allocation10 + $0x10] sm:$0xff]  ;;  %v1447_v8 = vld [vmem:[#allocation10 + $0x18] sm:$0xff] }
 0x207   :  { %2871 = vmatpush1.bf16.msra.mxu1 %v2870_v19  ;;  %2681 = vmatprep.subr.bf16.mxu0 %v2680_v20  ;;  %v667_v19 = vld [vmem:[#allocation4 + $0xbc0] sm:$0xff] }
 0x208   :  { %2873 = vmatprep.subr.bf16.mxu1 %v2872_v26  ;;  %v671_v20 = vld [vmem:[#allocation4 + $0xbe0] sm:$0xff]  ;;  %v1161_v26 = vld [vmem:[#allocation7 + $0x8] sm:$0xff] }
 0x209   :  { %v2702_v28 = vpack.c.bf16 %v671_v20, %v667_v19  ;;  %v2896_v30 = vpack.c.bf16 %v1163_v27, %v1161_v26  ;;  %v1196_v20 = vld [vmem:[#allocation7 + $0x120] sm:$0xff] }
 0x20a   :  { %2683 = vmatpush1.bf16.msra.mxu0 %v2682_v32  ;;  %v1162_v32 = vld [vmem:[#allocation7 + $0x10] sm:$0xff]  ;;  %v2934_v26 = vpack.c.bf16 %v1198_v21, %v1196_v20  ;;  %v1451_v21 = vld [vmem:[#allocation10 + $0x38] sm:$0xff] }
 0x20b   :  { %2875 = vmatpush1.bf16.msra.mxu1 %v2874_v33  ;;  %2685 = vmatprep.subr.bf16.mxu0 %v2684_v34  ;;  %v1165_v33 = vld [vmem:[#allocation7 + $0x28] sm:$0xff]  ;;  %v1167_v34 = vld [vmem:[#allocation7 + $0x38] sm:$0xff]  ;;  %v2898_v35 = vpack.c.bf16 %v1162_v32, %v1160_v31 }
 0x20c   :  { %2877 = vmatprep.subr.bf16.mxu1 %v2876_v38  ;;  %v2900_v37 = vpack.c.bf16 %v1167_v34, %v1165_v33  ;;  %v1166_v38 = vld [vmem:[#allocation7 + $0x30] sm:$0xff]  ;;  %v1207_v31 = vld [vmem:[#allocation7 + $0x178] sm:$0xff]  ;;  %v1204_v34 = vld [vmem:[#allocation7 + $0x160] sm:$0xff] }
 0x20d   :  { %v2902_v41 = vpack.c.bf16 %v1166_v38, %v1164_v11  ;;  %v1211_v11 = vld [vmem:[#allocation7 + $0x198] sm:$0xff] }
 0x20e   :  { %2687 = vmatpush1.bf16.msra.mxu0 %v2686_v44  ;;  %v1170_v44 = vld [vmem:[#allocation7 + $0x50] sm:$0xff] }
 0x20f   :  { %2879 = vmatpush1.bf16.msra.mxu1 %v2878_v45  ;;  %2689 = vmatprep.subr.bf16.mxu0 %v2688_v46  ;;  %v1173_v45 = vld [vmem:[#allocation7 + $0x68] sm:$0xff]  ;;  %v1175_v46 = vld [vmem:[#allocation7 + $0x78] sm:$0xff]  ;;  %v2906_v47 = vpack.c.bf16 %v1170_v44, %v1168_v43 }
 0x210   :  { %2881 = vmatprep.subr.bf16.mxu1 %v2880_v50  ;;  %v2908_v48 = vpack.c.bf16 %v1175_v46, %v1173_v45  ;;  %v1174_v50 = vld [vmem:[#allocation7 + $0x70] sm:$0xff]  ;;  %v1215_v43 = vld [vmem:[#allocation7 + $0x1b8] sm:$0xff]  ;;  %v1212_v46 = vld [vmem:[#allocation7 + $0x1a0] sm:$0xff] }
 0x211   :  { %v2910_v25 = vpack.c.bf16 %v1174_v50, %v1172_v49  ;;  %v1219_v49 = vld [vmem:[#allocation7 + $0x1d8] sm:$0xff] }
 0x212   :  { %2691 = vmatpush1.bf16.msra.mxu0 %v2690_v55  ;;  %v1181_v55 = vld [vmem:[#allocation7 + $0xa8] sm:$0xff]  ;;  %v1450_v20 = vld [vmem:[#allocation10 + $0x30] sm:$0xff] }
 0x213   :  { %2883 = vmatpush1.bf16.msra.mxu1 %v2882_v56  ;;  %2693 = vmatprep.subr.bf16.mxu0 %v2692_v57  ;;  %v1183_v56 = vld [vmem:[#allocation7 + $0xb8] sm:$0xff]  ;;  %v2914_v57 = vpack.c.bf16 %v1178_v54, %v1176_v53  ;;  %v1221_v53 = vld [vmem:[#allocation7 + $0x1e8] sm:$0xff] }
 0x214   :  { %2885 = vmatprep.subr.bf16.mxu1 %v2884_v60  ;;  %v2916_v58 = vpack.c.bf16 %v1183_v56, %v1181_v55  ;;  %v1185_v60 = vld [vmem:[#allocation7 + $0xc8] sm:$0xff]  ;;  %v1223_v54 = vld [vmem:[#allocation7 + $0x1f8] sm:$0xff]  ;;  %v1220_v56 = vld [vmem:[#allocation7 + $0x1e0] sm:$0xff] }
 0x215   :  { %v2920_v0 = vpack.c.bf16 %v1187_v62, %v1185_v60  ;;  %v2956_v55 = vpack.c.bf16 %v1223_v54, %v1221_v53  ;;  %v2960_v60 = vpack.c.bf16 %v1227_v22, %v1225_v59  ;;  %v1460_v62 = vld [vmem:[#allocation10 + $0x80] sm:$0xff]  ;;  %v1226_v53 = vld [vmem:[#allocation7 + $0x210] sm:$0xff] }
 0x216   :  { %2695 = vmatpush1.bf16.msra.mxu0 %v2694_v3  ;;  %v1189_v3 = vld [vmem:[#allocation7 + $0xe8] sm:$0xff] }
 0x217   :  { %2887 = vmatpush1.bf16.msra.mxu1 %v2886_v4  ;;  %2697 = vmatprep.subr.bf16.mxu0 %v2696_v5  ;;  %v1191_v4 = vld [vmem:[#allocation7 + $0xf8] sm:$0xff]  ;;  %v2922_v5 = vpack.c.bf16 %v1186_v2, %v1184_v1  ;;  %v1445_v2 = vld [vmem:[#allocation10 + $0x8] sm:$0xff] }
 0x218   :  { %2889 = vmatprep.subr.bf16.mxu1 %v2888_v9  ;;  %v2924_v6 = vpack.c.bf16 %v1191_v4, %v1189_v3  ;;  %v1193_v9 = vld [vmem:[#allocation7 + $0x108] sm:$0xff]  ;;  %v1462_v3 = vld [vmem:[#allocation10 + $0x90] sm:$0xff]  ;;  %v1463_v4 = vld [vmem:[#allocation10 + $0x98] sm:$0xff] }
 0x219   :  { %v2928_v13 = vpack.c.bf16 %v1195_v10, %v1193_v9  ;;  %v1464_v9 = vld [vmem:[#allocation10 + $0xa0] sm:$0xff]  ;;  %v1465_v10 = vld [vmem:[#allocation10 + $0xa8] sm:$0xff] }
 0x21a   :  { %2699 = vmatpush1.bf16.msra.mxu0 %v2698_v16  ;;  %v1197_v16 = vld [vmem:[#allocation7 + $0x128] sm:$0xff] }
 0x21b   :  { %2891 = vmatpush1.bf16.msra.mxu1 %v2890_v17  ;;  %2701 = vmatprep.subr.bf16.mxu0 %v2700_v18  ;;  %v1199_v17 = vld [vmem:[#allocation7 + $0x138] sm:$0xff]  ;;  %v2930_v18 = vpack.c.bf16 %v1194_v15, %v1192_v14  ;;  %v1448_v14 = vld [vmem:[#allocation10 + $0x20] sm:$0xff]  ;;  %v1449_v15 = vld [vmem:[#allocation10 + $0x28] sm:$0xff] }
 0x21c   :  { %2893 = vmatprep.subr.bf16.mxu1 %v2892_v23  ;;  %v2932_v19 = vpack.c.bf16 %v1199_v17, %v1197_v16  ;;  %v1201_v23 = vld [vmem:[#allocation7 + $0x148] sm:$0xff]  ;;  %v1466_v16 = vld [vmem:[#allocation10 + $0xb0] sm:$0xff]  ;;  %v1467_v17 = vld [vmem:[#allocation10 + $0xb8] sm:$0xff] }
 0x21d   :  { %v2936_v27 = vpack.c.bf16 %v1203_v24, %v1201_v23  ;;  %v1468_v23 = vld [vmem:[#allocation10 + $0xc0] sm:$0xff]  ;;  %v1469_v24 = vld [vmem:[#allocation10 + $0xc8] sm:$0xff] }
 0x21e   :  { %2703 = vmatpush1.bf16.msra.mxu0 %v2702_v28  ;;  %v1200_v28 = vld [vmem:[#allocation7 + $0x140] sm:$0xff] }
 0x21f   :  { %2895 = vmatpush1.bf16.msra.mxu1 %v2894_v29  ;;  %2897 = vmatprep.subr.bf16.mxu0 %v2896_v30  ;;  %v1202_v29 = vld [vmem:[#allocation7 + $0x150] sm:$0xff]  ;;  %v1205_v30 = vld [vmem:[#allocation7 + $0x168] sm:$0xff] }
 0x220   :  { %v2938_v32 = vpack.c.bf16 %v1202_v29, %v1200_v28  ;;  %v2940_v33 = vpack.c.bf16 %v1207_v31, %v1205_v30  ;;  %v1452_v28 = vld [vmem:[#allocation10 + $0x40] sm:$0xff]  ;;  %v1453_v29 = vld [vmem:[#allocation10 + $0x48] sm:$0xff]  ;;  %v1470_v30 = vld [vmem:[#allocation10 + $0xd0] sm:$0xff] }
 0x221   :  { %937 = vmatmul.mubr.f32.vlgmr.msra.gmra.mrb[0].mxu0 %v4032_v36  ;;  %v1471_v31 = vld [vmem:[#allocation10 + $0xd8] sm:$0xff] }
 0x222   :  { %1150 = vmatmul.mubr.f32.vlgmr.msra.gmra.mrb[0].mxu1 %v4032_v36  ;;  %2899 = vmatpush1.bf16.msra.mxu0 %v2898_v35  ;;  %v2912_v36 = vpack.c.bf16 %v1179_v52, %v1177_v51  ;;  %v1206_v35 = vld [vmem:[#allocation7 + $0x170] sm:$0xff]  ;;  %v1216_v52 = vld [vmem:[#allocation7 + $0x1c0] sm:$0xff] }
 0x223   :  { %2901 = vmatprep.subr.bf16.mxu0 %v2900_v37  ;;  %v1209_v37 = vld [vmem:[#allocation7 + $0x188] sm:$0xff]  ;;  %v2942_v38 = vpack.c.bf16 %v1206_v35, %v1204_v34  ;;  %v1454_v34 = vld [vmem:[#allocation10 + $0x50] sm:$0xff]  ;;  %v1455_v35 = vld [vmem:[#allocation10 + $0x58] sm:$0xff] }
 0x224   :  { %v2944_v39 = vpack.c.bf16 %v1211_v11, %v1209_v37  ;;  %v1472_v37 = vld [vmem:[#allocation10 + $0xe0] sm:$0xff]  ;;  %v1473_v11 = vld [vmem:[#allocation10 + $0xe8] sm:$0xff] }
 0x226   :  { %2903 = vmatpush1.bf16.msra.mxu0 %v2902_v41  ;;  %v1210_v41 = vld [vmem:[#allocation7 + $0x190] sm:$0xff] }
 0x227   :  { %2905 = vmatprep.subr.bf16.mxu0 %v2904_v42  ;;  %v1213_v42 = vld [vmem:[#allocation7 + $0x1a8] sm:$0xff]  ;;  %v2946_v44 = vpack.c.bf16 %v1210_v41, %v1208_v40 }
 0x228   :  { %v2948_v45 = vpack.c.bf16 %v1215_v43, %v1213_v42  ;;  %v1456_v40 = vld [vmem:[#allocation10 + $0x60] sm:$0xff]  ;;  %v1457_v41 = vld [vmem:[#allocation10 + $0x68] sm:$0xff]  ;;  %v679_v43 = vsub.s32 0, %v4004_v61 }
 0x229   :  { %v3050_v42 = vpack.c.bf16 %v1457_v41, %v1456_v40  ;;  %v1254_v40 = vld [vmem:[#allocation7 + $0x2f0] sm:$0xff]  ;;  %v1257_v41 = vld [vmem:[#allocation7 + $0x308] sm:$0xff] }
 0x22a   :  { %2907 = vmatpush1.bf16.msra.mxu0 %v2906_v47  ;;  %v1214_v47 = vld [vmem:[#allocation7 + $0x1b0] sm:$0xff] }
 0x22b   :  { %2909 = vmatprep.subr.bf16.mxu0 %v2908_v48  ;;  %v1217_v48 = vld [vmem:[#allocation7 + $0x1c8] sm:$0xff]  ;;  %v2950_v50 = vpack.c.bf16 %v1214_v47, %v1212_v46  ;;  %v691_v46 = vsub.s32 3, %v4004_v61 }
 0x22c   :  { %v2952_v51 = vpack.c.bf16 %v1219_v49, %v1217_v48 }
 0x22e   :  { %2911 = vmatpush1.bf16.msra.mxu0 %v2910_v25  ;;  %v1218_v25 = vld [vmem:[#allocation7 + $0x1d0] sm:$0xff] }
 0x22f   :  { %2913 = vmatprep.subr.bf16.mxu0 %v2912_v36  ;;  %v2954_v36 = vpack.c.bf16 %v1218_v25, %v1216_v52 }
 0x232   :  { %2915 = vmatpush1.bf16.msra.mxu0 %v2914_v57  ;;  %v1222_v57 = vld [vmem:[#allocation7 + $0x1f0] sm:$0xff] }
 0x233   :  { %2917 = vmatprep.subr.bf16.mxu0 %v2916_v58  ;;  %v2958_v58 = vpack.c.bf16 %v1222_v57, %v1220_v56  ;;  %v1229_v56 = vld [vmem:[#allocation7 + $0x228] sm:$0xff]  ;;  %v1231_v57 = vld [vmem:[#allocation7 + $0x238] sm:$0xff] }
 0x236   :  { %2919 = vmatpush1.bf16.msra.mxu0 %v2918_v63  ;;  %v1461_v63 = vld [vmem:[#allocation10 + $0x88] sm:$0xff] }
 0x237   :  { %2921 = vmatprep.subr.bf16.mxu0 %v2920_v0  ;;  %v1444_v0 = vld [vmem:[#allocation10] sm:$0xff]  ;;  %v3024_v1 = vpack.c.bf16 %v1461_v63, %v1460_v62  ;;  %v2964_v62 = vpack.c.bf16 %v1231_v57, %v1229_v56  ;;  %v1267_v56 = vld [vmem:[#allocation7 + $0x358] sm:$0xff] }
 0x238   :  { %v1228_v63 = vld [vmem:[#allocation7 + $0x220] sm:$0xff] }
 0x239   :  { %3025 = vmatprep.subr.bf16.mxu1 %v3024_v1 }
 0x23a   :  { %2923 = vmatpush1.bf16.msra.mxu0 %v2922_v5  ;;  %v3026_v5 = vpack.c.bf16 %v1445_v2, %v1444_v0  ;;  %v1230_v0 = vld [vmem:[#allocation7 + $0x230] sm:$0xff]  ;;  %v1233_v2 = vld [vmem:[#allocation7 + $0x248] sm:$0xff] }
 0x23b   :  { %2925 = vmatprep.subr.bf16.mxu0 %v2924_v6  ;;  %v3028_v6 = vpack.c.bf16 %v1463_v4, %v1462_v3  ;;  %v1235_v3 = vld [vmem:[#allocation7 + $0x258] sm:$0xff]  ;;  %v2966_v4 = vpack.c.bf16 %v1230_v0, %v1228_v63 }
 0x23c   :  { %3027 = vmatpush3.bf16.msra.mxu1 %v3026_v5  ;;  %v2968_v5 = vpack.c.bf16 %v1235_v3, %v1233_v2  ;;  %v1270_v2 = vld [vmem:[#allocation7 + $0x370] sm:$0xff]  ;;  %v1273_v3 = vld [vmem:[#allocation7 + $0x388] sm:$0xff] }
 0x23d   :  { %3029 = vmatprep.subr.bf16.mxu1 %v3028_v6  ;;  %v1232_v6 = vld [vmem:[#allocation7 + $0x240] sm:$0xff] }
 0x23e   :  { %2927 = vmatpush1.bf16.msra.mxu0 %v2926_v12  ;;  %v3030_v12 = vpack.c.bf16 %v1447_v8, %v1446_v7  ;;  %v1234_v7 = vld [vmem:[#allocation7 + $0x250] sm:$0xff]  ;;  %v1237_v8 = vld [vmem:[#allocation7 + $0x268] sm:$0xff] }
 0x23f   :  { %2929 = vmatprep.subr.bf16.mxu0 %v2928_v13  ;;  %v3032_v13 = vpack.c.bf16 %v1465_v10, %v1464_v9  ;;  %v1239_v9 = vld [vmem:[#allocation7 + $0x278] sm:$0xff]  ;;  %v2970_v10 = vpack.c.bf16 %v1234_v7, %v1232_v6  ;;  %v1272_v7 = vld [vmem:[#allocation7 + $0x380] sm:$0xff] }
 0x240   :  { %3031 = vmatpush3.bf16.msra.mxu1 %v3030_v12  ;;  %v2972_v12 = vpack.c.bf16 %v1239_v9, %v1237_v8  ;;  %v1274_v8 = vld [vmem:[#allocation7 + $0x390] sm:$0xff]  ;;  %v1277_v9 = vld [vmem:[#allocation7 + $0x3a8] sm:$0xff] }
 0x241   :  { %3033 = vmatprep.subr.bf16.mxu1 %v3032_v13  ;;  %v1236_v13 = vld [vmem:[#allocation7 + $0x260] sm:$0xff] }
 0x242   :  { %2931 = vmatpush1.bf16.msra.mxu0 %v2930_v18  ;;  %v3034_v18 = vpack.c.bf16 %v1449_v15, %v1448_v14  ;;  %v1238_v14 = vld [vmem:[#allocation7 + $0x270] sm:$0xff]  ;;  %v1241_v15 = vld [vmem:[#allocation7 + $0x288] sm:$0xff] }
 0x243   :  { %2933 = vmatprep.subr.bf16.mxu0 %v2932_v19  ;;  %v3036_v19 = vpack.c.bf16 %v1467_v17, %v1466_v16  ;;  %v1243_v16 = vld [vmem:[#allocation7 + $0x298] sm:$0xff]  ;;  %v2974_v17 = vpack.c.bf16 %v1238_v14, %v1236_v13  ;;  %v1276_v14 = vld [vmem:[#allocation7 + $0x3a0] sm:$0xff] }
 0x244   :  { %3035 = vmatpush3.bf16.msra.mxu1 %v3034_v18  ;;  %v2976_v18 = vpack.c.bf16 %v1243_v16, %v1241_v15  ;;  %v1278_v15 = vld [vmem:[#allocation7 + $0x3b0] sm:$0xff]  ;;  %v1281_v16 = vld [vmem:[#allocation7 + $0x3c8] sm:$0xff] }
 0x245   :  { %3037 = vmatprep.subr.bf16.mxu1 %v3036_v19  ;;  %v1240_v19 = vld [vmem:[#allocation7 + $0x280] sm:$0xff] }
 0x246   :  { %2935 = vmatpush1.bf16.msra.mxu0 %v2934_v26  ;;  %v3038_v26 = vpack.c.bf16 %v1451_v21, %v1450_v20  ;;  %v1242_v20 = vld [vmem:[#allocation7 + $0x290] sm:$0xff]  ;;  %v1245_v21 = vld [vmem:[#allocation7 + $0x2a8] sm:$0xff] }
 0x247   :  { %2937 = vmatprep.subr.bf16.mxu0 %v2936_v27  ;;  %v3040_v27 = vpack.c.bf16 %v1469_v24, %v1468_v23  ;;  %v1247_v23 = vld [vmem:[#allocation7 + $0x2b8] sm:$0xff]  ;;  %v2978_v24 = vpack.c.bf16 %v1242_v20, %v1240_v19  ;;  %v687_v19 = vsub.s32 2, %v4004_v61 }
 0x248   :  { %3039 = vmatpush3.bf16.msra.mxu1 %v3038_v26  ;;  %v2980_v26 = vpack.c.bf16 %v1247_v23, %v1245_v21  ;;  %v1280_v21 = vld [vmem:[#allocation7 + $0x3c0] sm:$0xff]  ;;  %v1282_v23 = vld [vmem:[#allocation7 + $0x3d0] sm:$0xff] }
 0x249   :  { %3041 = vmatprep.subr.bf16.mxu1 %v3040_v27  ;;  %v1244_v27 = vld [vmem:[#allocation7 + $0x2a0] sm:$0xff] }
 0x24a   :  { %2939 = vmatpush1.bf16.msra.mxu0 %v2938_v32  ;;  %v3042_v32 = vpack.c.bf16 %v1453_v29, %v1452_v28  ;;  %v1246_v28 = vld [vmem:[#allocation7 + $0x2b0] sm:$0xff]  ;;  %v1249_v29 = vld [vmem:[#allocation7 + $0x2c8] sm:$0xff] }
 0x24b   :  { %2941 = vmatprep.subr.bf16.mxu0 %v2940_v33  ;;  %v3044_v33 = vpack.c.bf16 %v1471_v31, %v1470_v30  ;;  %v1251_v30 = vld [vmem:[#allocation7 + $0x2d8] sm:$0xff]  ;;  %v2982_v31 = vpack.c.bf16 %v1246_v28, %v1244_v27  ;;  %v3018_v27 = vpack.c.bf16 %v1282_v23, %v1280_v21 }
 0x24c   :  { %3043 = vmatpush3.bf16.msra.mxu1 %v3042_v32  ;;  %v2984_v32 = vpack.c.bf16 %v1251_v30, %v1249_v29  ;;  %v1284_v30 = vld [vmem:[#allocation7 + $0x3e0] sm:$0xff] }
 0x24d   :  { %3045 = vmatprep.subr.bf16.mxu1 %v3044_v33  ;;  %v1248_v33 = vld [vmem:[#allocation7 + $0x2c0] sm:$0xff] }
 0x24e   :  { %2943 = vmatpush1.bf16.msra.mxu0 %v2942_v38  ;;  %v3046_v38 = vpack.c.bf16 %v1455_v35, %v1454_v34  ;;  %v1250_v34 = vld [vmem:[#allocation7 + $0x2d0] sm:$0xff]  ;;  %v1253_v35 = vld [vmem:[#allocation7 + $0x2e8] sm:$0xff] }
 0x24f   :  { %2945 = vmatprep.subr.bf16.mxu0 %v2944_v39  ;;  %v3048_v39 = vpack.c.bf16 %v1473_v11, %v1472_v37  ;;  %v1255_v37 = vld [vmem:[#allocation7 + $0x2f8] sm:$0xff]  ;;  %v2986_v11 = vpack.c.bf16 %v1250_v34, %v1248_v33 }
 0x250   :  { %3047 = vmatpush3.bf16.msra.mxu1 %v3046_v38  ;;  %v2988_v38 = vpack.c.bf16 %v1255_v37, %v1253_v35  ;;  %v1474_v35 = vld [vmem:[#allocation10 + $0xf0] sm:$0xff]  ;;  %v1475_v37 = vld [vmem:[#allocation10 + $0xf8] sm:$0xff] }
 0x251   :  { %3049 = vmatprep.subr.bf16.mxu1 %v3048_v39  ;;  %v1252_v39 = vld [vmem:[#allocation7 + $0x2e0] sm:$0xff] }
 0x252   :  { %2947 = vmatpush1.bf16.msra.mxu0 %v2946_v44  ;;  %v4041_v44 = vld [vmem:[#allocation6] sm:$0xf] }
 0x253   :  { %2949 = vmatprep.subr.bf16.mxu0 %v2948_v45  ;;  %v683_v45 = vsub.s32 1, %v4004_v61  ;;  %v680_v47 = vrot.slane %v4041_v44, %v679_v43  ;;  %v692_v49 = vrot.slane %v4041_v44, %v691_v46  ;;  %v2990_v46 = vpack.c.bf16 %v1254_v40, %v1252_v39  ;;  %v1459_v39 = vld [vmem:[#allocation10 + $0x78] sm:$0xff] }
 0x254   :  { %3051 = vmatpush3.bf16.msra.mxu1 %v3050_v42  ;;  %v1259_v42 = vld [vmem:[#allocation7 + $0x318] sm:$0xff]  ;;  %v688_v28 = vrot.slane %v4041_v44, %v687_v19 }
 0x255   :  { %v684_v48 = vrot.slane %v4041_v44, %v683_v45  ;;  %v3662_v44 = vmov 0.0   ;;  %v1554_v61 = vld [vmem:[%s4158_s27] sm:$0x3] }
 0x256   :  { %2951 = vmatpush1.bf16.msra.mxu0 %v2950_v50 }
 0x257   :  { %2953 = vmatprep.subr.bf16.mxu0 %v2952_v51 }
 0x25a   :  { %2955 = vmatpush1.bf16.msra.mxu0 %v2954_v36  ;;  %v1224_v36 = vld [vmem:[#allocation7 + $0x200] sm:$0xff] }
 0x25b   :  { %2957 = vmatprep.subr.bf16.mxu0 %v2956_v55  ;;  %v2962_v22 = vpack.c.bf16 %v1226_v53, %v1224_v36  ;;  %v1260_v53 = vld [vmem:[#allocation7 + $0x320] sm:$0xff] }
 0x25e   :  { %2959 = vmatpush1.bf16.msra.mxu0 %v2958_v58 }
 0x25f   :  { %2961 = vmatprep.subr.bf16.mxu0 %v2960_v60 }
 0x2f4   :  { %v938_v50 = vpop.f32.mrb[0].mxu0 }
 0x2f5   :  { %v3176_v51 = vadd.f32 %v938_v50, %v680_v47  ;;  %v4052_v52 = vpop.f32.mrb[0].mxu1  ;;  %v940_v25 = vpop.f32.mrb[1].mxu0  ;;  %v2992_v47 = vpack.c.bf16 %v1259_v42, %v1257_v41  ;;  %v1261_v50 = vld [vmem:[#allocation7 + $0x328] sm:$0xff]  ;;  %v3664_v42 = vmov 0.0|0.0  }
 0x2f6   :  { %v3177_v54 = vadd.f32 %v940_v25, %v684_v48  ;;  %v1153_v55 = vpop.f32.mrb[1].mxu1  ;;  %v1256_v48 = vld [vmem:[#allocation7 + $0x300] sm:$0xff]  ;;  %v3178_v33 = vadd.f32 %v4052_v52, %v688_v28  ;;  %v1556_v52 = vld [vmem:[#allocation2] sm:$0x3] }
 0x2f7   :  { %v3179_v58 = vadd.f32 %v1153_v55, %v692_v49  ;;  %v1156_v60 = vmax.f32 %v3176_v51, 0.0  ;;  %v1258_v49 = vld [vmem:[#allocation7 + $0x310] sm:$0xff]  ;;  %v1263_v51 = vld [vmem:[#allocation7 + $0x338] sm:$0xff]  ;;  %v1265_v55 = vld [vmem:[#allocation7 + $0x348] sm:$0xff] }
 0x2f8   :  { %v1157_v59 = vmax.f32 %v3177_v54, 0.0  ;;  %v2994_v25 = vpack.c.bf16 %v1258_v49, %v1256_v48  ;;  %v2996_v36 = vpack.c.bf16 %v1263_v51, %v1261_v50  ;;  %v1262_v54 = vld [vmem:[#allocation7 + $0x330] sm:$0xff]  ;;  %v1158_v34 = vmax.f32 %v3178_v33, 0.0  ;;  %v1557_v41 = vld [vmem:[#allocation15] sm:$0xf] }
 0x2f9   :  { %v1159_v1 = vmax.f32 %v3179_v58, 0.0  ;;  %v2998_v57 = vpack.c.bf16 %v1262_v54, %v1260_v53  ;;  %v3000_v58 = vpack.c.bf16 %v1267_v56, %v1265_v55  ;;  %v1555_v54 = vld [vmem:[#allocation13] sm:$0x1]  ;;  %v1739_v55 = vld [vmem:[#allocation19] sm:$0xff]  ;;  %v1740_v56 = vld [vmem:[#allocation19 + $0x8] sm:$0xff] }
 0x2fa   :  { %1364 = vmatprep.mubr.f32.mxu0 %v1157_v59  ;;  %v1264_v59 = vld [vmem:[#allocation7 + $0x340] sm:$0xff]  ;;  %v1727_v33 = vld [vmem:[#allocation18 + $0x20] sm:$0xff] }
 0x2fb   :  { %1365 = vmatmul.mubr.f32.vlgmr.msra.gmra.mrb[2].mxu0 %v1156_v60  ;;  %v1269_v60 = vld [vmem:[#allocation7 + $0x368] sm:$0xff] }
 0x2fc   :  { %2963 = vmatpush1.bf16.msra.mxu0 %v2962_v22  ;;  %1435 = vmatprep.mubr.f32.mxu0 %v1159_v1  ;;  %v1266_v22 = vld [vmem:[#allocation7 + $0x350] sm:$0xff]  ;;  %v1268_v1 = vld [vmem:[#allocation7 + $0x360] sm:$0xff] }
 0x2fd   :  { %2965 = vmatprep.subr.bf16.mxu0 %v2964_v62  ;;  %v1271_v62 = vld [vmem:[#allocation7 + $0x378] sm:$0xff]  ;;  %v3002_v63 = vpack.c.bf16 %v1266_v22, %v1264_v59  ;;  %v1743_v59 = vld [vmem:[#allocation19 + $0x20] sm:$0xff] }
 0x2fe   :  { %v3004_v0 = vpack.c.bf16 %v1271_v62, %v1269_v60  ;;  %v1744_v22 = vld [vmem:[#allocation19 + $0x28] sm:$0xff]  ;;  %v1745_v62 = vld [vmem:[#allocation19 + $0x30] sm:$0xff] }
 0x2ff   :  { %v3063_v60 = vpack.c.bf16 %v1744_v22, %v1743_v59  ;;  %v1924_v59 = vld [vmem:[#allocation24 + $0x20] sm:$0xff]  ;;  %v1925_v22 = vld [vmem:[#allocation24 + $0x28] sm:$0xff] }
 0x300   :  { %2967 = vmatpush1.bf16.msra.mxu0 %v2966_v4  ;;  %v1275_v4 = vld [vmem:[#allocation7 + $0x398] sm:$0xff] }
 0x301   :  { %2969 = vmatprep.subr.bf16.mxu0 %v2968_v5  ;;  %v3006_v5 = vpack.c.bf16 %v1270_v2, %v1268_v1  ;;  %v3008_v6 = vpack.c.bf16 %v1275_v4, %v1273_v3  ;;  %v1747_v1 = vld [vmem:[#allocation19 + $0x40] sm:$0xff]  ;;  %v1748_v2 = vld [vmem:[#allocation19 + $0x48] sm:$0xff]  ;;  %v1749_v4 = vld [vmem:[#allocation19 + $0x50] sm:$0xff] }
 0x302   :  { %v3069_v3 = vpack.c.bf16 %v1748_v2, %v1747_v1  ;;  %v1928_v1 = vld [vmem:[#allocation24 + $0x40] sm:$0xff]  ;;  %v1929_v2 = vld [vmem:[#allocation24 + $0x48] sm:$0xff] }
 0x304   :  { %2971 = vmatpush1.bf16.msra.mxu0 %v2970_v10  ;;  %v1279_v10 = vld [vmem:[#allocation7 + $0x3b8] sm:$0xff] }
 0x305   :  { %2973 = vmatprep.subr.bf16.mxu0 %v2972_v12  ;;  %v3010_v12 = vpack.c.bf16 %v1274_v8, %v1272_v7  ;;  %v3012_v13 = vpack.c.bf16 %v1279_v10, %v1277_v9  ;;  %v1751_v7 = vld [vmem:[#allocation19 + $0x60] sm:$0xff]  ;;  %v1752_v8 = vld [vmem:[#allocation19 + $0x68] sm:$0xff] }
 0x306   :  { %v3075_v9 = vpack.c.bf16 %v1752_v8, %v1751_v7  ;;  %v1932_v7 = vld [vmem:[#allocation24 + $0x60] sm:$0xff]  ;;  %v1933_v8 = vld [vmem:[#allocation24 + $0x68] sm:$0xff] }
 0x308   :  { %2975 = vmatpush1.bf16.msra.mxu0 %v2974_v17  ;;  %v1283_v17 = vld [vmem:[#allocation7 + $0x3d8] sm:$0xff] }
 0x309   :  { %2977 = vmatprep.subr.bf16.mxu0 %v2976_v18  ;;  %v3014_v18 = vpack.c.bf16 %v1278_v15, %v1276_v14  ;;  %v3016_v20 = vpack.c.bf16 %v1283_v17, %v1281_v16  ;;  %v1754_v14 = vld [vmem:[#allocation19 + $0x78] sm:$0xff] }
 0x30c   :  { %2979 = vmatpush1.bf16.msra.mxu0 %v2978_v24  ;;  %v1285_v24 = vld [vmem:[#allocation7 + $0x3e8] sm:$0xff] }
 0x30d   :  { %2981 = vmatprep.subr.bf16.mxu0 %v2980_v26  ;;  %v1287_v26 = vld [vmem:[#allocation7 + $0x3f8] sm:$0xff] }
 0x30e   :  { %v3020_v29 = vpack.c.bf16 %v1287_v26, %v1285_v24  ;;  %v1723_v24 = vld [vmem:[#allocation18] sm:$0xff]  ;;  %v1724_v26 = vld [vmem:[#allocation18 + $0x8] sm:$0xff] }
 0x30f   :  { %v3081_v28 = vpack.c.bf16 %v1724_v26, %v1723_v24  ;;  %v1910_v24 = vld [vmem:[#allocation22 + $0x30] sm:$0xff]  ;;  %v1911_v26 = vld [vmem:[#allocation22 + $0x38] sm:$0xff] }
 0x310   :  { %2983 = vmatpush1.bf16.msra.mxu0 %v2982_v31  ;;  %v1286_v31 = vld [vmem:[#allocation7 + $0x3f0] sm:$0xff] }
 0x311   :  { %2985 = vmatprep.subr.bf16.mxu0 %v2984_v32  ;;  %v3022_v32 = vpack.c.bf16 %v1286_v31, %v1284_v30  ;;  %v1725_v30 = vld [vmem:[#allocation18 + $0x10] sm:$0xff]  ;;  %v1726_v31 = vld [vmem:[#allocation18 + $0x18] sm:$0xff] }
 0x314   :  { %2987 = vmatpush1.bf16.msra.mxu0 %v2986_v11  ;;  %v3052_v11 = vpack.c.bf16 %v1475_v37, %v1474_v35  ;;  %v1729_v37 = vld [vmem:[#allocation18 + $0x30] sm:$0xff] }
 0x315   :  { %2989 = vmatprep.subr.bf16.mxu0 %v2988_v38  ;;  %v1458_v38 = vld [vmem:[#allocation10 + $0x70] sm:$0xff] }
 0x316   :  { %v3054_v40 = vpack.c.bf16 %v1459_v39, %v1458_v38  ;;  %3053 = vmatprep.subr.bf16.mxu1 %v3052_v11  ;;  %v1730_v11 = vld [vmem:[#allocation18 + $0x38] sm:$0xff]  ;;  %v1731_v39 = vld [vmem:[#allocation18 + $0x40] sm:$0xff] }
 0x317   :  { %v3090_v38 = vpack.c.bf16 %v1730_v11, %v1729_v37  ;;  %v1918_v37 = vld [vmem:[#allocation22 + $0x70] sm:$0xff]  ;;  %v1919_v11 = vld [vmem:[#allocation22 + $0x78] sm:$0xff] }
 0x318   :  { %2991 = vmatpush1.bf16.msra.mxu0 %v2990_v46  ;;  %3055 = vmatpush3.bf16.msra.mxu1 %v3054_v40  ;;  %v1288_v46 = vld [vmem:[#allocation9] sm:$0x3]  ;;  %v1732_v40 = vld [vmem:[#allocation18 + $0x48] sm:$0xff] }
 0x319   :  { %2993 = vmatprep.subr.bf16.mxu0 %v2992_v47  ;;  %2332 = vmatprep.subr.mxu1 %v3662_v44  ;;  %v1293_v47 = vrot.slane %v1288_v46, %v679_v43  ;;  %v1297_v48 = vrot.slane %v1288_v46, %v683_v45  ;;  %v3057_v43 = vpack.c.bf16 %v1740_v56, %v1739_v55  ;;  %v1741_v45 = vld [vmem:[#allocation19 + $0x10] sm:$0xff]  ;;  %v1734_v46 = vld [vmem:[#allocation18 + $0x58] sm:$0xff]  ;;  %v1920_v55 = vld [vmem:[#allocation24] sm:$0xff] }
 0x31a   :  { %v1921_v56 = vld [vmem:[#allocation24 + $0x8] sm:$0xff] }
 0x31c   :  { %2995 = vmatpush1.bf16.msra.mxu0 %v2994_v25 }
 0x31d   :  { %2997 = vmatprep.subr.bf16.mxu0 %v2996_v36 }
 0x320   :  { %2999 = vmatpush1.bf16.msra.mxu0 %v2998_v57  ;;  %v1742_v57 = vld [vmem:[#allocation19 + $0x18] sm:$0xff] }
 0x321   :  { %3001 = vmatprep.subr.bf16.mxu0 %v3000_v58  ;;  %v3060_v58 = vpack.c.bf16 %v1742_v57, %v1741_v45  ;;  %v1922_v45 = vld [vmem:[#allocation24 + $0x10] sm:$0xff]  ;;  %v1923_v57 = vld [vmem:[#allocation24 + $0x18] sm:$0xff] }
 0x324   :  { %3003 = vmatpush1.bf16.msra.mxu0 %v3002_v63  ;;  %v1746_v63 = vld [vmem:[#allocation19 + $0x38] sm:$0xff] }
 0x325   :  { %3005 = vmatprep.subr.bf16.mxu0 %v3004_v0  ;;  %v3066_v0 = vpack.c.bf16 %v1746_v63, %v1745_v62  ;;  %v1926_v62 = vld [vmem:[#allocation24 + $0x30] sm:$0xff]  ;;  %v1927_v63 = vld [vmem:[#allocation24 + $0x38] sm:$0xff] }
 0x328   :  { %3007 = vmatpush1.bf16.msra.mxu0 %v3006_v5  ;;  %v1750_v5 = vld [vmem:[#allocation19 + $0x58] sm:$0xff] }
 0x329   :  { %3009 = vmatprep.subr.bf16.mxu0 %v3008_v6  ;;  %v3072_v6 = vpack.c.bf16 %v1750_v5, %v1749_v4  ;;  %v1930_v4 = vld [vmem:[#allocation24 + $0x50] sm:$0xff]  ;;  %v1931_v5 = vld [vmem:[#allocation24 + $0x58] sm:$0xff] }
 0x32c   :  { %3011 = vmatpush1.bf16.msra.mxu0 %v3010_v12 }
 0x32d   :  { %3013 = vmatprep.subr.bf16.mxu0 %v3012_v13  ;;  %v1753_v13 = vld [vmem:[#allocation19 + $0x70] sm:$0xff] }
 0x32e   :  { %v3078_v15 = vpack.c.bf16 %v1754_v14, %v1753_v13  ;;  %v1904_v14 = vld [vmem:[#allocation22] sm:$0xff] }
 0x330   :  { %3015 = vmatpush1.bf16.msra.mxu0 %v3014_v18 }
 0x331   :  { %3017 = vmatprep.subr.bf16.mxu0 %v3016_v20  ;;  %v2199_v20 = vld [vmem:[#allocation16] ss:$0 sm:$0xff] }
 0x334   :  { %3019 = vmatpush1.bf16.msra.mxu0 %v3018_v27 }
 0x335   :  { %3021 = vmatprep.subr.bf16.mxu0 %v3020_v29 }
 0x338   :  { %3023 = vmatpush1.bf16.msra.mxu0 %v3022_v32  ;;  %v3084_v32 = vpack.c.bf16 %v1726_v31, %v1725_v30  ;;  %v1914_v30 = vld [vmem:[#allocation22 + $0x50] sm:$0xff]  ;;  %v1915_v31 = vld [vmem:[#allocation22 + $0x58] sm:$0xff] }
 0x339   :  { %2327 = vmatprep.subr.mxu0 %v3662_v44 }
 0x33b   :  { %1436 = vmatmul.mubr.f32.vlgmr.msra.gmra.mrb[2].mxu0 %v1158_v34  ;;  %v1728_v34 = vld [vmem:[#allocation18 + $0x28] sm:$0xff] }
 0x33c   :  { %2328 = vmatpush3.msk.msra.mxu0 %vm1562_vm0, %v1557_v41  ;;  %2329 = vmatprep.mubr.msk.f32.mxu0 %vm3663_vm2, %v3662_v44  ;;  %v3087_v35 = vpack.c.bf16 %v1728_v34, %v1727_v33  ;;  %v3093_v41 = vpack.c.bf16 %v1732_v40, %v1731_v39  ;;  %v1916_v33 = vld [vmem:[#allocation22 + $0x60] sm:$0xff]  ;;  %v1917_v34 = vld [vmem:[#allocation22 + $0x68] sm:$0xff] }
 0x33d   :  { %3128 = vmatprep.subr.bf16.mxu0 %v3664_v42  ;;  %v2085_v39 = vld [vmem:[#allocation27] sm:$0xff]  ;;  %v2086_v40 = vld [vmem:[#allocation27 + $0x8] sm:$0xff] }
 0x33f   :  { %2330 = vmatmul.mubr.msk.f32.vlgmr.msra.gmra.mrb[4].mxu0 %vm1558_vm1, %v1556_v52  ;;  %v1733_v52 = vld [vmem:[#allocation18 + $0x50] sm:$0xff] }
 0x340   :  { %2474 = vmatprep.mubr.msk.f32.mxu0 %vm3663_vm2, %v3662_v44 }
 0x40e   :  { %v1437_v49 = vpop.f32.mrb[2].mxu0 }
 0x40f   :  { %v3180_v50 = vadd.f32 %v1437_v49, %v1293_v47  ;;  %v1439_v51 = vpop.f32.mrb[3].mxu0  ;;  %v3096_v47 = vpack.c.bf16 %v1734_v46, %v1733_v52  ;;  %v1736_v49 = vld [vmem:[#allocation18 + $0x68] sm:$0xff]  ;;  %v3153_v52 = vpack.c.bf16 %v2086_v40, %v2085_v39  ;;  %v2088_v46 = vld [vmem:[#allocation27 + $0x18] sm:$0xff] }
 0x410   :  { %v3181_v25 = vadd.f32 %v1439_v51, %v1297_v48  ;;  %v1735_v48 = vld [vmem:[#allocation18 + $0x60] sm:$0xff]  ;;  %v1737_v51 = vld [vmem:[#allocation18 + $0x70] sm:$0xff] }
 0x411   :  { %v1442_v53 = vmax.f32 %v3180_v50, 0.0  ;;  %v3099_v50 = vpack.c.bf16 %v1736_v49, %v1735_v48  ;;  %v2089_v48 = vld [vmem:[#allocation27 + $0x20] sm:$0xff]  ;;  %v2090_v49 = vld [vmem:[#allocation27 + $0x28] sm:$0xff] }
 0x412   :  { %v1443_v36 = vmax.f32 %v3181_v25, 0.0  ;;  %v1632_v10 = vpop.f32.mrb[4].mxu0  ;;  %v1738_v25 = vld [vmem:[#allocation18 + $0x78] sm:$0xff] }
 0x413   :  { %v2331_v12 = vpop.f32.mrb[5].mxu0 }
 0x414   :  { %1547 = vmatprep.mubr.f32.mxu1 %v1443_v36  ;;  %v2194_v36 = vld [vmem:[#allocation12] ss:$0 sm:$0xff]  ;;  %v1935_v12 = vld [vmem:[#allocation24 + $0x78] sm:$0xff] }
 0x415   :  { %1548 = vmatmul.mubr.f32.vlgmr.msra.gmra.mrb[2].mxu1 %v1442_v53  ;;  %v3102_v53 = vpack.c.bf16 %v1738_v25, %v1737_v51  ;;  %v2091_v51 = vld [vmem:[#allocation27 + $0x30] sm:$0xff]  ;;  %v2092_v25 = vld [vmem:[#allocation27 + $0x38] sm:$0xff] }
 0x416   :  { %2333 = vmatpush3.msk.msra.mxu1 %vm1640_vm3, %v1555_v54  ;;  %2334 = vmatprep.mubr.msk.f32.mxu1 %vm3663_vm2, %v3662_v44 }
 0x417   :  { %3056 = vmatprep.subr.bf16.mxu1 %v3664_v42 }
 0x419   :  { %2335 = vmatmul.mubr.msk.f32.vlgmr.msra.gmra.mrb[4].mxu1 %vm1636_vm4, %v1554_v61  ;;  %v3105_v61 = vpack.c.bf16 %v1921_v56, %v1920_v55  ;;  %v2095_v56 = vld [vmem:[#allocation27 + $0x50] sm:$0xff] }
 0x41a   :  { %3058 = vmatpush3.bf16.msra.mxu1 %v3057_v43  ;;  %2369 = vmatprep.mubr.msk.f32.mxu1 %vm3663_vm2, %v3662_v44 }
 0x41b   :  { %3059 = vmatprep.subr.bf16.mxu1 %v3664_v42 }
 0x41e   :  { %3061 = vmatpush3.bf16.msra.mxu1 %v3060_v58  ;;  %v3108_v58 = vpack.c.bf16 %v1923_v57, %v1922_v45 }
 0x41f   :  { %3062 = vmatprep.subr.bf16.mxu1 %v3664_v42 }
 0x422   :  { %3064 = vmatpush3.bf16.msra.mxu1 %v3063_v60  ;;  %v3111_v60 = vpack.c.bf16 %v1925_v22, %v1924_v59  ;;  %v2200_v59 = vld [vmem:[#allocation21] ss:$0 sm:$0xff] }
 0x423   :  { %3065 = vmatprep.subr.bf16.mxu1 %v3664_v42 }
 0x426   :  { %3067 = vmatpush3.bf16.msra.mxu1 %v3066_v0  ;;  %v3114_v0 = vpack.c.bf16 %v1927_v63, %v1926_v62 }
 0x427   :  { %3068 = vmatprep.subr.bf16.mxu1 %v3664_v42 }
 0x42a   :  { %3070 = vmatpush3.bf16.msra.mxu1 %v3069_v3  ;;  %v3117_v3 = vpack.c.bf16 %v1929_v2, %v1928_v1  ;;  %v2097_v2 = vld [vmem:[#allocation27 + $0x60] sm:$0xff] }
 0x42b   :  { %3071 = vmatprep.subr.bf16.mxu1 %v3664_v42 }
 0x42e   :  { %3073 = vmatpush3.bf16.msra.mxu1 %v3072_v6  ;;  %v3120_v6 = vpack.c.bf16 %v1931_v5, %v1930_v4  ;;  %v2099_v5 = vld [vmem:[#allocation27 + $0x70] sm:$0xff] }
 0x42f   :  { %3074 = vmatprep.subr.bf16.mxu1 %v3664_v42 }
 0x432   :  { %3076 = vmatpush3.bf16.msra.mxu1 %v3075_v9  ;;  %v3123_v9 = vpack.c.bf16 %v1933_v8, %v1932_v7 }
 0x433   :  { %3077 = vmatprep.subr.bf16.mxu1 %v3664_v42 }
 0x436   :  { %3079 = vmatpush3.bf16.msra.mxu1 %v3078_v15  ;;  %v1905_v15 = vld [vmem:[#allocation22 + $0x8] sm:$0xff] }
 0x437   :  { %3080 = vmatprep.subr.bf16.mxu1 %v3664_v42 }
 0x4e8   :  { %v2235_v16 = vpop.f32.mrb[2].mxu1 }
 0x4e9   :  { %v2236_v17 = vpop.f32.mrb[3].mxu1 }
 0x4ea   :  { %v2237_v18 = vadd.f32 %v2236_v17, %v2235_v16  ;;  %v1906_v16 = vld [vmem:[#allocation22 + $0x10] sm:$0xff]  ;;  %v3129_v17 = vpack.c.bf16 %v1905_v15, %v1904_v14  ;;  %v2202_v15 = vld [vmem:[#allocation28] ss:$0 sm:$0xff] }
 0x4ec   :  { %v1710_v19 = vpop.f32.mrb[4].mxu1  ;;  %v1550_v54 = vadd.f32 %v2237_v18, %v2194_v36  ;;  %v1907_v18 = vld [vmem:[#allocation22 + $0x18] sm:$0xff]  ;;  %3130 = vmatpush3.bf16.msra.mxu0 %v3129_v17  ;;  %v3162_v36 = vpack.c.bf16 %v2092_v25, %v2091_v51 }
 0x4ed   :  { %v1711_v21 = vadd.f32 %v1710_v19, %v1632_v10  ;;  %v2336_v23 = vpop.f32.mrb[5].mxu1  ;;  %v1934_v10 = vld [vmem:[#allocation24 + $0x70] sm:$0xff]  ;;  %v3132_v19 = vpack.c.bf16 %v1907_v18, %v1906_v16  ;;  %3131 = vmatprep.subr.bf16.mxu0 %v3664_v42 }
 0x4ee   :  { %v1553_v43 = vmax.f32 %v1550_v54, 0.0  ;;  %v3126_v13 = vpack.c.bf16 %v1935_v12, %v1934_v10  ;;  %v2094_v54 = vld [vmem:[#allocation27 + $0x48] sm:$0xff] }
 0x4ef   :  { %v1721_v27 = vadd.f32 %v2199_v20, %v1711_v21  ;;  %v1908_v20 = vld [vmem:[#allocation22 + $0x20] sm:$0xff]  ;;  %v1909_v21 = vld [vmem:[#allocation22 + $0x28] sm:$0xff] }
 0x4f0   :  { %3133 = vmatpush3.bf16.msra.mxu0 %v3132_v19  ;;  %v3135_v23 = vpack.c.bf16 %v1909_v21, %v1908_v20 }
 0x4f1   :  { %v1722_v29 = vmax.f32 %v1721_v27, 0.0  ;;  %3134 = vmatprep.subr.bf16.mxu0 %v3664_v42  ;;  %v3138_v27 = vpack.c.bf16 %v1911_v26, %v1910_v24 }
 0x4f3   :  { %2370 = vmatmul.mubr.f32.vlgmr.msra.gmra.mrb[6].mxu1 %v1722_v29 }
 0x4f4   :  { %3082 = vmatpush3.bf16.msra.mxu1 %v3081_v28  ;;  %2404 = vmatprep.mubr.msk.f32.mxu1 %vm3663_vm2, %v3662_v44  ;;  %v1913_v28 = vld [vmem:[#allocation22 + $0x48] sm:$0xff] }
 0x4f5   :  { %3083 = vmatprep.subr.bf16.mxu1 %v3664_v42  ;;  %3136 = vmatpush3.bf16.msra.mxu0 %v3135_v23 }
 0x4f6   :  { %3137 = vmatprep.subr.bf16.mxu0 %v3664_v42 }
 0x4f8   :  { %3085 = vmatpush3.bf16.msra.mxu1 %v3084_v32  ;;  %v3144_v32 = vpack.c.bf16 %v1915_v31, %v1914_v30 }
 0x4f9   :  { %3086 = vmatprep.subr.bf16.mxu1 %v3664_v42  ;;  %3139 = vmatpush3.bf16.msra.mxu0 %v3138_v27 }
 0x4fa   :  { %3140 = vmatprep.subr.bf16.mxu0 %v3664_v42 }
 0x4fc   :  { %3088 = vmatpush3.bf16.msra.mxu1 %v3087_v35  ;;  %v3147_v35 = vpack.c.bf16 %v1917_v34, %v1916_v33 }
 0x4fd   :  { %3089 = vmatprep.subr.bf16.mxu1 %v3664_v42 }
 0x500   :  { %3091 = vmatpush3.bf16.msra.mxu1 %v3090_v38  ;;  %v3150_v38 = vpack.c.bf16 %v1919_v11, %v1918_v37 }
 0x501   :  { %3092 = vmatprep.subr.bf16.mxu1 %v3664_v42 }
 0x504   :  { %3094 = vmatpush3.bf16.msra.mxu1 %v3093_v41  ;;  %v2087_v41 = vld [vmem:[#allocation27 + $0x10] sm:$0xff] }
 0x505   :  { %3095 = vmatprep.subr.bf16.mxu1 %v3664_v42 }
 0x508   :  { %3097 = vmatpush3.bf16.msra.mxu1 %v3096_v47  ;;  %v3156_v47 = vpack.c.bf16 %v2088_v46, %v2087_v41 }
 0x509   :  { %3098 = vmatprep.subr.bf16.mxu1 %v3664_v42 }
 0x50c   :  { %3100 = vmatpush3.bf16.msra.mxu1 %v3099_v50  ;;  %v3159_v50 = vpack.c.bf16 %v2090_v49, %v2089_v48 }
 0x50d   :  { %3101 = vmatprep.subr.bf16.mxu1 %v3664_v42 }
 0x510   :  { %3103 = vmatpush3.bf16.msra.mxu1 %v3102_v53  ;;  %v2093_v53 = vld [vmem:[#allocation27 + $0x40] sm:$0xff] }
 0x511   :  { %3104 = vmatprep.subr.bf16.mxu1 %v3664_v42  ;;  %v3165_v55 = vpack.c.bf16 %v2094_v54, %v2093_v53 }
 0x513   :  { %2405 = vmatmul.mubr.f32.vlgmr.msra.gmra.mrb[8].mxu1 %v1553_v43 }
 0x514   :  { %3106 = vmatpush3.bf16.msra.mxu1 %v3105_v61  ;;  %2439 = vmatprep.mubr.msk.f32.mxu1 %vm3663_vm2, %v3662_v44  ;;  %v2096_v61 = vld [vmem:[#allocation27 + $0x58] sm:$0xff] }
 0x515   :  { %3107 = vmatprep.subr.bf16.mxu1 %v3664_v42 }
 0x518   :  { %3109 = vmatpush3.bf16.msra.mxu1 %v3108_v58 }
 0x519   :  { %3110 = vmatprep.subr.bf16.mxu1 %v3664_v42 }
 0x51c   :  { %3112 = vmatpush3.bf16.msra.mxu1 %v3111_v60 }
 0x51d   :  { %3113 = vmatprep.subr.bf16.mxu1 %v3664_v42 }
 0x520   :  { %3115 = vmatpush3.bf16.msra.mxu1 %v3114_v0 }
 0x521   :  { %3116 = vmatprep.subr.bf16.mxu1 %v3664_v42 }
 0x524   :  { %3118 = vmatpush3.bf16.msra.mxu1 %v3117_v3  ;;  %v2098_v3 = vld [vmem:[#allocation27 + $0x68] sm:$0xff] }
 0x525   :  { %3119 = vmatprep.subr.bf16.mxu1 %v3664_v42  ;;  %v3171_v4 = vpack.c.bf16 %v2098_v3, %v2097_v2 }
 0x528   :  { %3121 = vmatpush3.bf16.msra.mxu1 %v3120_v6  ;;  %v2100_v6 = vld [vmem:[#allocation27 + $0x78] sm:$0xff] }
 0x529   :  { %3122 = vmatprep.subr.bf16.mxu1 %v3664_v42  ;;  %v3174_v7 = vpack.c.bf16 %v2100_v6, %v2099_v5 }
 0x52c   :  { %3124 = vmatpush3.bf16.msra.mxu1 %v3123_v9  ;;  %v2201_v9 = vld [vmem:[#allocation25] ss:$0 sm:$0xff] }
 0x52d   :  { %3125 = vmatprep.subr.bf16.mxu1 %v3664_v42 }
 0x530   :  { %3127 = vmatpush3.bf16.msra.mxu1 %v3126_v13 }
 0x531   :  { %3152 = vmatprep.subr.bf16.mxu1 %v3664_v42 }
 0x533   :  { %2440 = vmatmul.mubr.f32.vlgmr.msra.gmra.mrb[10].mxu1 %v1553_v43  ;;  %v3168_v43 = vpack.c.bf16 %v2096_v61, %v2095_v56 }
 0x534   :  { %2509 = vmatprep.mubr.msk.f32.mxu1 %vm3663_vm2, %v3662_v44  ;;  %v1912_v44 = vld [vmem:[#allocation22 + $0x40] sm:$0xff]  ;;  %3154 = vmatpush3.bf16.msra.mxu1 %v3153_v52 }
 0x535   :  { %v3141_v29 = vpack.c.bf16 %v1913_v28, %v1912_v44  ;;  %3155 = vmatprep.subr.bf16.mxu1 %v3664_v42 }
 0x537   :  { %3142 = vmatpush3.bf16.msra.mxu0 %v3141_v29 }
 0x538   :  { %3143 = vmatprep.subr.bf16.mxu0 %v3664_v42  ;;  %3157 = vmatpush3.bf16.msra.mxu1 %v3156_v47 }
 0x539   :  { %3158 = vmatprep.subr.bf16.mxu1 %v3664_v42 }
 0x53b   :  { %3145 = vmatpush3.bf16.msra.mxu0 %v3144_v32 }
 0x53c   :  { %3146 = vmatprep.subr.bf16.mxu0 %v3664_v42  ;;  %3160 = vmatpush3.bf16.msra.mxu1 %v3159_v50 }
 0x53d   :  { %3161 = vmatprep.subr.bf16.mxu1 %v3664_v42 }
 0x53f   :  { %3148 = vmatpush3.bf16.msra.mxu0 %v3147_v35 }
 0x540   :  { %3149 = vmatprep.subr.bf16.mxu0 %v3664_v42  ;;  %3163 = vmatpush3.bf16.msra.mxu1 %v3162_v36 }
 0x541   :  { %3164 = vmatprep.subr.bf16.mxu1 %v3664_v42 }
 0x543   :  { %3151 = vmatpush3.bf16.msra.mxu0 %v3150_v38 }
 0x544   :  { %3166 = vmatpush3.bf16.msra.mxu1 %v3165_v55 }
 0x545   :  { %3167 = vmatprep.subr.bf16.mxu1 %v3664_v42 }
 0x548   :  { %3169 = vmatpush3.bf16.msra.mxu1 %v3168_v43 }
 0x549   :  { %3170 = vmatprep.subr.bf16.mxu1 %v3664_v42 }
 0x54c   :  { %3172 = vmatpush3.bf16.msra.mxu1 %v3171_v4 }
 0x54d   :  { %3173 = vmatprep.subr.bf16.mxu1 %v3664_v42 }
 0x550   :  { %3175 = vmatpush3.bf16.msra.mxu1 %v3174_v7 }
 0x5c6   :  { %v1821_v45 = vpop.f32.mrb[6].mxu1 }
 0x5c7   :  { %v2371_v57 = vpop.f32.mrb[7].mxu1 }
 0x5e6   :  { %v1891_v58 = vpop.f32.mrb[8].mxu1 }
 0x5e7   :  { %v1892_v22 = vadd.f32 %v1891_v58, %v1821_v45  ;;  %v2406_v60 = vpop.f32.mrb[9].mxu1 }
 0x5e9   :  { %v1902_v62 = vadd.f32 %v2200_v59, %v1892_v22 }
 0x5eb   :  { %v1903_v63 = vmax.f32 %v1902_v62, 0.0 }
 0x5ed   :  { %2475 = vmatmul.mubr.f32.vlgmr.msra.gmra.mrb[6].mxu0 %v1903_v63 }
 0x606   :  { %v2002_v0 = vpop.f32.mrb[10].mxu1 }
 0x607   :  { %v2441_v1 = vpop.f32.mrb[11].mxu1 }
 0x6c0   :  { %v2072_v8 = vpop.f32.mrb[6].mxu0 }
 0x6c1   :  { %v2073_v10 = vadd.f32 %v2072_v8, %v2002_v0  ;;  %v2476_v12 = vpop.f32.mrb[7].mxu0 }
 0x6c3   :  { %v2083_v13 = vadd.f32 %v2201_v9, %v2073_v10 }
 0x6c5   :  { %v2084_v14 = vmax.f32 %v2083_v13, 0.0 }
 0x6c7   :  { %2510 = vmatmul.mubr.f32.vlgmr.msra.gmra.mrb[12].mxu1 %v2084_v14 }
 0x79a   :  { %v2174_v16 = vpop.f32.mrb[12].mxu1 }
 0x79b   :  { %v2175_v17 = vadd.f32 %v2202_v15, %v2174_v16  ;;  %v2511_v18 = vpop.f32.mrb[13].mxu1 }
 0x79d   :  { %2178 = vst [vmem:[%s4159_s17] sm:$0x3] %v2175_v17 }
 0x79e   :  { %2183 = vsyncpa [#allocation3], 1 }
 0x79f   :  { %2184 = vsyncpa [#allocation5], 1 }
 0x7a0   :  { %2185 = vsyncpa [#allocation8], 1 }
 0x7a1   :  { %2186 = vsyncpa [#allocation11], 1 }
 0x7a2   :  { %2187 = vsyncpa [#allocation14], 1 }
 0x7a3   :  { %2188 = vsyncpa [#allocation17], 1 }
 0x7a4   :  { %2189 = vsyncpa [#allocation20], 1 }
 0x7a5   :  { %2190 = vsyncpa [#allocation23], 1 }
 0x7a6   :  { %2191 = vsyncpa [#allocation26], 1 }
 0x7a7   :  { %2192 = vsyncpa [#allocation29], 1 }

</bundles_post_ra>
